<compile_context>
chip_gen: v7x
topology: tpu7x:2x2x1
jax: 0.10.0
libtpu: 0.0.40
codegen_flags: <defaults>
</compile_context>

<pallas_src>
import functools

import jax
import jax.numpy as jnp
from jax import lax
from jax.experimental import pallas as pl
from jax.experimental.pallas import tpu as pltpu


# ---------------------------------------------------------------------------
# hardware-aware knobs & tiling helpers
# ---------------------------------------------------------------------------

@functools.lru_cache(maxsize=None)
def _vmem_limit_bytes():
    """Scoped-VMEM budget: half the physical VMEM, capped at 64 MiB.
    128-MiB parts (v5e/v6e) -> 64 MiB; 64-MiB parts (v7x) -> 32 MiB."""
    try:
        cap = getattr(pltpu.get_tpu_info(), "vmem_capacity_bytes", None)
    except Exception:
        cap = None
    if not cap:
        return 32 * 1024 * 1024
    return int(min(cap // 2, 64 * 1024 * 1024))


def _row_tile(n, target):
    """Row-tile size: full extent if small, else a multiple of 8 <= target
    (preferring one that divides n so no partial blocks are generated)."""
    if n <= max(target, 8):
        return n
    t = max(8, (target // 8) * 8)
    for cand in range(t, 7, -8):
        if n % cand == 0:
            return cand
    return t


def _divisor_tile(n, target):
    """Largest divisor of n that is <= target (conv row bands must divide H
    exactly so the fused BN statistics never see padded rows)."""
    t = min(n, max(1, target))
    while n % t:
        t -= 1
    return t


# ---------------------------------------------------------------------------
# kernel 1: row-tiled matmul + bias (ConvTranspose2d 2x2 / stride 2 as a GEMM)
# ---------------------------------------------------------------------------

def _matmul_bias_kernel(x_ref, w_ref, b_ref, o_ref, *, compute_dtype):
    # NOTE: if M % tm != 0 the last block computes on out-of-range rows; Pallas
    # only writes back the in-range part and no epilogue (e.g. stats) depends
    # on those rows, so this is safe.
    x = x_ref[...].astype(compute_dtype)
    o_ref[...] = (jnp.dot(x, w_ref[...], preferred_element_type=jnp.float32)
                  + b_ref[...]).astype(o_ref.dtype)


def matmul_bias(x, w, b, *, out_dtype, compute_dtype=jnp.bfloat16,
                row_tile=4096):
    M, K = x.shape
    _, N = w.shape
    per_row = (K * jnp.dtype(x.dtype).itemsize
               + N * jnp.dtype(out_dtype).itemsize) * 2 + 1      # double-buffered
    cap = max(8, (_vmem_limit_bytes() // 2) // per_row)
    tm = _row_tile(M, min(int(row_tile), int(cap)))
    kernel = functools.partial(_matmul_bias_kernel, compute_dtype=compute_dtype)
    return pl.pallas_call(
        kernel,
        out_shape=jax.ShapeDtypeStruct((M, N), out_dtype),
        grid=(pl.cdiv(M, tm),),
        in_specs=[pl.BlockSpec((tm, K), lambda i: (i, 0)),
                  pl.BlockSpec((K, N), lambda i: (0, 0)),
                  pl.BlockSpec((1, N), lambda i: (0, 0))],
        out_specs=pl.BlockSpec((tm, N), lambda i: (i, 0)),
        compiler_params=pltpu.CompilerParams(
            dimension_semantics=("parallel",),
            vmem_limit_bytes=_vmem_limit_bytes()),
    )(x, w.astype(compute_dtype), b.reshape(1, N).astype(jnp.float32))


def conv_transpose2x2_s2(x_nhwc, w_iohw, b, *, out_dtype, compute_dtype,
                         row_tile=4096):
    """PyTorch ConvTranspose2d(ci, co, 2, stride=2): the 4 (dh, dw) taps are 4
    1x1 convs == one fused GEMM with N = 4*Cout, then an XLA interleave."""
    B, H, W, Cin = x_nhwc.shape
    Cout = w_iohw.shape[1]
    x2d = x_nhwc.reshape(B * H * W, Cin)
    w2d = jnp.transpose(w_iohw, (0, 2, 3, 1)).reshape(Cin, 4 * Cout)
    y = matmul_bias(x2d, w2d, jnp.tile(b, 4), out_dtype=out_dtype,
                    compute_dtype=compute_dtype, row_tile=row_tile)
    y = y.reshape(B, H, W, 2, 2, Cout)
    # TODO(synk): scatter the 4 taps directly from the GEMM out_spec instead of
    # this XLA transpose round-trip of the upsampled tensor.
    return jnp.transpose(y, (0, 1, 3, 2, 4, 5)).reshape(B, 2 * H, 2 * W, Cout)


# ---------------------------------------------------------------------------
# kernel 2: 3x3 "same" conv over an implicit channel concat, banded over output
# rows.  Zero padding, the module's F.pad placement and (optionally) the
# previous layer's BatchNorm+ReLU are applied while building a stacked-K
# (H+2, W, 3*Cin) VMEM scratch once per image; each band then runs 3 deep-K MXU
# dots.  Per-image BN partial statistics (sum / sum-of-squares of the f32
# conv+bias output) are accumulated in the epilogue.
# ---------------------------------------------------------------------------

def _make_conv3x3_kernel(*, srcs, W, th, Cout, Ktot, with_prologue):
    n_src = len(srcs)

    def kernel(*refs):
        i = 0
        x_refs = refs[i:i + n_src]; i += n_src
        if with_prologue:
            scale_ref, shift_ref = refs[i], refs[i + 1]; i += 2
        w_ref, b_ref = refs[i], refs[i + 1]; i += 2
        y_ref, stats_ref, s_ref = refs[i], refs[i + 1], refs[i + 2]

        band = pl.program_id(1)

        @pl.when(band == 0)
        def _fill_scratch():
            # Build the stacked-K padded image once per image (the band axis is
            # "arbitrary"/sequential, so band 0 always runs first per image).
            s_ref[...] = jnp.zeros_like(s_ref)
            stats_ref[...] = jnp.zeros_like(stats_ref)
            base = 0
            for x_ref, (Hi, Wi, Ci, ph, pw, c0) in zip(x_refs, srcs):
                xi = x_ref[0]                                  # (Hi, Wi, Ci)
                if with_prologue:
                    sc = scale_ref[:, c0:c0 + Ci].reshape(1, 1, Ci)
                    sh = shift_ref[:, c0:c0 + Ci].reshape(1, 1, Ci)
                    xi = jnp.maximum(xi.astype(jnp.float32) * sc + sh, 0.0)
                xi = xi.astype(s_ref.dtype)
                for dw in range(3):
                    w_lo = max(0, pw - dw)
                    w_hi = min(W, pw - dw + Wi)
                    if w_hi <= w_lo:
                        continue
                    src_lo = w_lo + dw - pw
                    s_ref[ph:ph + Hi, w_lo:w_hi,
                          base + dw * Ci: base + (dw + 1) * Ci] = (
                              xi[:, src_lo:src_lo + (w_hi - w_lo), :])
                base += 3 * Ci

        row0 = band * th
        acc = jnp.zeros((th * W, Cout), jnp.float32)
        for dh in range(3):
            patch = s_ref[pl.ds(row0 + dh, th), :, :].reshape(th * W, Ktot)
            acc = acc + jnp.dot(patch, w_ref[dh],
                                preferred_element_type=jnp.float32)
        y = acc + b_ref[...]                                   # f32 epilogue
        y_ref[0] = y.reshape(th, W, Cout).astype(y_ref.dtype)

        # Per-image BN partials, accumulated in the resident stats block.
        s = jnp.sum(y, axis=0, keepdims=True)                  # (1, Cout)
        ss = jnp.sum(y * y, axis=0, keepdims=True)             # (1, Cout)
        stats_ref[0] = stats_ref[0] + jnp.concatenate([s, ss], axis=0)

    return kernel


def conv3x3_fused(sources, w_hwio, bias, out_hw, *, prologue=None,
                  io_dtype=jnp.bfloat16, compute_dtype=jnp.bfloat16,
                  band_rows=None):
    """3x3 "same" conv (+bias) over the implicit channel concat of `sources`.

    sources  : list of (x, (row_off, col_off)); x is NHWC (B, Hi, Wi, Ci) and is
               placed at that offset inside the conv's zero-padded (H+2, W+2)
               canvas (offset (1, 1) == no extra padding).  List order must
               match the concat channel order.
    w_hwio   : (3, 3, sum(Ci), Cout) HWIO weights.
    prologue : optional (scale, shift), each (sum(Ci),) f32 — applies
               relu(x*scale + shift) to every source before the conv (fuses the
               previous layer's BatchNorm+ReLU into this kernel).
    Returns (y, stats): y (B, H, W, Cout) in io_dtype (pre-BN conv output) and
    stats (B, 2, Cout) f32 per-image [sum, sum_of_squares] of the f32 output.
    """
    H, W = out_hw
    B = sources[0][0].shape[0]
    Cout = w_hwio.shape[3]

    src_cfg, ch_off = [], 0
    for x, (ph, pw) in sources:
        Bi, Hi, Wi, Ci = x.shape
        assert Bi == B
        assert ph >= 1 and pw >= 1 and ph + Hi <= H + 1 and pw + Wi <= W + 1, \
            "source does not fit inside the conv canvas"
        src_cfg.append((Hi, Wi, Ci, ph, pw, ch_off))
        ch_off += Ci
    Cin_tot = ch_off
    assert w_hwio.shape == (3, 3, Cin_tot, Cout), w_hwio.shape
    Ktot = 3 * Cin_tot
    with_prologue = prologue is not None

    # Stacked weights: per dh, rows ordered [src0: dw0,dw1,dw2, src1: ...].
    per_dh = []
    for dh in range(3):
        chunks = []
        for (Hi, Wi, Ci, ph, pw, c0) in src_cfg:
            for dw in range(3):
                chunks.append(w_hwio[dh, dw, c0:c0 + Ci, :])
        per_dh.append(jnp.concatenate(chunks, axis=0))
    w_stk = jnp.stack(per_dh, axis=0).astype(compute_dtype)     # (3, Ktot, Cout)

    th = _divisor_tile(H, band_rows if band_rows is not None
                       else max(1, 2048 // max(W, 1)))
    n_bands = H // th

    src_arrays = [x for x, _ in sources]
    in_specs = [pl.BlockSpec((1,) + x.shape[1:], lambda bi, r: (bi, 0, 0, 0))
                for x in src_arrays]
    operands = list(src_arrays)
    if with_prologue:
        sc, sh = prologue
        operands += [sc.reshape(1, Cin_tot).astype(jnp.float32),
                     sh.reshape(1, Cin_tot).astype(jnp.float32)]
        in_specs += [pl.BlockSpec((1, Cin_tot), lambda bi, r: (0, 0)),
                     pl.BlockSpec((1, Cin_tot), lambda bi, r: (0, 0))]
    operands += [w_stk, bias.reshape(1, Cout).astype(jnp.float32)]
    in_specs += [pl.BlockSpec((3, Ktot, Cout), lambda bi, r: (0, 0, 0)),
                 pl.BlockSpec((1, Cout), lambda bi, r: (0, 0))]

    kernel = _make_conv3x3_kernel(srcs=tuple(src_cfg), W=W, th=th, Cout=Cout,
                                  Ktot=Ktot, with_prologue=with_prologue)

    y, stats = pl.pallas_call(
        kernel,
        out_shape=(jax.ShapeDtypeStruct((B, H, W, Cout), io_dtype),
                   jax.ShapeDtypeStruct((B, 2, Cout), jnp.float32)),
        grid=(B, n_bands),
        in_specs=in_specs,
        out_specs=(pl.BlockSpec((1, th, W, Cout), lambda bi, r: (bi, r, 0, 0)),
                   pl.BlockSpec((1, 2, Cout), lambda bi, r: (bi, 0, 0))),
        scratch_shapes=[pltpu.VMEM((H + 2, W, Ktot), compute_dtype)],
        # Batch axis parallel (megacore on v7x wants B >= 2); band axis must be
        # sequential: the stacked scratch is filled at band 0 and the per-image
        # stats block is accumulated across bands.
        compiler_params=pltpu.CompilerParams(
            dimension_semantics=("parallel", "arbitrary"),
            vmem_limit_bytes=_vmem_limit_bytes()),
    )(*operands)
    return y, stats


# ---------------------------------------------------------------------------
# BatchNorm(train-mode) scale/shift from fused stats + final apply kernel
# ---------------------------------------------------------------------------

def bn_scale_shift(stats, gamma, beta, count, eps=1e-5):
    tot = jnp.sum(stats.astype(jnp.float32), axis=0)             # (2, C)
    mean = tot[0] / count
    var = tot[1] / count - mean * mean                           # biased (training)
    scale = gamma.astype(jnp.float32) * lax.rsqrt(var + eps)
    shift = beta.astype(jnp.float32) - mean * scale
    return scale, shift


def _scale_shift_relu_kernel(x_ref, s_ref, t_ref, o_ref):
    x = x_ref[...].astype(jnp.float32)
    o_ref[...] = jnp.maximum(x * s_ref[...] + t_ref[...], 0.0).astype(o_ref.dtype)


def scale_shift_relu(y, scale, shift, *, out_dtype=jnp.float32):
    """relu(y*scale + shift) on a lane-dense (B*H, W*C) view; row tile derived
    from a VMEM byte budget (not a fixed row count)."""
    B, H, W, C = y.shape
    R, L = B * H, W * C
    x2d = y.reshape(R, L)
    s_row = jnp.tile(scale, W).reshape(1, L).astype(jnp.float32)
    t_row = jnp.tile(shift, W).reshape(1, L).astype(jnp.float32)

    limit = _vmem_limit_bytes()
    per_row = L * (jnp.dtype(y.dtype).itemsize
                   + jnp.dtype(out_dtype).itemsize) * 2 + 1      # double-buffered
    tr = _row_tile(R, max(8, int((limit // 2) // per_row)))

    out = pl.pallas_call(
        _scale_shift_relu_kernel,
        out_shape=jax.ShapeDtypeStruct((R, L), out_dtype),
        grid=(pl.cdiv(R, tr),),
        in_specs=[pl.BlockSpec((tr, L), lambda i: (i, 0)),
                  pl.BlockSpec((1, L), lambda i: (0, 0)),
                  pl.BlockSpec((1, L), lambda i: (0, 0))],
        out_specs=pl.BlockSpec((tr, L), lambda i: (i, 0)),
        compiler_params=pltpu.CompilerParams(
            dimension_semantics=("parallel",),
            vmem_limit_bytes=limit),
    )(x2d, s_row, t_row)
    return out.reshape(B, H, W, C)


# ---------------------------------------------------------------------------
# deconv forward (glue in JAX, compute in the kernels above)
# ---------------------------------------------------------------------------

def deconv_forward(x1_nchw, x2_nchw, p, *, io_dtype=jnp.bfloat16,
                   compute_dtype=jnp.bfloat16, row_tile=4096, band_rows=None):
    # NCHW -> NHWC; cast to the inter-kernel I/O dtype here so XLA fuses the
    # cast into the transpose (bf16 activations halve HBM traffic end to end).
    x1 = jnp.transpose(x1_nchw, (0, 2, 3, 1)).astype(io_dtype)
    x2 = jnp.transpose(x2_nchw, (0, 2, 3, 1)).astype(io_dtype)
    B = x1.shape[0]

    # --- upsample: ConvTranspose2d(ci, co, 2, stride=2) as one fused GEMM ---
    up = conv_transpose2x2_s2(x1, p["up_w"], p["up_b"], out_dtype=io_dtype,
                              compute_dtype=compute_dtype, row_tile=row_tile)

    # --- F.pad(x1, (diffX, 0, diffY, 0)) folded into conv1's canvas offsets ---
    # PyTorch: diffX/diffY are the H/W deltas but F.pad applies diffX to W-left
    # and diffY to H-top; the module's semantics are reproduced exactly.
    H, W = x2.shape[1], x2.shape[2]
    diffX = H - up.shape[1]
    diffY = W - up.shape[2]
    assert diffX >= 0 and diffY >= 0, "upsampled x1 larger than x2"
    off_up = (1 + diffY, 1 + diffX)         # (row, col) offset in padded canvas

    c2 = x2.shape[-1]

    # --- conv1 over the implicit concat cat([x2, x1_up]); zero padding and the
    #     F.pad placement are done inside the kernel's stacked-K VMEM scratch ---
    w1 = jnp.transpose(p["c1_w"], (2, 3, 1, 0))     # OIHW -> HWIO
    y1, st1 = conv3x3_fused([(x2, (1, 1)), (up, off_up)], w1, p["c1_b"],
                            (H, W), prologue=None, io_dtype=io_dtype,
                            compute_dtype=compute_dtype, band_rows=band_rows)
    s1, t1 = bn_scale_shift(st1, p["c1_g"], p["c1_beta"], B * H * W)

    # --- conv2; conv1's BatchNorm+ReLU is fused into its input prologue ---
    w2 = jnp.transpose(p["c2_w"], (2, 3, 1, 0))
    y2, st2 = conv3x3_fused([(y1, (1, 1))], w2, p["c2_b"], (H, W),
                            prologue=(s1, t1), io_dtype=io_dtype,
                            compute_dtype=compute_dtype, band_rows=band_rows)
    s2, t2 = bn_scale_shift(st2, p["c2_g"], p["c2_beta"], B * H * W)

    out = scale_shift_relu(y2, s2, t2)              # (B, H, W, co) f32
    return jnp.transpose(out, (0, 3, 1, 2))         # NHWC -> NCHW


def init_params(key, ci, co):
    ks = jax.random.split(key, 6)
    return {
        "up_w": jax.random.normal(ks[0], (ci, co, 2, 2), jnp.float32) * 0.1,
        "up_b": jax.random.normal(ks[1], (co,), jnp.float32) * 0.1,
        "c1_w": jax.random.normal(ks[2], (co, ci, 3, 3), jnp.float32) * 0.1,
        "c1_b": jax.random.normal(ks[3], (co,), jnp.float32) * 0.1,
        "c1_g": jnp.ones((co,), jnp.float32),
        "c1_beta": jnp.zeros((co,), jnp.float32),
        "c2_w": jax.random.normal(ks[4], (co, co, 3, 3), jnp.float32) * 0.1,
        "c2_b": jax.random.normal(ks[5], (co,), jnp.float32) * 0.1,
        "c2_g": jnp.ones((co,), jnp.float32),
        "c2_beta": jnp.zeros((co,), jnp.float32),
    }


# ---------------------------------------------------------------------------
# Pure-JAX reference (NCHW, mirrors PyTorch exactly) for validation
# ---------------------------------------------------------------------------

def ref_forward(x1, x2, p):
    y = jnp.einsum("bchw,coij->bohiwj", x1, p["up_w"],
                   precision=lax.Precision.HIGHEST)
    B, co, H, _, W, _ = y.shape
    y = y.reshape(B, co, 2 * H, 2 * W) + p["up_b"][None, :, None, None]
    diffX = x2.shape[2] - y.shape[2]
    diffY = x2.shape[3] - y.shape[3]
    y = jnp.pad(y, ((0, 0), (0, 0), (diffY, 0), (diffX, 0)))
    x = jnp.concatenate([x2, y], axis=1)

    def conv_bn_relu(x, w, b, g, beta):
        x = lax.conv_general_dilated(
            x, w, (1, 1), ((1, 1), (1, 1)),
            dimension_numbers=("NCHW", "OIHW", "NCHW"),
            precision=lax.Precision.HIGHEST)
        x = x + b[None, :, None, None]
        mean = jnp.mean(x, axis=(0, 2, 3), keepdims=True)
        var = jnp.mean((x - mean) ** 2, axis=(0, 2, 3), keepdims=True)
        x = (x - mean) / jnp.sqrt(var + 1e-5)
        x = x * g[None, :, None, None] + beta[None, :, None, None]
        return jnp.maximum(x, 0.0)

    x = conv_bn_relu(x, p["c1_w"], p["c1_b"], p["c1_g"], p["c1_beta"])
    x = conv_bn_relu(x, p["c2_w"], p["c2_b"], p["c2_g"], p["c2_beta"])
    return x


if __name__ == "__main__":
    ci, co = 8, 4
    B, H1, W1 = 2, 8, 8              # x1: (B, ci, H1, W1); upsample -> 2x spatial

    key = jax.random.PRNGKey(0)
    k1, k2, k3, kp = jax.random.split(key, 4)
    params = init_params(kp, ci, co)
    x1 = jax.random.normal(k1, (B, ci, H1, W1), jnp.float32)

    fwd_f32 = jax.jit(functools.partial(
        deconv_forward, io_dtype=jnp.float32, compute_dtype=jnp.float32,
        row_tile=64, band_rows=8))
    fwd = jax.jit(deconv_forward)    # default performance path (bf16 I/O + MXU)

    # 1) f32 path, diffX = diffY = 0, deliberately small tiles (multi-block
    #    GEMM grid, multi-band conv, accumulated stats); tight tolerance.
    x2 = jax.random.normal(k2, (B, ci - co, 2 * H1, 2 * W1), jnp.float32)
    ref = jax.block_until_ready(ref_forward(x1, x2, params))
    out32 = jax.block_until_ready(fwd_f32(x1, x2, params))
    assert out32.shape == ref.shape == (B, co, 2 * H1, 2 * W1)
    err = float(jnp.max(jnp.abs(out32 - ref)))
    if err > 2e-3:
        raise AssertionError(f"f32 path mismatch vs reference: max abs err = {err}")

    # 2) f32 path with a non-trivial F.pad placement (diffX = diffY = 8):
    #    exercises the in-kernel canvas offsets for the upsampled tensor.
    x2b = jax.random.normal(k3, (B, ci - co, 2 * H1 + 8, 2 * W1 + 8), jnp.float32)
    refb = jax.block_until_ready(ref_forward(x1, x2b, params))
    outb = jax.block_until_ready(fwd_f32(x1, x2b, params))
    assert outb.shape == refb.shape
    errb = float(jnp.max(jnp.abs(outb - refb)))
    if errb > 2e-3:
        raise AssertionError(f"f32 padded-path mismatch: max abs err = {errb}")

    # 3) default performance path (bf16 activations + bf16 MXU operands, f32
    #    accumulation / BN stats); tolerance relaxed for bf16 rounding.
    out = jax.block_until_ready(fwd(x1, x2, params))
    assert out.shape == ref.shape
    max_err = float(jnp.max(jnp.abs(out - ref)))
    rel_rms = float(jnp.sqrt(jnp.mean((out - ref) ** 2)
                             / (jnp.mean(ref ** 2) + 1e-12)))
    if max_err > 0.25 or rel_rms > 0.06:
        raise AssertionError(
            f"bf16 path mismatch vs reference: max abs {max_err}, rel rms {rel_rms}")

    print("KERNEL_OK")
</pallas_src>

<mosaic_0001>
module attributes {stable_mosaic.version = 11 : i64} {
  func.func @_matmul_bias_kernel(%arg0: i32, %arg1: memref<64x8xf32, #tpu.memory_space<vmem>>, %arg2: memref<8x16xf32, #tpu.memory_space<vmem>>, %arg3: memref<1x16xf32, #tpu.memory_space<vmem>>, %arg4: memref<64x16xf32, #tpu.memory_space<vmem>>) attributes {dimension_semantics = [#tpu.dimension_semantics<parallel>], iteration_bounds = array<i64: 2>, scalar_prefetch = 0 : i64, scratch_operands = 0 : i64, tpu.core_type = #tpu.core_type<tc>, window_params = [{transform_indices = @transform_0, window_bounds = array<i64: 64, 8>}, {pipeline_mode = #tpu.pipeline_mode<synchronous>, transform_indices = @transform_1, window_bounds = array<i64: 8, 16>}, {pipeline_mode = #tpu.pipeline_mode<synchronous>, transform_indices = @transform_2, window_bounds = array<i64: 1, 16>}, {transform_indices = @transform_3, window_bounds = array<i64: 64, 16>}]} {
    %c0 = arith.constant 0 : index
    %c0_0 = arith.constant 0 : index
    %0 = vector.load %arg1[%c0, %c0_0] : memref<64x8xf32, #tpu.memory_space<vmem>>, vector<64x8xf32>
    %c0_1 = arith.constant 0 : index
    %c0_2 = arith.constant 0 : index
    %1 = vector.load %arg2[%c0_1, %c0_2] : memref<8x16xf32, #tpu.memory_space<vmem>>, vector<8x16xf32>
    %cst = arith.constant dense<0.000000e+00> : vector<64x16xf32>
    %2 = tpu.matmul %0, %1, %cst {dimension_numbers = #tpu.dot_dimension_numbers<[1], [0], [0], [1], [0, 0, 1, 1], [], []>} : vector<64x8xf32>, vector<8x16xf32>, vector<64x16xf32> -> vector<64x16xf32>
    %c0_3 = arith.constant 0 : index
    %c0_4 = arith.constant 0 : index
    %3 = vector.load %arg3[%c0_3, %c0_4] : memref<1x16xf32, #tpu.memory_space<vmem>>, vector<1x16xf32>
    %4 = vector.broadcast %3 : vector<1x16xf32> to vector<64x16xf32>
    %5 = arith.addf %2, %4 : vector<64x16xf32>
    %c0_5 = arith.constant 0 : index
    %c0_6 = arith.constant 0 : index
    %6 = vector.load %arg4[%c0_5, %c0_6] : memref<64x16xf32, #tpu.memory_space<vmem>>, vector<64x16xf32>
    tpu.vector_store %arg4[%c0_5, %c0_6], %5 {strides = array<i32>} : memref<64x16xf32, #tpu.memory_space<vmem>>, vector<64x16xf32>,
    return
  }
  func.func @transform_0(%arg0: i32) -> (i32, i32) {
    %c0_i32 = arith.constant 0 : i32
    %c0_i32_0 = arith.constant 0 : i32
    return %arg0, %c0_i32 : i32, i32
  }
  func.func @transform_1(%arg0: i32) -> (i32, i32) {
    %c0_i32 = arith.constant 0 : i32
    %c0_i32_0 = arith.constant 0 : i32
    %c0_i32_1 = arith.constant 0 : i32
    return %c0_i32, %c0_i32_0 : i32, i32
  }
  func.func @transform_2(%arg0: i32) -> (i32, i32) {
    %c0_i32 = arith.constant 0 : i32
    %c0_i32_0 = arith.constant 0 : i32
    %c0_i32_1 = arith.constant 0 : i32
    return %c0_i32, %c0_i32_0 : i32, i32
  }
  func.func @transform_3(%arg0: i32) -> (i32, i32) {
    %c0_i32 = arith.constant 0 : i32
    %c0_i32_0 = arith.constant 0 : i32
    return %arg0, %c0_i32 : i32, i32
  }
}

module attributes {stable_mosaic.version = 11 : i64} {
  func.func @kernel(%arg0: i32, %arg1: i32, %arg2: memref<1x16x16x4xf32, #tpu.memory_space<vmem>>, %arg3: memref<1x16x16x4xf32, #tpu.memory_space<vmem>>, %arg4: memref<3x24x4xf32, #tpu.memory_space<vmem>>, %arg5: memref<1x4xf32, #tpu.memory_space<vmem>>, %arg6: memref<1x8x16x4xf32, #tpu.memory_space<vmem>>, %arg7: memref<1x2x4xf32, #tpu.memory_space<vmem>>, %arg8: memref<18x16x24xf32, #tpu.memory_space<vmem>>) attributes {dimension_semantics = [#tpu.dimension_semantics<parallel>, #tpu.dimension_semantics<arbitrary>], iteration_bounds = array<i64: 2, 2>, scalar_prefetch = 0 : i64, scratch_operands = 1 : i64, tpu.core_type = #tpu.core_type<tc>, window_params = [{transform_indices = @transform_0, window_bounds = array<i64: 1, 16, 16, 4>}, {transform_indices = @transform_1, window_bounds = array<i64: 1, 16, 16, 4>}, {pipeline_mode = #tpu.pipeline_mode<synchronous>, transform_indices = @transform_2, window_bounds = array<i64: 3, 24, 4>}, {pipeline_mode = #tpu.pipeline_mode<synchronous>, transform_indices = @transform_3, window_bounds = array<i64: 1, 4>}, {transform_indices = @transform_4, window_bounds = array<i64: 1, 8, 16, 4>}, {transform_indices = @transform_5, window_bounds = array<i64: 1, 2, 4>}]} {
    %c0_i32 = arith.constant 0 : i32
    %0 = arith.cmpi eq, %arg1, %c0_i32 : i32
    %1 = arith.extui %0 : i1 to i32
    %c0_i32_0 = arith.constant 0 : i32
    %2 = arith.cmpi ne, %1, %c0_i32_0 : i32
    scf.if %2 {
      %cst_31 = arith.constant 0.000000e+00 : f32
      %48 = vector.broadcast %cst_31 : f32 to vector<18x16x24xf32>
      %c0_32 = arith.constant 0 : index
      %c0_33 = arith.constant 0 : index
      %c0_34 = arith.constant 0 : index
      %49 = vector.load %arg8[%c0_32, %c0_33, %c0_34] : memref<18x16x24xf32, #tpu.memory_space<vmem>>, vector<18x16x24xf32>
      tpu.vector_store %arg8[%c0_32, %c0_33, %c0_34], %48 {strides = array<i32>} : memref<18x16x24xf32, #tpu.memory_space<vmem>>, vector<18x16x24xf32>,
      %cst_35 = arith.constant 0.000000e+00 : f32
      %50 = vector.broadcast %cst_35 : f32 to vector<1x2x4xf32>
      %c0_36 = arith.constant 0 : index
      %c0_37 = arith.constant 0 : index
      %c0_38 = arith.constant 0 : index
      %51 = vector.load %arg7[%c0_36, %c0_37, %c0_38] : memref<1x2x4xf32, #tpu.memory_space<vmem>>, vector<1x2x4xf32>
      tpu.vector_store %arg7[%c0_36, %c0_37, %c0_38], %50 {strides = array<i32>} : memref<1x2x4xf32, #tpu.memory_space<vmem>>, vector<1x2x4xf32>,
      %c0_39 = arith.constant 0 : index
      %c0_40 = arith.constant 0 : index
      %c0_41 = arith.constant 0 : index
      %c0_42 = arith.constant 0 : index
      %52 = vector.load %arg2[%c0_39, %c0_40, %c0_41, %c0_42] : memref<1x16x16x4xf32, #tpu.memory_space<vmem>>, vector<1x16x16x4xf32>
      %53 = vector.shape_cast %52 : vector<1x16x16x4xf32> to vector<16x16x4xf32>
      %54 = vector.extract_strided_slice %53 {offsets = [0, 0, 0], sizes = [16, 15, 4], strides = [1, 1, 1]} : vector<16x16x4xf32> to vector<16x15x4xf32>
      %c1_43 = arith.constant 1 : index
      %c1_44 = arith.constant 1 : index
      %c0_45 = arith.constant 0 : index
      %55 = vector.load %arg8[%c1_43, %c1_44, %c0_45] : memref<18x16x24xf32, #tpu.memory_space<vmem>>, vector<16x15x4xf32>
      tpu.vector_store %arg8[%c1_43, %c1_44, %c0_45], %54 {strides = array<i32>} : memref<18x16x24xf32, #tpu.memory_space<vmem>>, vector<16x15x4xf32>,
      %c1_46 = arith.constant 1 : index
      %c0_47 = arith.constant 0 : index
      %c4 = arith.constant 4 : index
      %56 = vector.load %arg8[%c1_46, %c0_47, %c4] : memref<18x16x24xf32, #tpu.memory_space<vmem>>, vector<16x16x4xf32>
      tpu.vector_store %arg8[%c1_46, %c0_47, %c4], %53 {strides = array<i32>} : memref<18x16x24xf32, #tpu.memory_space<vmem>>, vector<16x16x4xf32>,
      %57 = vector.extract_strided_slice %53 {offsets = [0, 1, 0], sizes = [16, 15, 4], strides = [1, 1, 1]} : vector<16x16x4xf32> to vector<16x15x4xf32>
      %c1_48 = arith.constant 1 : index
      %c0_49 = arith.constant 0 : index
      %c8 = arith.constant 8 : index
      %58 = vector.load %arg8[%c1_48, %c0_49, %c8] : memref<18x16x24xf32, #tpu.memory_space<vmem>>, vector<16x15x4xf32>
      tpu.vector_store %arg8[%c1_48, %c0_49, %c8], %57 {strides = array<i32>} : memref<18x16x24xf32, #tpu.memory_space<vmem>>, vector<16x15x4xf32>,
      %c0_50 = arith.constant 0 : index
      %c0_51 = arith.constant 0 : index
      %c0_52 = arith.constant 0 : index
      %c0_53 = arith.constant 0 : index
      %59 = vector.load %arg3[%c0_50, %c0_51, %c0_52, %c0_53] : memref<1x16x16x4xf32, #tpu.memory_space<vmem>>, vector<1x16x16x4xf32>
      %60 = vector.shape_cast %59 : vector<1x16x16x4xf32> to vector<16x16x4xf32>
      %61 = vector.extract_strided_slice %60 {offsets = [0, 0, 0], sizes = [16, 15, 4], strides = [1, 1, 1]} : vector<16x16x4xf32> to vector<16x15x4xf32>
      %c1_54 = arith.constant 1 : index
      %c1_55 = arith.constant 1 : index
      %c12 = arith.constant 12 : index
      %62 = vector.load %arg8[%c1_54, %c1_55, %c12] : memref<18x16x24xf32, #tpu.memory_space<vmem>>, vector<16x15x4xf32>
      tpu.vector_store %arg8[%c1_54, %c1_55, %c12], %61 {strides = array<i32>} : memref<18x16x24xf32, #tpu.memory_space<vmem>>, vector<16x15x4xf32>,
      %c1_56 = arith.constant 1 : index
      %c0_57 = arith.constant 0 : index
      %c16 = arith.constant 16 : index
      %63 = vector.load %arg8[%c1_56, %c0_57, %c16] : memref<18x16x24xf32, #tpu.memory_space<vmem>>, vector<16x16x4xf32>
      tpu.vector_store %arg8[%c1_56, %c0_57, %c16], %60 {strides = array<i32>} : memref<18x16x24xf32, #tpu.memory_space<vmem>>, vector<16x16x4xf32>,
      %64 = vector.extract_strided_slice %60 {offsets = [0, 1, 0], sizes = [16, 15, 4], strides = [1, 1, 1]} : vector<16x16x4xf32> to vector<16x15x4xf32>
      %c1_58 = arith.constant 1 : index
      %c0_59 = arith.constant 0 : index
      %c20 = arith.constant 20 : index
      %65 = vector.load %arg8[%c1_58, %c0_59, %c20] : memref<18x16x24xf32, #tpu.memory_space<vmem>>, vector<16x15x4xf32>
      tpu.vector_store %arg8[%c1_58, %c0_59, %c20], %64 {strides = array<i32>} : memref<18x16x24xf32, #tpu.memory_space<vmem>>, vector<16x15x4xf32>,
    } else {
    }
    %c8_i32 = arith.constant 8 : i32
    %3 = arith.muli %arg1, %c8_i32 : i32
    %cst = arith.constant 0.000000e+00 : f32
    %4 = vector.broadcast %cst : f32 to vector<128x4xf32>
    %c0_i32_1 = arith.constant 0 : i32
    %5 = arith.addi %3, %c0_i32_1 : i32
    %6 = arith.index_cast %5 : i32 to index
    %c0 = arith.constant 0 : index
    %c0_2 = arith.constant 0 : index
    %7 = vector.load %arg8[%6, %c0, %c0_2] : memref<18x16x24xf32, #tpu.memory_space<vmem>>, vector<8x16x24xf32>
    %8 = vector.shape_cast %7 : vector<8x16x24xf32> to vector<128x24xf32>
    %c0_3 = arith.constant 0 : index
    %c0_4 = arith.constant 0 : index
    %c0_5 = arith.constant 0 : index
    %9 = vector.load %arg4[%c0_3, %c0_4, %c0_5] : memref<3x24x4xf32, #tpu.memory_space<vmem>>, vector<1x24x4xf32>
    %10 = vector.shape_cast %9 : vector<1x24x4xf32> to vector<24x4xf32>
    %cst_6 = arith.constant dense<0.000000e+00> : vector<128x4xf32>
    %11 = tpu.matmul %8, %10, %cst_6 {dimension_numbers = #tpu.dot_dimension_numbers<[1], [0], [0], [1], [0, 0, 1, 1], [], []>} : vector<128x24xf32>, vector<24x4xf32>, vector<128x4xf32> -> vector<128x4xf32>
    %12 = arith.addf %4, %11 : vector<128x4xf32>
    %c1_i32 = arith.constant 1 : i32
    %13 = arith.addi %3, %c1_i32 : i32
    %14 = arith.index_cast %13 : i32 to index
    %c0_7 = arith.constant 0 : index
    %c0_8 = arith.constant 0 : index
    %15 = vector.load %arg8[%14, %c0_7, %c0_8] : memref<18x16x24xf32, #tpu.memory_space<vmem>>, vector<8x16x24xf32>
    %16 = vector.shape_cast %15 : vector<8x16x24xf32> to vector<128x24xf32>
    %c1 = arith.constant 1 : index
    %c0_9 = arith.constant 0 : index
    %c0_10 = arith.constant 0 : index
    %17 = vector.load %arg4[%c1, %c0_9, %c0_10] : memref<3x24x4xf32, #tpu.memory_space<vmem>>, vector<1x24x4xf32>
    %18 = vector.shape_cast %17 : vector<1x24x4xf32> to vector<24x4xf32>
    %cst_11 = arith.constant dense<0.000000e+00> : vector<128x4xf32>
    %19 = tpu.matmul %16, %18, %cst_11 {dimension_numbers = #tpu.dot_dimension_numbers<[1], [0], [0], [1], [0, 0, 1, 1], [], []>} : vector<128x24xf32>, vector<24x4xf32>, vector<128x4xf32> -> vector<128x4xf32>
    %20 = arith.addf %12, %19 : vector<128x4xf32>
    %c2_i32 = arith.constant 2 : i32
    %21 = arith.addi %3, %c2_i32 : i32
    %22 = arith.index_cast %21 : i32 to index
    %c0_12 = arith.constant 0 : index
    %c0_13 = arith.constant 0 : index
    %23 = vector.load %arg8[%22, %c0_12, %c0_13] : memref<18x16x24xf32, #tpu.memory_space<vmem>>, vector<8x16x24xf32>
    %24 = vector.shape_cast %23 : vector<8x16x24xf32> to vector<128x24xf32>
    %c2 = arith.constant 2 : index
    %c0_14 = arith.constant 0 : index
    %c0_15 = arith.constant 0 : index
    %25 = vector.load %arg4[%c2, %c0_14, %c0_15] : memref<3x24x4xf32, #tpu.memory_space<vmem>>, vector<1x24x4xf32>
    %26 = vector.shape_cast %25 : vector<1x24x4xf32> to vector<24x4xf32>
    %cst_16 = arith.constant dense<0.000000e+00> : vector<128x4xf32>
    %27 = tpu.matmul %24, %26, %cst_16 {dimension_numbers = #tpu.dot_dimension_numbers<[1], [0], [0], [1], [0, 0, 1, 1], [], []>} : vector<128x24xf32>, vector<24x4xf32>, vector<128x4xf32> -> vector<128x4xf32>
    %28 = arith.addf %20, %27 : vector<128x4xf32>
    %c0_17 = arith.constant 0 : index
    %c0_18 = arith.constant 0 : index
    %29 = vector.load %arg5[%c0_17, %c0_18] : memref<1x4xf32, #tpu.memory_space<vmem>>, vector<1x4xf32>
    %30 = vector.broadcast %29 : vector<1x4xf32> to vector<128x4xf32>
    %31 = arith.addf %28, %30 : vector<128x4xf32>
    %32 = vector.shape_cast %31 : vector<128x4xf32> to vector<8x16x4xf32>
    %c0_19 = arith.constant 0 : index
    %c0_20 = arith.constant 0 : index
    %c0_21 = arith.constant 0 : index
    %c0_22 = arith.constant 0 : index
    %33 = vector.load %arg6[%c0_19, %c0_20, %c0_21, %c0_22] : memref<1x8x16x4xf32, #tpu.memory_space<vmem>>, vector<1x8x16x4xf32>
    %34 = vector.shape_cast %33 : vector<1x8x16x4xf32> to vector<8x16x4xf32>
    %35 = vector.shape_cast %32 : vector<8x16x4xf32> to vector<1x8x16x4xf32>
    tpu.vector_store %arg6[%c0_19, %c0_20, %c0_21, %c0_22], %35 {strides = array<i32>} : memref<1x8x16x4xf32, #tpu.memory_space<vmem>>, vector<1x8x16x4xf32>,
    %cst_23 = arith.constant dense<0.000000e+00> : vector<4xf32>
    %36 = vector.multi_reduction <add>, %31, %cst_23 [0] : vector<128x4xf32> to vector<4xf32>
    %37 = vector.shape_cast %36 : vector<4xf32> to vector<1x4xf32>
    %38 = arith.mulf %31, %31 : vector<128x4xf32>
    %cst_24 = arith.constant dense<0.000000e+00> : vector<4xf32>
    %39 = vector.multi_reduction <add>, %38, %cst_24 [0] : vector<128x4xf32> to vector<4xf32>
    %40 = vector.shape_cast %39 : vector<4xf32> to vector<1x4xf32>
    %c0_25 = arith.constant 0 : index
    %c0_26 = arith.constant 0 : index
    %c0_27 = arith.constant 0 : index
    %41 = vector.load %arg7[%c0_25, %c0_26, %c0_27] : memref<1x2x4xf32, #tpu.memory_space<vmem>>, vector<1x2x4xf32>
    %42 = vector.shape_cast %41 : vector<1x2x4xf32> to vector<2x4xf32>
    %43 = tpu.concatenate %37, %40 in 0 : vector<1x4xf32>, vector<1x4xf32> -> vector<2x4xf32>
    %44 = arith.addf %42, %43 : vector<2x4xf32>
    %c0_28 = arith.constant 0 : index
    %c0_29 = arith.constant 0 : index
    %c0_30 = arith.constant 0 : index
    %45 = vector.load %arg7[%c0_28, %c0_29, %c0_30] : memref<1x2x4xf32, #tpu.memory_space<vmem>>, vector<1x2x4xf32>
    %46 = vector.shape_cast %45 : vector<1x2x4xf32> to vector<2x4xf32>
    %47 = vector.shape_cast %44 : vector<2x4xf32> to vector<1x2x4xf32>
    tpu.vector_store %arg7[%c0_28, %c0_29, %c0_30], %47 {strides = array<i32>} : memref<1x2x4xf32, #tpu.memory_space<vmem>>, vector<1x2x4xf32>,
    return
  }
  func.func @transform_0(%arg0: i32, %arg1: i32) -> (i32, i32, i32, i32) {
    %c0_i32 = arith.constant 0 : i32
    %c0_i32_0 = arith.constant 0 : i32
    %c0_i32_1 = arith.constant 0 : i32
    %c0_i32_2 = arith.constant 0 : i32
    return %arg0, %c0_i32, %c0_i32_0, %c0_i32_1 : i32, i32, i32, i32
  }
  func.func @transform_1(%arg0: i32, %arg1: i32) -> (i32, i32, i32, i32) {
    %c0_i32 = arith.constant 0 : i32
    %c0_i32_0 = arith.constant 0 : i32
    %c0_i32_1 = arith.constant 0 : i32
    %c0_i32_2 = arith.constant 0 : i32
    return %arg0, %c0_i32, %c0_i32_0, %c0_i32_1 : i32, i32, i32, i32
  }
  func.func @transform_2(%arg0: i32, %arg1: i32) -> (i32, i32, i32) {
    %c0_i32 = arith.constant 0 : i32
    %c0_i32_0 = arith.constant 0 : i32
    %c0_i32_1 = arith.constant 0 : i32
    %c0_i32_2 = arith.constant 0 : i32
    return %c0_i32, %c0_i32_0, %c0_i32_1 : i32, i32, i32
  }
  func.func @transform_3(%arg0: i32, %arg1: i32) -> (i32, i32) {
    %c0_i32 = arith.constant 0 : i32
    %c0_i32_0 = arith.constant 0 : i32
    %c0_i32_1 = arith.constant 0 : i32
    return %c0_i32, %c0_i32_0 : i32, i32
  }
  func.func @transform_4(%arg0: i32, %arg1: i32) -> (i32, i32, i32, i32) {
    %c0_i32 = arith.constant 0 : i32
    %c0_i32_0 = arith.constant 0 : i32
    %c0_i32_1 = arith.constant 0 : i32
    return %arg0, %arg1, %c0_i32, %c0_i32_0 : i32, i32, i32, i32
  }
  func.func @transform_5(%arg0: i32, %arg1: i32) -> (i32, i32, i32) {
    %c0_i32 = arith.constant 0 : i32
    %c0_i32_0 = arith.constant 0 : i32
    %c0_i32_1 = arith.constant 0 : i32
    return %arg0, %c0_i32, %c0_i32_0 : i32, i32, i32
  }
}

module attributes {stable_mosaic.version = 11 : i64} {
  func.func @kernel(%arg0: i32, %arg1: i32, %arg2: memref<1x16x16x4xf32, #tpu.memory_space<vmem>>, %arg3: memref<1x4xf32, #tpu.memory_space<vmem>>, %arg4: memref<1x4xf32, #tpu.memory_space<vmem>>, %arg5: memref<3x12x4xf32, #tpu.memory_space<vmem>>, %arg6: memref<1x4xf32, #tpu.memory_space<vmem>>, %arg7: memref<1x8x16x4xf32, #tpu.memory_space<vmem>>, %arg8: memref<1x2x4xf32, #tpu.memory_space<vmem>>, %arg9: memref<18x16x12xf32, #tpu.memory_space<vmem>>) attributes {dimension_semantics = [#tpu.dimension_semantics<parallel>, #tpu.dimension_semantics<arbitrary>], iteration_bounds = array<i64: 2, 2>, scalar_prefetch = 0 : i64, scratch_operands = 1 : i64, tpu.core_type = #tpu.core_type<tc>, window_params = [{transform_indices = @transform_0, window_bounds = array<i64: 1, 16, 16, 4>}, {pipeline_mode = #tpu.pipeline_mode<synchronous>, transform_indices = @transform_1, window_bounds = array<i64: 1, 4>}, {pipeline_mode = #tpu.pipeline_mode<synchronous>, transform_indices = @transform_2, window_bounds = array<i64: 1, 4>}, {pipeline_mode = #tpu.pipeline_mode<synchronous>, transform_indices = @transform_3, window_bounds = array<i64: 3, 12, 4>}, {pipeline_mode = #tpu.pipeline_mode<synchronous>, transform_indices = @transform_4, window_bounds = array<i64: 1, 4>}, {transform_indices = @transform_5, window_bounds = array<i64: 1, 8, 16, 4>}, {transform_indices = @transform_6, window_bounds = array<i64: 1, 2, 4>}]} {
    %c0_i32 = arith.constant 0 : i32
    %0 = arith.cmpi eq, %arg1, %c0_i32 : i32
    %1 = arith.extui %0 : i1 to i32
    %c0_i32_0 = arith.constant 0 : i32
    %2 = arith.cmpi ne, %1, %c0_i32_0 : i32
    scf.if %2 {
      %cst_31 = arith.constant 0.000000e+00 : f32
      %48 = vector.broadcast %cst_31 : f32 to vector<18x16x12xf32>
      %c0_32 = arith.constant 0 : index
      %c0_33 = arith.constant 0 : index
      %c0_34 = arith.constant 0 : index
      %49 = vector.load %arg9[%c0_32, %c0_33, %c0_34] : memref<18x16x12xf32, #tpu.memory_space<vmem>>, vector<18x16x12xf32>
      tpu.vector_store %arg9[%c0_32, %c0_33, %c0_34], %48 {strides = array<i32>} : memref<18x16x12xf32, #tpu.memory_space<vmem>>, vector<18x16x12xf32>,
      %cst_35 = arith.constant 0.000000e+00 : f32
      %50 = vector.broadcast %cst_35 : f32 to vector<1x2x4xf32>
      %c0_36 = arith.constant 0 : index
      %c0_37 = arith.constant 0 : index
      %c0_38 = arith.constant 0 : index
      %51 = vector.load %arg8[%c0_36, %c0_37, %c0_38] : memref<1x2x4xf32, #tpu.memory_space<vmem>>, vector<1x2x4xf32>
      tpu.vector_store %arg8[%c0_36, %c0_37, %c0_38], %50 {strides = array<i32>} : memref<1x2x4xf32, #tpu.memory_space<vmem>>, vector<1x2x4xf32>,
      %c0_39 = arith.constant 0 : index
      %c0_40 = arith.constant 0 : index
      %c0_41 = arith.constant 0 : index
      %c0_42 = arith.constant 0 : index
      %52 = vector.load %arg2[%c0_39, %c0_40, %c0_41, %c0_42] : memref<1x16x16x4xf32, #tpu.memory_space<vmem>>, vector<1x16x16x4xf32>
      %53 = vector.shape_cast %52 : vector<1x16x16x4xf32> to vector<16x16x4xf32>
      %c0_43 = arith.constant 0 : index
      %c0_44 = arith.constant 0 : index
      %54 = vector.load %arg3[%c0_43, %c0_44] : memref<1x4xf32, #tpu.memory_space<vmem>>, vector<1x4xf32>
      %55 = vector.shape_cast %54 : vector<1x4xf32> to vector<1x1x4xf32>
      %c0_45 = arith.constant 0 : index
      %c0_46 = arith.constant 0 : index
      %56 = vector.load %arg4[%c0_45, %c0_46] : memref<1x4xf32, #tpu.memory_space<vmem>>, vector<1x4xf32>
      %57 = vector.shape_cast %56 : vector<1x4xf32> to vector<1x1x4xf32>
      %58 = vector.broadcast %55 : vector<1x1x4xf32> to vector<16x16x4xf32>
      %59 = arith.mulf %53, %58 : vector<16x16x4xf32>
      %60 = vector.broadcast %57 : vector<1x1x4xf32> to vector<16x16x4xf32>
      %61 = arith.addf %59, %60 : vector<16x16x4xf32>
      %cst_47 = arith.constant 0.000000e+00 : f32
      %62 = vector.broadcast %cst_47 : f32 to vector<16x16x4xf32>
      %63 = arith.maximumf %61, %62 : vector<16x16x4xf32>
      %64 = vector.extract_strided_slice %63 {offsets = [0, 0, 0], sizes = [16, 15, 4], strides = [1, 1, 1]} : vector<16x16x4xf32> to vector<16x15x4xf32>
      %c1_48 = arith.constant 1 : index
      %c1_49 = arith.constant 1 : index
      %c0_50 = arith.constant 0 : index
      %65 = vector.load %arg9[%c1_48, %c1_49, %c0_50] : memref<18x16x12xf32, #tpu.memory_space<vmem>>, vector<16x15x4xf32>
      tpu.vector_store %arg9[%c1_48, %c1_49, %c0_50], %64 {strides = array<i32>} : memref<18x16x12xf32, #tpu.memory_space<vmem>>, vector<16x15x4xf32>,
      %c1_51 = arith.constant 1 : index
      %c0_52 = arith.constant 0 : index
      %c4 = arith.constant 4 : index
      %66 = vector.load %arg9[%c1_51, %c0_52, %c4] : memref<18x16x12xf32, #tpu.memory_space<vmem>>, vector<16x16x4xf32>
      tpu.vector_store %arg9[%c1_51, %c0_52, %c4], %63 {strides = array<i32>} : memref<18x16x12xf32, #tpu.memory_space<vmem>>, vector<16x16x4xf32>,
      %67 = vector.extract_strided_slice %63 {offsets = [0, 1, 0], sizes = [16, 15, 4], strides = [1, 1, 1]} : vector<16x16x4xf32> to vector<16x15x4xf32>
      %c1_53 = arith.constant 1 : index
      %c0_54 = arith.constant 0 : index
      %c8 = arith.constant 8 : index
      %68 = vector.load %arg9[%c1_53, %c0_54, %c8] : memref<18x16x12xf32, #tpu.memory_space<vmem>>, vector<16x15x4xf32>
      tpu.vector_store %arg9[%c1_53, %c0_54, %c8], %67 {strides = array<i32>} : memref<18x16x12xf32, #tpu.memory_space<vmem>>, vector<16x15x4xf32>,
    } else {
    }
    %c8_i32 = arith.constant 8 : i32
    %3 = arith.muli %arg1, %c8_i32 : i32
    %cst = arith.constant 0.000000e+00 : f32
    %4 = vector.broadcast %cst : f32 to vector<128x4xf32>
    %c0_i32_1 = arith.constant 0 : i32
    %5 = arith.addi %3, %c0_i32_1 : i32
    %6 = arith.index_cast %5 : i32 to index
    %c0 = arith.constant 0 : index
    %c0_2 = arith.constant 0 : index
    %7 = vector.load %arg9[%6, %c0, %c0_2] : memref<18x16x12xf32, #tpu.memory_space<vmem>>, vector<8x16x12xf32>
    %8 = vector.shape_cast %7 : vector<8x16x12xf32> to vector<128x12xf32>
    %c0_3 = arith.constant 0 : index
    %c0_4 = arith.constant 0 : index
    %c0_5 = arith.constant 0 : index
    %9 = vector.load %arg5[%c0_3, %c0_4, %c0_5] : memref<3x12x4xf32, #tpu.memory_space<vmem>>, vector<1x12x4xf32>
    %10 = vector.shape_cast %9 : vector<1x12x4xf32> to vector<12x4xf32>
    %cst_6 = arith.constant dense<0.000000e+00> : vector<128x4xf32>
    %11 = tpu.matmul %8, %10, %cst_6 {dimension_numbers = #tpu.dot_dimension_numbers<[1], [0], [0], [1], [0, 0, 1, 1], [], []>} : vector<128x12xf32>, vector<12x4xf32>, vector<128x4xf32> -> vector<128x4xf32>
    %12 = arith.addf %4, %11 : vector<128x4xf32>
    %c1_i32 = arith.constant 1 : i32
    %13 = arith.addi %3, %c1_i32 : i32
    %14 = arith.index_cast %13 : i32 to index
    %c0_7 = arith.constant 0 : index
    %c0_8 = arith.constant 0 : index
    %15 = vector.load %arg9[%14, %c0_7, %c0_8] : memref<18x16x12xf32, #tpu.memory_space<vmem>>, vector<8x16x12xf32>
    %16 = vector.shape_cast %15 : vector<8x16x12xf32> to vector<128x12xf32>
    %c1 = arith.constant 1 : index
    %c0_9 = arith.constant 0 : index
    %c0_10 = arith.constant 0 : index
    %17 = vector.load %arg5[%c1, %c0_9, %c0_10] : memref<3x12x4xf32, #tpu.memory_space<vmem>>, vector<1x12x4xf32>
    %18 = vector.shape_cast %17 : vector<1x12x4xf32> to vector<12x4xf32>
    %cst_11 = arith.constant dense<0.000000e+00> : vector<128x4xf32>
    %19 = tpu.matmul %16, %18, %cst_11 {dimension_numbers = #tpu.dot_dimension_numbers<[1], [0], [0], [1], [0, 0, 1, 1], [], []>} : vector<128x12xf32>, vector<12x4xf32>, vector<128x4xf32> -> vector<128x4xf32>
    %20 = arith.addf %12, %19 : vector<128x4xf32>
    %c2_i32 = arith.constant 2 : i32
    %21 = arith.addi %3, %c2_i32 : i32
    %22 = arith.index_cast %21 : i32 to index
    %c0_12 = arith.constant 0 : index
    %c0_13 = arith.constant 0 : index
    %23 = vector.load %arg9[%22, %c0_12, %c0_13] : memref<18x16x12xf32, #tpu.memory_space<vmem>>, vector<8x16x12xf32>
    %24 = vector.shape_cast %23 : vector<8x16x12xf32> to vector<128x12xf32>
    %c2 = arith.constant 2 : index
    %c0_14 = arith.constant 0 : index
    %c0_15 = arith.constant 0 : index
    %25 = vector.load %arg5[%c2, %c0_14, %c0_15] : memref<3x12x4xf32, #tpu.memory_space<vmem>>, vector<1x12x4xf32>
    %26 = vector.shape_cast %25 : vector<1x12x4xf32> to vector<12x4xf32>
    %cst_16 = arith.constant dense<0.000000e+00> : vector<128x4xf32>
    %27 = tpu.matmul %24, %26, %cst_16 {dimension_numbers = #tpu.dot_dimension_numbers<[1], [0], [0], [1], [0, 0, 1, 1], [], []>} : vector<128x12xf32>, vector<12x4xf32>, vector<128x4xf32> -> vector<128x4xf32>
    %28 = arith.addf %20, %27 : vector<128x4xf32>
    %c0_17 = arith.constant 0 : index
    %c0_18 = arith.constant 0 : index
    %29 = vector.load %arg6[%c0_17, %c0_18] : memref<1x4xf32, #tpu.memory_space<vmem>>, vector<1x4xf32>
    %30 = vector.broadcast %29 : vector<1x4xf32> to vector<128x4xf32>
    %31 = arith.addf %28, %30 : vector<128x4xf32>
    %32 = vector.shape_cast %31 : vector<128x4xf32> to vector<8x16x4xf32>
    %c0_19 = arith.constant 0 : index
    %c0_20 = arith.constant 0 : index
    %c0_21 = arith.constant 0 : index
    %c0_22 = arith.constant 0 : index
    %33 = vector.load %arg7[%c0_19, %c0_20, %c0_21, %c0_22] : memref<1x8x16x4xf32, #tpu.memory_space<vmem>>, vector<1x8x16x4xf32>
    %34 = vector.shape_cast %33 : vector<1x8x16x4xf32> to vector<8x16x4xf32>
    %35 = vector.shape_cast %32 : vector<8x16x4xf32> to vector<1x8x16x4xf32>
    tpu.vector_store %arg7[%c0_19, %c0_20, %c0_21, %c0_22], %35 {strides = array<i32>} : memref<1x8x16x4xf32, #tpu.memory_space<vmem>>, vector<1x8x16x4xf32>,
    %cst_23 = arith.constant dense<0.000000e+00> : vector<4xf32>
    %36 = vector.multi_reduction <add>, %31, %cst_23 [0] : vector<128x4xf32> to vector<4xf32>
    %37 = vector.shape_cast %36 : vector<4xf32> to vector<1x4xf32>
    %38 = arith.mulf %31, %31 : vector<128x4xf32>
    %cst_24 = arith.constant dense<0.000000e+00> : vector<4xf32>
    %39 = vector.multi_reduction <add>, %38, %cst_24 [0] : vector<128x4xf32> to vector<4xf32>
    %40 = vector.shape_cast %39 : vector<4xf32> to vector<1x4xf32>
    %c0_25 = arith.constant 0 : index
    %c0_26 = arith.constant 0 : index
    %c0_27 = arith.constant 0 : index
    %41 = vector.load %arg8[%c0_25, %c0_26, %c0_27] : memref<1x2x4xf32, #tpu.memory_space<vmem>>, vector<1x2x4xf32>
    %42 = vector.shape_cast %41 : vector<1x2x4xf32> to vector<2x4xf32>
    %43 = tpu.concatenate %37, %40 in 0 : vector<1x4xf32>, vector<1x4xf32> -> vector<2x4xf32>
    %44 = arith.addf %42, %43 : vector<2x4xf32>
    %c0_28 = arith.constant 0 : index
    %c0_29 = arith.constant 0 : index
    %c0_30 = arith.constant 0 : index
    %45 = vector.load %arg8[%c0_28, %c0_29, %c0_30] : memref<1x2x4xf32, #tpu.memory_space<vmem>>, vector<1x2x4xf32>
    %46 = vector.shape_cast %45 : vector<1x2x4xf32> to vector<2x4xf32>
    %47 = vector.shape_cast %44 : vector<2x4xf32> to vector<1x2x4xf32>
    tpu.vector_store %arg8[%c0_28, %c0_29, %c0_30], %47 {strides = array<i32>} : memref<1x2x4xf32, #tpu.memory_space<vmem>>, vector<1x2x4xf32>,
    return
  }
  func.func @transform_0(%arg0: i32, %arg1: i32) -> (i32, i32, i32, i32) {
    %c0_i32 = arith.constant 0 : i32
    %c0_i32_0 = arith.constant 0 : i32
    %c0_i32_1 = arith.constant 0 : i32
    %c0_i32_2 = arith.constant 0 : i32
    return %arg0, %c0_i32, %c0_i32_0, %c0_i32_1 : i32, i32, i32, i32
  }
  func.func @transform_1(%arg0: i32, %arg1: i32) -> (i32, i32) {
    %c0_i32 = arith.constant 0 : i32
    %c0_i32_0 = arith.constant 0 : i32
    %c0_i32_1 = arith.constant 0 : i32
    return %c0_i32, %c0_i32_0 : i32, i32
  }
  func.func @transform_2(%arg0: i32, %arg1: i32) -> (i32, i32) {
    %c0_i32 = arith.constant 0 : i32
    %c0_i32_0 = arith.constant 0 : i32
    %c0_i32_1 = arith.constant 0 : i32
    return %c0_i32, %c0_i32_0 : i32, i32
  }
  func.func @transform_3(%arg0: i32, %arg1: i32) -> (i32, i32, i32) {
    %c0_i32 = arith.constant 0 : i32
    %c0_i32_0 = arith.constant 0 : i32
    %c0_i32_1 = arith.constant 0 : i32
    %c0_i32_2 = arith.constant 0 : i32
    return %c0_i32, %c0_i32_0, %c0_i32_1 : i32, i32, i32
  }
  func.func @transform_4(%arg0: i32, %arg1: i32) -> (i32, i32) {
    %c0_i32 = arith.constant 0 : i32
    %c0_i32_0 = arith.constant 0 : i32
    %c0_i32_1 = arith.constant 0 : i32
    return %c0_i32, %c0_i32_0 : i32, i32
  }
  func.func @transform_5(%arg0: i32, %arg1: i32) -> (i32, i32, i32, i32) {
    %c0_i32 = arith.constant 0 : i32
    %c0_i32_0 = arith.constant 0 : i32
    %c0_i32_1 = arith.constant 0 : i32
    return %arg0, %arg1, %c0_i32, %c0_i32_0 : i32, i32, i32, i32
  }
  func.func @transform_6(%arg0: i32, %arg1: i32) -> (i32, i32, i32) {
    %c0_i32 = arith.constant 0 : i32
    %c0_i32_0 = arith.constant 0 : i32
    %c0_i32_1 = arith.constant 0 : i32
    return %arg0, %c0_i32, %c0_i32_0 : i32, i32, i32
  }
}

module attributes {stable_mosaic.version = 11 : i64} {
  func.func @_scale_shift_relu_kernel(%arg0: i32, %arg1: memref<32x64xf32, #tpu.memory_space<vmem>>, %arg2: memref<1x64xf32, #tpu.memory_space<vmem>>, %arg3: memref<1x64xf32, #tpu.memory_space<vmem>>, %arg4: memref<32x64xf32, #tpu.memory_space<vmem>>) attributes {dimension_semantics = [#tpu.dimension_semantics<parallel>], iteration_bounds = array<i64: 1>, scalar_prefetch = 0 : i64, scratch_operands = 0 : i64, tpu.core_type = #tpu.core_type<tc>, window_params = [{transform_indices = @transform_0, window_bounds = array<i64: 32, 64>}, {pipeline_mode = #tpu.pipeline_mode<synchronous>, transform_indices = @transform_1, window_bounds = array<i64: 1, 64>}, {pipeline_mode = #tpu.pipeline_mode<synchronous>, transform_indices = @transform_2, window_bounds = array<i64: 1, 64>}, {transform_indices = @transform_3, window_bounds = array<i64: 32, 64>}]} {
    %c0 = arith.constant 0 : index
    %c0_0 = arith.constant 0 : index
    %0 = vector.load %arg1[%c0, %c0_0] : memref<32x64xf32, #tpu.memory_space<vmem>>, vector<32x64xf32>
    %c0_1 = arith.constant 0 : index
    %c0_2 = arith.constant 0 : index
    %1 = vector.load %arg2[%c0_1, %c0_2] : memref<1x64xf32, #tpu.memory_space<vmem>>, vector<1x64xf32>
    %2 = vector.broadcast %1 : vector<1x64xf32> to vector<32x64xf32>
    %3 = arith.mulf %0, %2 : vector<32x64xf32>
    %c0_3 = arith.constant 0 : index
    %c0_4 = arith.constant 0 : index
    %4 = vector.load %arg3[%c0_3, %c0_4] : memref<1x64xf32, #tpu.memory_space<vmem>>, vector<1x64xf32>
    %5 = vector.broadcast %4 : vector<1x64xf32> to vector<32x64xf32>
    %6 = arith.addf %3, %5 : vector<32x64xf32>
    %cst = arith.constant 0.000000e+00 : f32
    %7 = vector.broadcast %cst : f32 to vector<32x64xf32>
    %8 = arith.maximumf %6, %7 : vector<32x64xf32>
    %c0_5 = arith.constant 0 : index
    %c0_6 = arith.constant 0 : index
    %9 = vector.load %arg4[%c0_5, %c0_6] : memref<32x64xf32, #tpu.memory_space<vmem>>, vector<32x64xf32>
    tpu.vector_store %arg4[%c0_5, %c0_6], %8 {strides = array<i32>} : memref<32x64xf32, #tpu.memory_space<vmem>>, vector<32x64xf32>,
    return
  }
  func.func @transform_0(%arg0: i32) -> (i32, i32) {
    %c0_i32 = arith.constant 0 : i32
    %c0_i32_0 = arith.constant 0 : i32
    return %arg0, %c0_i32 : i32, i32
  }
  func.func @transform_1(%arg0: i32) -> (i32, i32) {
    %c0_i32 = arith.constant 0 : i32
    %c0_i32_0 = arith.constant 0 : i32
    %c0_i32_1 = arith.constant 0 : i32
    return %c0_i32, %c0_i32_0 : i32, i32
  }
  func.func @transform_2(%arg0: i32) -> (i32, i32) {
    %c0_i32 = arith.constant 0 : i32
    %c0_i32_0 = arith.constant 0 : i32
    %c0_i32_1 = arith.constant 0 : i32
    return %c0_i32, %c0_i32_0 : i32, i32
  }
  func.func @transform_3(%arg0: i32) -> (i32, i32) {
    %c0_i32 = arith.constant 0 : i32
    %c0_i32_0 = arith.constant 0 : i32
    return %arg0, %c0_i32 : i32, i32
  }
}

</mosaic_0001>

<bundles_post_ra>
// kernel: tile.18
= control target key start
LH: loop header
LB: loop body
LE: loop exit
PB: predicated region body
PF: predicated region fallthrough
CT: control target
= control target key end

     0   :  { %s22_s0 = inlined_call_operand.vmem [shape: f32[4], index: 0, kind: input, shape index: {}]   ;;  %s23_s1 = inlined_call_operand.vmem [shape: f32[4,4], index: 1, kind: output, shape index: {}]  }
   0x1   :  { %v4_v0 = vld [vmem:[%s22_s0] ss:$0 sm:$0xff] }
   0x2   :  { %5 = vst [vmem:[%s23_s1] sm:$0xf] %v4_v0 }

// kernel: tile.19
= control target key start
LH: loop header
LB: loop body
LE: loop exit
PB: predicated region body
PF: predicated region fallthrough
CT: control target
= control target key end

     0   :  { %vm7_vm0 = vcmask 31744   ;;  %s37_s8 = smov 4   ;;  %s38_s9 = smov 8   ;;  %vm13_vm1 = vcmask 130144   ;;  %vm19_vm2 = vcmask 97344   ;;  %vm25_vm3 = vcmask 64544   ;;  %s55_s0 = inlined_call_operand.vmem [shape: f32[4,4], index: 0, kind: input, shape index: {}]   ;;  %s56_s1 = inlined_call_operand.vmem [shape: f32[1,16], index: 1, kind: output, shape index: {}]  }
   0x1   :  { %v4_v0 = vld [vmem:[%s55_s0] sm:$0xf]  ;;  %s36_s0 = smov 12  }
   0x2   :  { %5 = vst [vmem:[#allocation1] sm:$0xf] %v4_v0 }
   0x9   :  { %v10_v1 = vld [vmem:[#allocation1 + $0x3] sm:$0x1]   ;;  %v22_v2 = vld [vmem:[#allocation1 + $0x1] sm:$0x1]   ;;  %v6_v3 = vld [vmem:[#allocation1] sm:$0x1]  }
   0xa   :  { %11 = vrot.lane.b32.xlu0 %v10_v1, %s36_s0  ;;  %23 = vrot.lane.b32.xlu1 %v22_v2, %s37_s8  ;;  %v16_v4 = vld [vmem:[#allocation1 + $0x2] sm:$0x1]   ;;  %8 = vst.msk [vmem:[#allocation0] sm:$0x1] %vm7_vm0, %v6_v3  }
   0xe   :  { %17 = vrot.lane.b32.xlu0 %v16_v4, %s38_s9 }
  0x7c   :  { %v12_v5 = vpop.permute.xlu0 %11   ;;  %v24_v6 = vpop.permute.xlu1 %23  }
  0x7d   :  { %14 = vst.msk [vmem:[#allocation0] sm:$0x1] %vm13_vm1, %v12_v5  }
  0x80   :  { %v18_v7 = vpop.permute.xlu0 %17  }
  0x81   :  { %20 = vst.msk [vmem:[#allocation0] sm:$0x1] %vm19_vm2, %v18_v7  }
  0x82   :  { %26 = vst.msk [vmem:[#allocation0] sm:$0x1] %vm25_vm3, %v24_v6  }
  0x89   :  { %v30_v8 = vld [vmem:[#allocation0] sm:$0x1] }
  0x8a   :  { %32 = vst [vmem:[%s56_s1] sm:$0x1] %v30_v8 }

// kernel: deconv_forward.4
= control target key start
LH: loop header
LB: loop body
LE: loop exit
PB: predicated region body
PF: predicated region fallthrough
CT: control target
= control target key end

     0   :  { %s466_s12 = smov 0   ;;  %s505_s0 = inlined_call_operand.vmem [shape: f32[128,8], index: 0, kind: input, shape index: {}]   ;;  %s506_s1 = inlined_call_operand.vmem [shape: f32[8,16], index: 1, kind: input, shape index: {}]   ;;  %s507_s2 = inlined_call_operand.vmem [shape: f32[1,16], index: 2, kind: input, shape index: {}]   ;;  %s508_s3 = inlined_call_operand.vmem [shape: f32[128,16], index: 3, kind: output, shape index: {}]  }
   0x1 LB: > { %s385_s13 = sadd.s32 4294967295, %s444_s12   ;;  %p389_p0 = scmp.ge.s32.totalorder %s444_s12, 1  ;;  %s444_s12 = sphi %s466_s12, %s13_s12  }
   0x2   : > { %p138_p1 = scmp.lt.s32.totalorder %s444_s12, 3 }
   0x4   : > { %p139_p2 = pnand %p389_p0, %p138_p1 }
   0x5   : > { %v182_v0 = vld [vmem:[%s506_s1] sm:$0xff] (!%p139_p2)  ;;  %s390_s16 = sshll.u32 (!%p139_p2), %s385_s13, 3  ;;  %vm190_vm0 = vcmask (!%p139_p2), 64512   ;;  %vm320_vm1 = vcmask (!%p139_p2), 130048  }
   0x6   : > { %142 = sbr.rel (%p139_p2) target bundleno = 239 (0xef), region = 32  ;;  %414 = vmatprep.subr.mxu0 (!%p139_p2), %v182_v0  ;;  %428 = vmatprep.subr.mxu1 (!%p139_p2), %v182_v0  ;;  %p163_p3 = scmp.lt.s32.totalorder (!%p139_p2), %s390_s16, 15  ;;  %v394_v9 = vld [vmem:[%s507_s2] ss:$0 sm:$0xff] (!%p139_p2) }
   0x7   : > { %415 = vmatpush3.msra.mxu0 (!%p139_p2), %v182_v0  ;;  %429 = vmatpush3.msra.mxu1 (!%p139_p2), %v182_v0 }
   0xd   : > { %s510_s16 = smov (!%p163_p3, %s390_s16), 15 }
   0xe   : > { %s391_s17 = sshll.u32 %s510_s16, 3 }
   0xf   : > { %s166_s20 = scalar_lea.vmem %s505_s0, %s391_s17  ;;  %s172_s25 = scalar_lea.vmem %s508_s3, %s391_s17 }
  0x10   : > { %v174_v1 = vld [vmem:[%s166_s20] sm:$0xff]  ;;  %v175_v3 = vld [vmem:[%s166_s20 + $0x8] sm:$0xff]  ;;  %v176_v5 = vld [vmem:[%s166_s20 + $0x10] sm:$0xff] }
  0x11   : > { %v178_v2 = vld [vmem:[%s166_s20 + $0x20] sm:$0xff]  ;;  %416 = vmatprep.mubr.msk.f32.mxu0 %vm190_vm0, %v174_v1  ;;  %v179_v4 = vld [vmem:[%s166_s20 + $0x28] sm:$0xff]  ;;  %v180_v6 = vld [vmem:[%s166_s20 + $0x30] sm:$0xff] }
  0x12   : > { %422 = vmatprep.mubr.msk.f32.mxu1 %vm190_vm0, %v178_v2  ;;  %417 = vmatmul.mubr.msk.f32.vlgmr.msra.gmra.mrb[0].mxu0 %vm190_vm0, %v175_v3  ;;  %v177_v7 = vld [vmem:[%s166_s20 + $0x18] sm:$0xff] }
  0x13   : > { %423 = vmatmul.mubr.msk.f32.vlgmr.msra.gmra.mrb[0].mxu1 %vm190_vm0, %v179_v4  ;;  %419 = vmatprep.mubr.msk.f32.mxu0 %vm190_vm0, %v176_v5  ;;  %v181_v8 = vld [vmem:[%s166_s20 + $0x38] sm:$0xff] }
  0x14   : > { %425 = vmatprep.mubr.msk.f32.mxu1 %vm190_vm0, %v180_v6 }
  0x16   : > { %420 = vmatmul.mubr.msk.f32.gmra.mrb[2].mxu0 %vm190_vm0, %v177_v7 }
  0x17   : > { %426 = vmatmul.mubr.msk.f32.gmra.mrb[2].mxu1 %vm190_vm0, %v181_v8 }
  0xe5   : > { %v418_v10 = vpop.f32.mrb[0].mxu0 }
  0xe6   : > { %v424_v11 = vpop.f32.mrb[0].mxu1  ;;  %v287_v12 = vadd.f32 %v418_v10, %v394_v9  ;;  %v281_v14 = vpop.f32.mrb[1].mxu0 }
  0xe7   : > { %v307_v13 = vadd.f32 %v424_v11, %v394_v9  ;;  %v301_v15 = vpop.f32.mrb[1].mxu1  ;;  %v282_v16 = vadd.f32 %v394_v9, %v281_v14 }
  0xe8   : > { %v302_v17 = vadd.f32 %v394_v9, %v301_v15  ;;  %322 = vst.msk [vmem:[%s172_s25 + $0x8] sm:$0xff] %vm320_vm1, %v287_v12 }
  0xe9   : > { %326 = vst.msk [vmem:[%s172_s25 + $0x28] sm:$0xff] %vm320_vm1, %v307_v13  ;;  %321 = vst.msk [vmem:[%s172_s25] sm:$0xff] %vm320_vm1, %v282_v16  ;;  %v421_v18 = vpop.f32.mrb[2].mxu0 }
  0xea   : > { %325 = vst.msk [vmem:[%s172_s25 + $0x20] sm:$0xff] %vm320_vm1, %v302_v17  ;;  %v427_v19 = vpop.f32.mrb[2].mxu1  ;;  %v297_v20 = vadd.f32 %v421_v18, %v394_v9  ;;  %v291_v22 = vpop.f32.mrb[3].mxu0 }
  0xeb   : > { %v317_v21 = vadd.f32 %v427_v19, %v394_v9  ;;  %v311_v23 = vpop.f32.mrb[3].mxu1  ;;  %v292_v24 = vadd.f32 %v394_v9, %v291_v22 }
  0xec   : > { %v312_v25 = vadd.f32 %v394_v9, %v311_v23  ;;  %324 = vst.msk [vmem:[%s172_s25 + $0x18] sm:$0xff] %vm320_vm1, %v297_v20 }
  0xed   : > { %328 = vst.msk [vmem:[%s172_s25 + $0x38] sm:$0xff] %vm320_vm1, %v317_v21  ;;  %323 = vst.msk [vmem:[%s172_s25 + $0x10] sm:$0xff] %vm320_vm1, %v292_v24 }
  0xee   : > { %327 = vst.msk [vmem:[%s172_s25 + $0x30] sm:$0xff] %vm320_vm1, %v312_v25 }
  0xef PF: > { %s13_s12 = sadd.s32 1, %s444_s12  }
  0xf0   : > { %p10_p4 = scmp.ge.s32.totalorder %s13_s12, 4  }
  0xf2   :  { %12 = sbr.rel (!%p10_p4) target bundleno = 1 (0x1), region = 62 }

// kernel: tile.23
= control target key start
LH: loop header
LB: loop body
LE: loop exit
PB: predicated region body
PF: predicated region fallthrough
CT: control target
= control target key end

     0   :  { %s28_s0 = inlined_call_operand.vmem [shape: f32[4], index: 0, kind: input, shape index: {}]   ;;  %s29_s1 = inlined_call_operand.vmem [shape: f32[16,4], index: 1, kind: output, shape index: {}]  }
   0x1   :  { %v4_v0 = vld [vmem:[%s28_s0] ss:$0 sm:$0xff] }
   0x2   :  { %5 = vst [vmem:[%s29_s1] sm:$0xff] %v4_v0  ;;  %8 = vst [vmem:[%s29_s1 + $0x8] sm:$0xff] %v4_v0 }

// kernel: tile.24
= control target key start
LH: loop header
LB: loop body
LE: loop exit
PB: predicated region body
PF: predicated region fallthrough
CT: control target
= control target key end

     0   :  { %s131_s10 = smov 60   ;;  %s132_s11 = smov 52   ;;  %vm3_vm0 = vcmask 31744   ;;  %vm9_vm1 = vcmask 523744   ;;  %vm15_vm2 = vcmask 490944   ;;  %vm21_vm3 = vcmask 458144   ;;  %s207_s0 = inlined_call_operand.vmem [shape: f32[16,4], index: 0, kind: input, shape index: {}]   ;;  %s208_s1 = inlined_call_operand.vmem [shape: f32[1,64], index: 1, kind: output, shape index: {}]  }
   0x1   :  { %v101_v0 = vld [vmem:[%s207_s0 + $0xf] sm:$0x1]   ;;  %v103_v1 = vld [vmem:[%s207_s0 + $0xd] sm:$0x1]   ;;  %v102_v2 = vld [vmem:[%s207_s0 + $0xe] sm:$0x1]  }
   0x2   :  { %7 = vrot.lane.b32.xlu0 %v101_v0, %s131_s10  ;;  %19 = vrot.lane.b32.xlu1 %v103_v1, %s132_s11  ;;  %v104_v3 = vld [vmem:[%s207_s0 + $0xc] sm:$0x1]   ;;  %s133_s16 = smov 56   ;;  %s134_s17 = smov 48   ;;  %v105_v4 = vld [vmem:[%s207_s0 + $0xb] sm:$0x1]  }
   0x3   :  { %v106_v5 = vld [vmem:[%s207_s0 + $0xa] sm:$0x1]   ;;  %v2_v6 = vld [vmem:[%s207_s0] sm:$0x1]   ;;  %s135_s24 = smov 44   ;;  %s136_s25 = smov 40  }
   0x4   :  { %4 = vst.msk [vmem:[#allocation0] sm:$0x1] %vm3_vm0, %v2_v6   ;;  %v107_v7 = vld [vmem:[%s207_s0 + $0x9] sm:$0x1]   ;;  %v108_v8 = vld [vmem:[%s207_s0 + $0x8] sm:$0x1]  }
   0x5   :  { %s137_s30 = smov 36   ;;  %s138_s2 = smov 32   ;;  %v109_v9 = vld [vmem:[%s207_s0 + $0x7] sm:$0x1]   ;;  %v110_v10 = vld [vmem:[%s207_s0 + $0x6] sm:$0x1]  }
   0x6   :  { %13 = vrot.lane.b32.xlu0 %v102_v2, %s133_s16  ;;  %25 = vrot.lane.b32.xlu1 %v104_v3, %s134_s17  ;;  %s139_s7 = smov 28   ;;  %s140_s8 = smov 24   ;;  %v111_v11 = vld [vmem:[%s207_s0 + $0x5] sm:$0x1]   ;;  %v112_v12 = vld [vmem:[%s207_s0 + $0x4] sm:$0x1]  }
   0x7   :  { %s141_s13 = smov 20   ;;  %s142_s14 = smov 16   ;;  %v113_v13 = vld [vmem:[%s207_s0 + $0x3] sm:$0x1]   ;;  %v114_v14 = vld [vmem:[%s207_s0 + $0x2] sm:$0x1]  }
   0x8   :  { %s143_s19 = smov 12   ;;  %s144_s20 = smov 8   ;;  %v115_v15 = vld [vmem:[%s207_s0 + $0x1] sm:$0x1]   ;;  %vm27_vm4 = vcmask 425344   ;;  %vm33_vm5 = vcmask 392544  }
   0x9   :  { %s145_s0 = smov 4   ;;  %vm39_vm6 = vcmask 359744   ;;  %vm45_vm7 = vcmask 326944   ;;  %vm51_vm8 = vcmask 294144   ;;  %vm57_vm9 = vcmask 261344  }
   0xa   :  { %31 = vrot.lane.b32.xlu0 %v105_v4, %s135_s24  ;;  %37 = vrot.lane.b32.xlu1 %v106_v5, %s136_s25  ;;  %vm63_vm10 = vcmask 228544   ;;  %vm69_vm11 = vcmask 195744   ;;  %vm75_vm12 = vcmask 162944   ;;  %vm81_vm13 = vcmask 130144  }
   0xb   :  { %vm87_vm14 = vcmask 97344   ;;  %vm93_vm15 = vcmask 64544  }
   0xe   :  { %43 = vrot.lane.b32.xlu0 %v107_v7, %s137_s30  ;;  %49 = vrot.lane.b32.xlu1 %v108_v8, %s138_s2 }
  0x12   :  { %55 = vrot.lane.b32.xlu0 %v109_v9, %s139_s7  ;;  %61 = vrot.lane.b32.xlu1 %v110_v10, %s140_s8 }
  0x16   :  { %67 = vrot.lane.b32.xlu0 %v111_v11, %s141_s13  ;;  %73 = vrot.lane.b32.xlu1 %v112_v12, %s142_s14 }
  0x1a   :  { %79 = vrot.lane.b32.xlu0 %v113_v13, %s143_s19  ;;  %85 = vrot.lane.b32.xlu1 %v114_v14, %s144_s20 }
  0x1e   :  { %91 = vrot.lane.b32.xlu0 %v115_v15, %s145_s0 }
  0x74   :  { %v8_v16 = vpop.permute.xlu0 %7   ;;  %v20_v17 = vpop.permute.xlu1 %19  }
  0x75   :  { %10 = vst.msk [vmem:[#allocation0] sm:$0x1] %vm9_vm1, %v8_v16  }
  0x78   :  { %v14_v18 = vpop.permute.xlu0 %13   ;;  %v26_v19 = vpop.permute.xlu1 %25  }
  0x79   :  { %16 = vst.msk [vmem:[#allocation0] sm:$0x1] %vm15_vm2, %v14_v18  }
  0x7a   :  { %22 = vst.msk [vmem:[#allocation0] sm:$0x1] %vm21_vm3, %v20_v17  }
  0x7b   :  { %28 = vst.msk [vmem:[#allocation0] sm:$0x1] %vm27_vm4, %v26_v19  }
  0x7c   :  { %v32_v20 = vpop.permute.xlu0 %31   ;;  %v38_v21 = vpop.permute.xlu1 %37  }
  0x7d   :  { %34 = vst.msk [vmem:[#allocation0] sm:$0x1] %vm33_vm5, %v32_v20  }
  0x7e   :  { %40 = vst.msk [vmem:[#allocation0] sm:$0x1] %vm39_vm6, %v38_v21  }
  0x80   :  { %v44_v22 = vpop.permute.xlu0 %43   ;;  %v50_v23 = vpop.permute.xlu1 %49  }
  0x81   :  { %46 = vst.msk [vmem:[#allocation0] sm:$0x1] %vm45_vm7, %v44_v22  }
  0x82   :  { %52 = vst.msk [vmem:[#allocation0] sm:$0x1] %vm51_vm8, %v50_v23  }
  0x84   :  { %v56_v24 = vpop.permute.xlu0 %55   ;;  %v62_v25 = vpop.permute.xlu1 %61  }
  0x85   :  { %58 = vst.msk [vmem:[#allocation0] sm:$0x1] %vm57_vm9, %v56_v24  }
  0x86   :  { %64 = vst.msk [vmem:[#allocation0] sm:$0x1] %vm63_vm10, %v62_v25  }
  0x88   :  { %v68_v26 = vpop.permute.xlu0 %67   ;;  %v74_v27 = vpop.permute.xlu1 %73  }
  0x89   :  { %70 = vst.msk [vmem:[#allocation0] sm:$0x1] %vm69_vm11, %v68_v26  }
  0x8a   :  { %76 = vst.msk [vmem:[#allocation0] sm:$0x1] %vm75_vm12, %v74_v27  }
  0x8c   :  { %v80_v28 = vpop.permute.xlu0 %79   ;;  %v86_v29 = vpop.permute.xlu1 %85  }
  0x8d   :  { %82 = vst.msk [vmem:[#allocation0] sm:$0x1] %vm81_vm13, %v80_v28  }
  0x8e   :  { %88 = vst.msk [vmem:[#allocation0] sm:$0x1] %vm87_vm14, %v86_v29  }
  0x90   :  { %v92_v30 = vpop.permute.xlu0 %91  }
  0x91   :  { %94 = vst.msk [vmem:[#allocation0] sm:$0x1] %vm93_vm15, %v92_v30  }
  0x98   :  { %v98_v31 = vld [vmem:[#allocation0] sm:$0x1] }
  0x99   :  { %100 = vst [vmem:[%s208_s1] sm:$0x1] %v98_v31 }

// kernel: deconv_forward.5
= control target key start
LH: loop header
LB: loop body
LE: loop exit
PB: predicated region body
PF: predicated region fallthrough
CT: control target
= control target key end

     0   :  { %s2510_s18 = smov 0   ;;  %s2512_s19 = smov 0   ;;  %s3574_s0 = inlined_call_operand.vmem [shape: f32[2,16,16,4], index: 0, kind: input, shape index: {}]   ;;  %s3575_s1 = inlined_call_operand.vmem [shape: f32[2,16,16,4], index: 1, kind: input, shape index: {}]   ;;  %s3576_s2 = inlined_call_operand.vmem [shape: f32[3,24,4], index: 2, kind: input, shape index: {}]   ;;  %s3577_s3 = inlined_call_operand.vmem [shape: f32[1,4], index: 3, kind: input, shape index: {}]   ;;  %s3578_s4 = inlined_call_operand.vmem [shape: f32[2,16,16,4], index: 4, kind: output, shape index: {0}]   ;;  %s3579_s5 = inlined_call_operand.vmem [shape: f32[2,2,4], index: 5, kind: output, shape index: {1}]  }
   0x1   :  { %s2514_s20 = smov 0   ;;  %s2516_s21 = smov 0  }
   0x2   :  { %s2518_s22 = smov 0  }
   0x3 LB: > { %s25_s23 = sadd.s32 1, %s2464_s20  ;;  %s28_s24 = sadd.s32 1, %s2468_s21  ;;  %s2472_s22 = sphi %s2518_s22, %s16_s22   ;;  %s2468_s21 = sphi %s2516_s21, %s3583_s21   ;;  %s2464_s20 = sphi %s2514_s20, %s3582_s20   ;;  %s2460_s19 = sphi %s2512_s19, %s3581_s19   ;;  %s2456_s18 = sphi %s2510_s18, %s3580_s18  }
   0x4   : > { %p26_p0 = scmp.ge.s32.totalorder %s25_s23, 2  ;;  %p2082_p1 = scmp.ge.s32.totalorder %s2472_s22, 1 }
   0x5   : > { %p214_p2 = scmp.lt.s32.totalorder %s2472_s22, 5 }
   0x6   : > { %s3585_s23 = smov (%p26_p0, %s25_s23), 0  ;;  %s3587_s24 = smov (!%p26_p0, %s28_s24), %s2468_s21 }
   0x7   : > { %p215_p3 = pnand %p2082_p1, %p214_p2  ;;  %p30_p4 = scmp.ge.s32.totalorder %s3587_s24, 2 }
   0x8   : > { %p256_p5 = scmp.lt.s32.totalorder (!%p215_p3), %s2460_s19, 1  ;;  %s2087_s25 = sshll.u32 (!%p215_p3), %s2456_s18, 3 }
   0x9   : > { %s3589_s24 = smov (%p30_p4, %s3587_s24), 0  ;;  %218 = sbr.rel (%p215_p3) target bundleno = 750 (0x2ee), region = 36 }
   0xa   : > { %p269_p6 = scmp.lt.s32.totalorder (!%p215_p3), %s2087_s25, 15  ;;  %p2092_p7 = scmp.ne.s32.totalorder (!%p215_p3), %s2456_s18, 0 }
  0x10   : > { %s3591_s19 = smov (!%p256_p5, %s2460_s19), 1  ;;  %s3593_s25 = smov (!%p269_p6, %s2087_s25), 15 }
  0x11   : > { %s2188_s26 = sshll.u32 %s3591_s19, 8  ;;  %s2089_s27 = sshll.u32 %s3591_s19, 5  ;;  %vm357_vm0 = vcmask (!%p2092_p7), 31744   ;;  %vm285_vm1 = vcmask (!%p2092_p7), 195584   ;;  %v2475_v2 = vmov (!%p2092_p7), 0.0   ;;  %vm359_vm2 = vcmask (!%p2092_p7), 30720  }
  0x12   : > { %s2546_s30 = scalar_lea.vmem %s3574_s0, %s2188_s26  ;;  %s2551_s8 = scalar_lea.vmem %s3575_s1, %s2188_s26  ;;  %290 = vst.msk [vmem:[#allocation2 + $0x20] sm:$0xff] (!%p2092_p7), %vm285_vm1, %v2475_v2  ;;  %291 = vst.msk [vmem:[#allocation2 + $0x28] sm:$0xff] (!%p2092_p7), %vm285_vm1, %v2475_v2  ;;  %vm519_vm3 = vcmask (!%p2092_p7), 64544   ;;  %vm650_vm4 = vcmask (!%p2092_p7), 97344   ;;  %vm648_vm5 = vcmask (!%p2092_p7), 97345   ;;  %vm844_vm6 = vcmask (!%p2092_p7), 129120  }
  0x13   : > { %s2088_s9 = sshll.u32 %s3593_s25, 1  ;;  %s2091_s10 = sshll.u32 %s3591_s19, 1  ;;  %v2565_v0 = vld [vmem:[%s2546_s30 + $0x10] sm:$0xff] (!%p2092_p7)  ;;  %v2568_v1 = vld [vmem:[%s2546_s30] sm:$0xff] (!%p2092_p7)  ;;  %286 = vst.msk [vmem:[#allocation2] sm:$0xff] (!%p2092_p7), %vm285_vm1, %v2475_v2  ;;  %287 = vst.msk [vmem:[#allocation2 + $0x8] sm:$0xff] (!%p2092_p7), %vm285_vm1, %v2475_v2 }
  0x14   : > { %s273_s11 = sadd.s32 %s2089_s27, %s2088_s9  ;;  %s2556_s14 = scalar_lea.vmem %s3579_s5, %s2091_s10  ;;  %288 = vst.msk [vmem:[#allocation2 + $0x10] sm:$0xff] (!%p2092_p7), %vm285_vm1, %v2475_v2  ;;  %289 = vst.msk [vmem:[#allocation2 + $0x18] sm:$0xff] (!%p2092_p7), %vm285_vm1, %v2475_v2  ;;  %v2647_v3 = vld [vmem:[%s2546_s30 + $0x18] sm:$0xff] (!%p2092_p7)  ;;  %v2650_v4 = vld [vmem:[%s2546_s30 + $0x8] sm:$0xff] (!%p2092_p7)  ;;  %vm842_vm7 = vcmask (!%p2092_p7), 130144   ;;  %vm322_vm8 = vcmask (!%p2092_p7), 25600  }
  0x15   : > { %s2090_s15 = sshll.u32 %s273_s11, 3  ;;  %284 = sbr.rel (%p2092_p7) target bundleno = 456 (0x1c8), region = 40  ;;  %292 = vst.msk [vmem:[#allocation2 + $0x30] sm:$0xff] (!%p2092_p7), %vm285_vm1, %v2475_v2  ;;  %293 = vst.msk [vmem:[#allocation2 + $0x38] sm:$0xff] (!%p2092_p7), %vm285_vm1, %v2475_v2  ;;  %v2661_v5 = vld [vmem:[%s2546_s30 + $0x28] sm:$0xff] (!%p2092_p7)  ;;  %v2664_v6 = vld [vmem:[%s2546_s30 + $0x20] sm:$0xff] (!%p2092_p7) }
  0x16   : > { %s2561_s28 = scalar_lea.vmem %s3578_s4, %s2090_s15  ;;  %s2474_s19 = smov (!%p2092_p7), 4   ;;  %294 = vst.msk [vmem:[#allocation2 + $0x40] sm:$0xff] (!%p2092_p7), %vm285_vm1, %v2475_v2  ;;  %295 = vst.msk [vmem:[#allocation2 + $0x48] sm:$0xff] (!%p2092_p7), %vm285_vm1, %v2475_v2  ;;  %v2667_v7 = vld [vmem:[%s2546_s30 + $0x38] sm:$0xff] (!%p2092_p7)  ;;  %v2676_v8 = vld [vmem:[%s2546_s30 + $0x30] sm:$0xff] (!%p2092_p7)  ;;  %vm972_vm9 = vcmask (!%p2092_p7), 162944  }
  0x17   : > { %427 = vrot.lane.b32.xlu1 (!%p2092_p7), %v2565_v0, %s2474_s19  ;;  %296 = vst.msk [vmem:[#allocation2 + $0x50] sm:$0xff] (!%p2092_p7), %vm285_vm1, %v2475_v2  ;;  %297 = vst.msk [vmem:[#allocation2 + $0x58] sm:$0xff] (!%p2092_p7), %vm285_vm1, %v2475_v2  ;;  %423 = vrot.lane.b32.xlu0 (!%p2092_p7), %v2568_v1, %s2474_s19  ;;  %v2679_v9 = vld [vmem:[%s2546_s30 + $0x48] sm:$0xff] (!%p2092_p7)  ;;  %v2682_v10 = vld [vmem:[%s2546_s30 + $0x40] sm:$0xff] (!%p2092_p7)  ;;  %s2476_s25 = smov (!%p2092_p7), 8   ;;  %s2477_s26 = smov (!%p2092_p7), 12  }
  0x18   : > { %298 = vst.msk [vmem:[#allocation2 + $0x60] sm:$0xff] (!%p2092_p7), %vm285_vm1, %v2475_v2  ;;  %299 = vst.msk [vmem:[#allocation2 + $0x68] sm:$0xff] (!%p2092_p7), %vm285_vm1, %v2475_v2  ;;  %v2691_v11 = vld [vmem:[%s2546_s30 + $0x58] sm:$0xff] (!%p2092_p7)  ;;  %v2694_v12 = vld [vmem:[%s2546_s30 + $0x50] sm:$0xff] (!%p2092_p7)  ;;  %s2478_s27 = smov (!%p2092_p7), 16   ;;  %s2479_s29 = smov (!%p2092_p7), 20  }
  0x19   : > { %300 = vst.msk [vmem:[#allocation2 + $0x70] sm:$0xff] (!%p2092_p7), %vm285_vm1, %v2475_v2  ;;  %301 = vst.msk [vmem:[#allocation2 + $0x78] sm:$0xff] (!%p2092_p7), %vm285_vm1, %v2475_v2  ;;  %v2697_v13 = vld [vmem:[%s2546_s30 + $0x68] sm:$0xff] (!%p2092_p7)  ;;  %v2710_v14 = vld [vmem:[%s2546_s30 + $0x60] sm:$0xff] (!%p2092_p7)  ;;  %vm1103_vm10 = vcmask (!%p2092_p7), 195744   ;;  %vm1101_vm11 = vcmask (!%p2092_p7), 195745  }
  0x1a   : > { %302 = vst.msk [vmem:[#allocation2 + $0x80] sm:$0xff] (!%p2092_p7), %vm285_vm1, %v2475_v2  ;;  %303 = vst.msk [vmem:[#allocation2 + $0x88] sm:$0xff] (!%p2092_p7), %vm285_vm1, %v2475_v2  ;;  %v2713_v15 = vld [vmem:[%s2546_s30 + $0x78] sm:$0xff] (!%p2092_p7)  ;;  %v2720_v16 = vld [vmem:[%s2546_s30 + $0x70] sm:$0xff] (!%p2092_p7) }
  0x1b   : > { %304 = vst.msk [vmem:[#allocation2 + $0x90] sm:$0xff] (!%p2092_p7), %vm285_vm1, %v2475_v2  ;;  %305 = vst.msk [vmem:[#allocation2 + $0x98] sm:$0xff] (!%p2092_p7), %vm285_vm1, %v2475_v2  ;;  %429 = vrot.lane.b32.xlu1 (!%p2092_p7), %v2647_v3, %s2474_s19  ;;  %425 = vrot.lane.b32.xlu0 (!%p2092_p7), %v2650_v4, %s2474_s19  ;;  %v2723_v17 = vld [vmem:[%s2546_s30 + $0x88] sm:$0xff] (!%p2092_p7)  ;;  %v2726_v18 = vld [vmem:[%s2546_s30 + $0x80] sm:$0xff] (!%p2092_p7) }
  0x1c   : > { %306 = vst.msk [vmem:[#allocation2 + $0xa0] sm:$0xff] %vm285_vm1, %v2475_v2  ;;  %307 = vst.msk [vmem:[#allocation2 + $0xa8] sm:$0xff] %vm285_vm1, %v2475_v2  ;;  %v2735_v19 = vld [vmem:[%s2546_s30 + $0x98] sm:$0xff]  ;;  %v2738_v20 = vld [vmem:[%s2546_s30 + $0x90] sm:$0xff] }
  0x1d   : > { %308 = vst.msk [vmem:[#allocation2 + $0xb0] sm:$0xff] %vm285_vm1, %v2475_v2  ;;  %309 = vst.msk [vmem:[#allocation2 + $0xb8] sm:$0xff] %vm285_vm1, %v2475_v2  ;;  %v2741_v21 = vld [vmem:[%s2546_s30 + $0xa8] sm:$0xff]  ;;  %v2750_v22 = vld [vmem:[%s2546_s30 + $0xa0] sm:$0xff] }
  0x1e   : > { %310 = vst.msk [vmem:[#allocation2 + $0xc0] sm:$0xff] %vm285_vm1, %v2475_v2  ;;  %311 = vst.msk [vmem:[#allocation2 + $0xc8] sm:$0xff] %vm285_vm1, %v2475_v2  ;;  %v2753_v23 = vld [vmem:[%s2546_s30 + $0xb8] sm:$0xff]  ;;  %v2756_v24 = vld [vmem:[%s2546_s30 + $0xb0] sm:$0xff] }
  0x1f   : > { %312 = vst.msk [vmem:[#allocation2 + $0xd0] sm:$0xff] %vm285_vm1, %v2475_v2  ;;  %313 = vst.msk [vmem:[#allocation2 + $0xd8] sm:$0xff] %vm285_vm1, %v2475_v2  ;;  %433 = vrot.lane.b32.xlu1 %v2661_v5, %s2474_s19  ;;  %431 = vrot.lane.b32.xlu0 %v2664_v6, %s2474_s19  ;;  %v2769_v25 = vld [vmem:[%s2546_s30 + $0xc8] sm:$0xff]  ;;  %v2772_v26 = vld [vmem:[%s2546_s30 + $0xc0] sm:$0xff] }
  0x20   : > { %314 = vst.msk [vmem:[#allocation2 + $0xe0] sm:$0xff] %vm285_vm1, %v2475_v2  ;;  %315 = vst.msk [vmem:[#allocation2 + $0xe8] sm:$0xff] %vm285_vm1, %v2475_v2  ;;  %v2779_v27 = vld [vmem:[%s2546_s30 + $0xd8] sm:$0xff]  ;;  %v2782_v28 = vld [vmem:[%s2546_s30 + $0xd0] sm:$0xff] }
  0x21   : > { %316 = vst.msk [vmem:[#allocation2 + $0xf0] sm:$0xff] %vm285_vm1, %v2475_v2  ;;  %317 = vst.msk [vmem:[#allocation2 + $0xf8] sm:$0xff] %vm285_vm1, %v2475_v2  ;;  %v2785_v29 = vld [vmem:[%s2546_s30 + $0xe8] sm:$0xff]  ;;  %v2794_v30 = vld [vmem:[%s2546_s30 + $0xe0] sm:$0xff] }
  0x22   : > { %318 = vst.msk [vmem:[#allocation2 + $0x100] sm:$0xff] %vm285_vm1, %v2475_v2  ;;  %319 = vst.msk [vmem:[#allocation2 + $0x108] sm:$0xff] %vm285_vm1, %v2475_v2  ;;  %v2797_v31 = vld [vmem:[%s2546_s30 + $0xf8] sm:$0xff]  ;;  %v2800_v32 = vld [vmem:[%s2546_s30 + $0xf0] sm:$0xff] }
  0x23   : > { %320 = vst.msk [vmem:[#allocation2 + $0x110] sm:$0xff] %vm285_vm1, %v2475_v2  ;;  %321 = vst.msk [vmem:[#allocation2 + $0x118] sm:$0xff] %vm285_vm1, %v2475_v2  ;;  %437 = vrot.lane.b32.xlu1 %v2667_v7, %s2474_s19  ;;  %435 = vrot.lane.b32.xlu0 %v2676_v8, %s2474_s19  ;;  %v2931_v39 = vld [vmem:[%s2551_s8 + $0x8] sm:$0xff]  ;;  %v2934_v40 = vld [vmem:[%s2551_s8] sm:$0xff] }
  0x24   : > { %361 = vst.msk [vmem:[#allocation2 + $0x21] sm:$0xff] %vm357_vm0, %v2565_v0  ;;  %358 = vst.msk [vmem:[#allocation2 + $0x11] sm:$0xff] %vm357_vm0, %v2568_v1  ;;  %v2943_v43 = vld [vmem:[%s2551_s8 + $0x18] sm:$0xff]  ;;  %v2946_v44 = vld [vmem:[%s2551_s8 + $0x10] sm:$0xff] }
  0x25   : > { %362 = vst.msk [vmem:[#allocation2 + $0x29] sm:$0x7f] %vm359_vm2, %v2647_v3  ;;  %360 = vst.msk [vmem:[#allocation2 + $0x19] sm:$0x7f] %vm359_vm2, %v2650_v4  ;;  %v2955_v47 = vld [vmem:[%s2551_s8 + $0x28] sm:$0xff]  ;;  %v2958_v48 = vld [vmem:[%s2551_s8 + $0x20] sm:$0xff] }
  0x26   : > { %364 = vst.msk [vmem:[#allocation2 + $0x39] sm:$0x7f] %vm359_vm2, %v2661_v5  ;;  %366 = vst.msk [vmem:[#allocation2 + $0x49] sm:$0x7f] %vm359_vm2, %v2667_v7  ;;  %v2967_v51 = vld [vmem:[%s2551_s8 + $0x38] sm:$0xff]  ;;  %v2970_v52 = vld [vmem:[%s2551_s8 + $0x30] sm:$0xff] }
  0x27   : > { %363 = vst.msk [vmem:[#allocation2 + $0x31] sm:$0xff] %vm357_vm0, %v2664_v6  ;;  %365 = vst.msk [vmem:[#allocation2 + $0x41] sm:$0xff] %vm357_vm0, %v2676_v8  ;;  %441 = vrot.lane.b32.xlu1 %v2679_v9, %s2474_s19  ;;  %439 = vrot.lane.b32.xlu0 %v2682_v10, %s2474_s19  ;;  %v2979_v55 = vld [vmem:[%s2551_s8 + $0x48] sm:$0xff]  ;;  %v2982_v56 = vld [vmem:[%s2551_s8 + $0x40] sm:$0xff] }
  0x28   : > { %368 = vst.msk [vmem:[#allocation2 + $0x59] sm:$0x7f] %vm359_vm2, %v2679_v9  ;;  %370 = vst.msk [vmem:[#allocation2 + $0x69] sm:$0x7f] %vm359_vm2, %v2691_v11  ;;  %v2991_v59 = vld [vmem:[%s2551_s8 + $0x58] sm:$0xff]  ;;  %v2994_v60 = vld [vmem:[%s2551_s8 + $0x50] sm:$0xff] }
  0x29   : > { %367 = vst.msk [vmem:[#allocation2 + $0x51] sm:$0xff] %vm357_vm0, %v2682_v10  ;;  %369 = vst.msk [vmem:[#allocation2 + $0x61] sm:$0xff] %vm357_vm0, %v2694_v12  ;;  %v3003_v63 = vld [vmem:[%s2551_s8 + $0x68] sm:$0xff] }
  0x2a   : > { %372 = vst.msk [vmem:[#allocation2 + $0x79] sm:$0x7f] %vm359_vm2, %v2697_v13  ;;  %374 = vst.msk [vmem:[#allocation2 + $0x89] sm:$0x7f] %vm359_vm2, %v2713_v15 }
  0x2b   : > { %371 = vst.msk [vmem:[#allocation2 + $0x71] sm:$0xff] %vm357_vm0, %v2710_v14  ;;  %373 = vst.msk [vmem:[#allocation2 + $0x81] sm:$0xff] %vm357_vm0, %v2720_v16  ;;  %445 = vrot.lane.b32.xlu1 %v2691_v11, %s2474_s19  ;;  %443 = vrot.lane.b32.xlu0 %v2694_v12, %s2474_s19 }
  0x2c   : > { %376 = vst.msk [vmem:[#allocation2 + $0x99] sm:$0x7f] %vm359_vm2, %v2723_v17  ;;  %378 = vst.msk [vmem:[#allocation2 + $0xa9] sm:$0x7f] %vm359_vm2, %v2735_v19 }
  0x2d   : > { %375 = vst.msk [vmem:[#allocation2 + $0x91] sm:$0xff] %vm357_vm0, %v2726_v18  ;;  %377 = vst.msk [vmem:[#allocation2 + $0xa1] sm:$0xff] %vm357_vm0, %v2738_v20 }
  0x2e   : > { %380 = vst.msk [vmem:[#allocation2 + $0xb9] sm:$0x7f] %vm359_vm2, %v2741_v21  ;;  %382 = vst.msk [vmem:[#allocation2 + $0xc9] sm:$0x7f] %vm359_vm2, %v2753_v23 }
  0x2f   : > { %379 = vst.msk [vmem:[#allocation2 + $0xb1] sm:$0xff] %vm357_vm0, %v2750_v22  ;;  %381 = vst.msk [vmem:[#allocation2 + $0xc1] sm:$0xff] %vm357_vm0, %v2756_v24  ;;  %449 = vrot.lane.b32.xlu1 %v2697_v13, %s2474_s19  ;;  %447 = vrot.lane.b32.xlu0 %v2710_v14, %s2474_s19 }
  0x30   : > { %384 = vst.msk [vmem:[#allocation2 + $0xd9] sm:$0x7f] %vm359_vm2, %v2769_v25  ;;  %386 = vst.msk [vmem:[#allocation2 + $0xe9] sm:$0x7f] %vm359_vm2, %v2779_v27 }
  0x31   : > { %383 = vst.msk [vmem:[#allocation2 + $0xd1] sm:$0xff] %vm357_vm0, %v2772_v26  ;;  %385 = vst.msk [vmem:[#allocation2 + $0xe1] sm:$0xff] %vm357_vm0, %v2782_v28 }
  0x32   : > { %388 = vst.msk [vmem:[#allocation2 + $0xf9] sm:$0x7f] %vm359_vm2, %v2785_v29  ;;  %390 = vst.msk [vmem:[#allocation2 + $0x109] sm:$0x7f] %vm359_vm2, %v2797_v31 }
  0x33   : > { %387 = vst.msk [vmem:[#allocation2 + $0xf1] sm:$0xff] %vm357_vm0, %v2794_v30  ;;  %389 = vst.msk [vmem:[#allocation2 + $0x101] sm:$0xff] %vm357_vm0, %v2800_v32  ;;  %453 = vrot.lane.b32.xlu1 %v2713_v15, %s2474_s19  ;;  %451 = vrot.lane.b32.xlu0 %v2720_v16, %s2474_s19 }
  0x34   : > { %323 = vst.msk [vmem:[%s2556_s14] sm:$0x3] %vm322_vm8, %v2475_v2 }
  0x37   : > { %457 = vrot.lane.b32.xlu1 %v2723_v17, %s2474_s19  ;;  %455 = vrot.lane.b32.xlu0 %v2726_v18, %s2474_s19 }
  0x3b   : > { %461 = vrot.lane.b32.xlu1 %v2735_v19, %s2474_s19  ;;  %459 = vrot.lane.b32.xlu0 %v2738_v20, %s2474_s19 }
  0x3f   : > { %465 = vrot.lane.b32.xlu1 %v2741_v21, %s2474_s19  ;;  %463 = vrot.lane.b32.xlu0 %v2750_v22, %s2474_s19 }
  0x43   : > { %469 = vrot.lane.b32.xlu1 %v2753_v23, %s2474_s19  ;;  %467 = vrot.lane.b32.xlu0 %v2756_v24, %s2474_s19 }
  0x47   : > { %473 = vrot.lane.b32.xlu1 %v2769_v25, %s2474_s19  ;;  %471 = vrot.lane.b32.xlu0 %v2772_v26, %s2474_s19 }
  0x4b   : > { %477 = vrot.lane.b32.xlu1 %v2779_v27, %s2474_s19  ;;  %475 = vrot.lane.b32.xlu0 %v2782_v28, %s2474_s19 }
  0x4f   : > { %481 = vrot.lane.b32.xlu1 %v2785_v29, %s2474_s19  ;;  %479 = vrot.lane.b32.xlu0 %v2794_v30, %s2474_s19 }
  0x53   : > { %485 = vrot.lane.b32.xlu1 %v2797_v31, %s2474_s19  ;;  %483 = vrot.lane.b32.xlu0 %v2800_v32, %s2474_s19 }
  0x57   : > { %554 = vrot.lane.b32.xlu1 %v2650_v4, %s2476_s25  ;;  %552 = vrot.lane.b32.xlu0 %v2568_v1, %s2476_s25  ;;  %v3015_v4 = vld [vmem:[%s2551_s8 + $0x78] sm:$0xff] }
  0x5b   : > { %558 = vrot.lane.b32.xlu1 %v2647_v3, %s2476_s25  ;;  %556 = vrot.lane.b32.xlu0 %v2565_v0, %s2476_s25  ;;  %v3006_v0 = vld [vmem:[%s2551_s8 + $0x60] sm:$0xff] }
  0x5f   : > { %562 = vrot.lane.b32.xlu1 %v2661_v5, %s2476_s25  ;;  %560 = vrot.lane.b32.xlu0 %v2664_v6, %s2476_s25  ;;  %v3018_v5 = vld [vmem:[%s2551_s8 + $0x70] sm:$0xff] }
  0x63   : > { %566 = vrot.lane.b32.xlu1 %v2667_v7, %s2476_s25  ;;  %564 = vrot.lane.b32.xlu0 %v2676_v8, %s2476_s25  ;;  %v3027_v8 = vld [vmem:[%s2551_s8 + $0x88] sm:$0xff] }
  0x67   : > { %570 = vrot.lane.b32.xlu1 %v2679_v9, %s2476_s25  ;;  %568 = vrot.lane.b32.xlu0 %v2682_v10, %s2476_s25  ;;  %v3030_v9 = vld [vmem:[%s2551_s8 + $0x80] sm:$0xff] }
  0x6b   : > { %574 = vrot.lane.b32.xlu1 %v2691_v11, %s2476_s25  ;;  %572 = vrot.lane.b32.xlu0 %v2694_v12, %s2476_s25  ;;  %v3039_v12 = vld [vmem:[%s2551_s8 + $0x98] sm:$0xff] }
  0x6f   : > { %578 = vrot.lane.b32.xlu1 %v2697_v13, %s2476_s25  ;;  %576 = vrot.lane.b32.xlu0 %v2710_v14, %s2476_s25  ;;  %v3042_v13 = vld [vmem:[%s2551_s8 + $0x90] sm:$0xff] }
  0x73   : > { %582 = vrot.lane.b32.xlu1 %v2713_v15, %s2476_s25  ;;  %580 = vrot.lane.b32.xlu0 %v2720_v16, %s2476_s25  ;;  %v3051_v16 = vld [vmem:[%s2551_s8 + $0xa8] sm:$0xff] }
  0x77   : > { %586 = vrot.lane.b32.xlu1 %v2723_v17, %s2476_s25  ;;  %584 = vrot.lane.b32.xlu0 %v2726_v18, %s2476_s25  ;;  %v3054_v17 = vld [vmem:[%s2551_s8 + $0xa0] sm:$0xff] }
  0x7b   : > { %590 = vrot.lane.b32.xlu1 %v2735_v19, %s2476_s25  ;;  %588 = vrot.lane.b32.xlu0 %v2738_v20, %s2476_s25  ;;  %v3063_v20 = vld [vmem:[%s2551_s8 + $0xb8] sm:$0xff] }
  0x7f   : > { %594 = vrot.lane.b32.xlu1 %v2741_v21, %s2476_s25  ;;  %592 = vrot.lane.b32.xlu0 %v2750_v22, %s2476_s25  ;;  %v3066_v21 = vld [vmem:[%s2551_s8 + $0xb0] sm:$0xff] }
  0x83   : > { %598 = vrot.lane.b32.xlu1 %v2753_v23, %s2476_s25  ;;  %596 = vrot.lane.b32.xlu0 %v2756_v24, %s2476_s25  ;;  %v3075_v24 = vld [vmem:[%s2551_s8 + $0xc8] sm:$0xff] }
  0x87   : > { %602 = vrot.lane.b32.xlu1 %v2769_v25, %s2476_s25  ;;  %600 = vrot.lane.b32.xlu0 %v2772_v26, %s2476_s25  ;;  %v3078_v25 = vld [vmem:[%s2551_s8 + $0xc0] sm:$0xff] }
  0x89   : > { %v428_v33 = vpop.permute.xlu1 %427  ;;  %v424_v34 = vpop.permute.xlu0 %423 }
  0x8a   : > { %522 = vst.msk [vmem:[#allocation2 + $0x20] sm:$0xff] %vm519_vm3, %v428_v33  ;;  %520 = vst.msk [vmem:[#allocation2 + $0x10] sm:$0xff] %vm519_vm3, %v424_v34  ;;  %v3102_v33 = vld [vmem:[%s2551_s8 + $0xe0] sm:$0xff] }
  0x8b   : > { %606 = vrot.lane.b32.xlu1 %v2779_v27, %s2476_s25  ;;  %604 = vrot.lane.b32.xlu0 %v2782_v28, %s2476_s25  ;;  %v3087_v28 = vld [vmem:[%s2551_s8 + $0xd8] sm:$0xff] }
  0x8d   : > { %v430_v35 = vpop.permute.xlu1 %429  ;;  %v426_v36 = vpop.permute.xlu0 %425 }
  0x8e   : > { %523 = vst.msk [vmem:[#allocation2 + $0x28] sm:$0xff] %vm519_vm3, %v430_v35  ;;  %521 = vst.msk [vmem:[#allocation2 + $0x18] sm:$0xff] %vm519_vm3, %v426_v36  ;;  %v3111_v36 = vld [vmem:[%s2551_s8 + $0xf8] sm:$0xff] }
  0x8f   : > { %610 = vrot.lane.b32.xlu1 %v2785_v29, %s2476_s25  ;;  %608 = vrot.lane.b32.xlu0 %v2794_v30, %s2476_s25  ;;  %v3090_v29 = vld [vmem:[%s2551_s8 + $0xd0] sm:$0xff] }
  0x91   : > { %v434_v37 = vpop.permute.xlu1 %433  ;;  %v432_v38 = vpop.permute.xlu0 %431 }
  0x92   : > { %525 = vst.msk [vmem:[#allocation2 + $0x38] sm:$0xff] %vm519_vm3, %v434_v37  ;;  %524 = vst.msk [vmem:[#allocation2 + $0x30] sm:$0xff] %vm519_vm3, %v432_v38  ;;  %v3114_v37 = vld [vmem:[%s2551_s8 + $0xf0] sm:$0xff] }
  0x93   : > { %614 = vrot.lane.b32.xlu1 %v2797_v31, %s2476_s25  ;;  %612 = vrot.lane.b32.xlu0 %v2800_v32, %s2476_s25  ;;  %v3099_v32 = vld [vmem:[%s2551_s8 + $0xe8] sm:$0xff] }
  0x95   : > { %v438_v41 = vpop.permute.xlu1 %437  ;;  %v436_v42 = vpop.permute.xlu0 %435 }
  0x96   : > { %527 = vst.msk [vmem:[#allocation2 + $0x48] sm:$0xff] %vm519_vm3, %v438_v41  ;;  %526 = vst.msk [vmem:[#allocation2 + $0x40] sm:$0xff] %vm519_vm3, %v436_v42 }
  0x97   : > { %748 = vrot.lane.b32.xlu1 %v2931_v39, %s2477_s26  ;;  %746 = vrot.lane.b32.xlu0 %v2934_v40, %s2477_s26 }
  0x99   : > { %v442_v45 = vpop.permute.xlu1 %441  ;;  %v440_v46 = vpop.permute.xlu0 %439 }
  0x9a   : > { %529 = vst.msk [vmem:[#allocation2 + $0x58] sm:$0xff] %vm519_vm3, %v442_v45  ;;  %528 = vst.msk [vmem:[#allocation2 + $0x50] sm:$0xff] %vm519_vm3, %v440_v46 }
  0x9b   : > { %752 = vrot.lane.b32.xlu1 %v2943_v43, %s2477_s26  ;;  %750 = vrot.lane.b32.xlu0 %v2946_v44, %s2477_s26 }
  0x9d   : > { %v446_v49 = vpop.permute.xlu1 %445  ;;  %v444_v50 = vpop.permute.xlu0 %443 }
  0x9e   : > { %531 = vst.msk [vmem:[#allocation2 + $0x68] sm:$0xff] %vm519_vm3, %v446_v49  ;;  %530 = vst.msk [vmem:[#allocation2 + $0x60] sm:$0xff] %vm519_vm3, %v444_v50 }
  0x9f   : > { %756 = vrot.lane.b32.xlu1 %v2955_v47, %s2477_s26  ;;  %754 = vrot.lane.b32.xlu0 %v2958_v48, %s2477_s26 }
  0xa1   : > { %v450_v53 = vpop.permute.xlu1 %449  ;;  %v448_v54 = vpop.permute.xlu0 %447 }
  0xa2   : > { %533 = vst.msk [vmem:[#allocation2 + $0x78] sm:$0xff] %vm519_vm3, %v450_v53  ;;  %532 = vst.msk [vmem:[#allocation2 + $0x70] sm:$0xff] %vm519_vm3, %v448_v54 }
  0xa3   : > { %760 = vrot.lane.b32.xlu1 %v2967_v51, %s2477_s26  ;;  %758 = vrot.lane.b32.xlu0 %v2970_v52, %s2477_s26 }
  0xa5   : > { %v454_v57 = vpop.permute.xlu1 %453  ;;  %v452_v58 = vpop.permute.xlu0 %451 }
  0xa6   : > { %535 = vst.msk [vmem:[#allocation2 + $0x88] sm:$0xff] %vm519_vm3, %v454_v57  ;;  %534 = vst.msk [vmem:[#allocation2 + $0x80] sm:$0xff] %vm519_vm3, %v452_v58 }
  0xa7   : > { %764 = vrot.lane.b32.xlu1 %v2979_v55, %s2477_s26  ;;  %762 = vrot.lane.b32.xlu0 %v2982_v56, %s2477_s26 }
  0xa9   : > { %v458_v61 = vpop.permute.xlu1 %457  ;;  %v456_v62 = vpop.permute.xlu0 %455 }
  0xaa   : > { %537 = vst.msk [vmem:[#allocation2 + $0x98] sm:$0xff] %vm519_vm3, %v458_v61  ;;  %536 = vst.msk [vmem:[#allocation2 + $0x90] sm:$0xff] %vm519_vm3, %v456_v62 }
  0xab   : > { %768 = vrot.lane.b32.xlu1 %v2991_v59, %s2477_s26  ;;  %766 = vrot.lane.b32.xlu0 %v2994_v60, %s2477_s26 }
  0xad   : > { %v462_v1 = vpop.permute.xlu1 %461  ;;  %v460_v3 = vpop.permute.xlu0 %459 }
  0xae   : > { %539 = vst.msk [vmem:[#allocation2 + $0xa8] sm:$0xff] %vm519_vm3, %v462_v1  ;;  %538 = vst.msk [vmem:[#allocation2 + $0xa0] sm:$0xff] %vm519_vm3, %v460_v3 }
  0xaf   : > { %772 = vrot.lane.b32.xlu1 %v3003_v63, %s2477_s26  ;;  %770 = vrot.lane.b32.xlu0 %v3006_v0, %s2477_s26 }
  0xb1   : > { %v466_v6 = vpop.permute.xlu1 %465  ;;  %v464_v7 = vpop.permute.xlu0 %463 }
  0xb2   : > { %541 = vst.msk [vmem:[#allocation2 + $0xb8] sm:$0xff] %vm519_vm3, %v466_v6  ;;  %540 = vst.msk [vmem:[#allocation2 + $0xb0] sm:$0xff] %vm519_vm3, %v464_v7 }
  0xb3   : > { %776 = vrot.lane.b32.xlu1 %v3015_v4, %s2477_s26  ;;  %774 = vrot.lane.b32.xlu0 %v3018_v5, %s2477_s26 }
  0xb5   : > { %v470_v10 = vpop.permute.xlu1 %469  ;;  %v468_v11 = vpop.permute.xlu0 %467 }
  0xb6   : > { %543 = vst.msk [vmem:[#allocation2 + $0xc8] sm:$0xff] %vm519_vm3, %v470_v10  ;;  %542 = vst.msk [vmem:[#allocation2 + $0xc0] sm:$0xff] %vm519_vm3, %v468_v11 }
  0xb7   : > { %780 = vrot.lane.b32.xlu1 %v3027_v8, %s2477_s26  ;;  %778 = vrot.lane.b32.xlu0 %v3030_v9, %s2477_s26 }
  0xb9   : > { %v474_v14 = vpop.permute.xlu1 %473  ;;  %v472_v15 = vpop.permute.xlu0 %471 }
  0xba   : > { %545 = vst.msk [vmem:[#allocation2 + $0xd8] sm:$0xff] %vm519_vm3, %v474_v14  ;;  %544 = vst.msk [vmem:[#allocation2 + $0xd0] sm:$0xff] %vm519_vm3, %v472_v15 }
  0xbb   : > { %784 = vrot.lane.b32.xlu1 %v3039_v12, %s2477_s26  ;;  %782 = vrot.lane.b32.xlu0 %v3042_v13, %s2477_s26 }
  0xbd   : > { %v478_v18 = vpop.permute.xlu1 %477  ;;  %v476_v19 = vpop.permute.xlu0 %475 }
  0xbe   : > { %547 = vst.msk [vmem:[#allocation2 + $0xe8] sm:$0xff] %vm519_vm3, %v478_v18  ;;  %546 = vst.msk [vmem:[#allocation2 + $0xe0] sm:$0xff] %vm519_vm3, %v476_v19 }
  0xbf   : > { %788 = vrot.lane.b32.xlu1 %v3051_v16, %s2477_s26  ;;  %786 = vrot.lane.b32.xlu0 %v3054_v17, %s2477_s26 }
  0xc1   : > { %v482_v22 = vpop.permute.xlu1 %481  ;;  %v480_v23 = vpop.permute.xlu0 %479 }
  0xc2   : > { %549 = vst.msk [vmem:[#allocation2 + $0xf8] sm:$0xff] %vm519_vm3, %v482_v22  ;;  %548 = vst.msk [vmem:[#allocation2 + $0xf0] sm:$0xff] %vm519_vm3, %v480_v23 }
  0xc3   : > { %792 = vrot.lane.b32.xlu1 %v3063_v20, %s2477_s26  ;;  %790 = vrot.lane.b32.xlu0 %v3066_v21, %s2477_s26 }
  0xc5   : > { %v486_v26 = vpop.permute.xlu1 %485  ;;  %v484_v27 = vpop.permute.xlu0 %483 }
  0xc6   : > { %551 = vst.msk [vmem:[#allocation2 + $0x108] sm:$0xff] %vm519_vm3, %v486_v26  ;;  %550 = vst.msk [vmem:[#allocation2 + $0x100] sm:$0xff] %vm519_vm3, %v484_v27 }
  0xc7   : > { %796 = vrot.lane.b32.xlu1 %v3075_v24, %s2477_s26  ;;  %794 = vrot.lane.b32.xlu0 %v3078_v25, %s2477_s26 }
  0xc9   : > { %v555_v30 = vpop.permute.xlu1 %554  ;;  %v553_v31 = vpop.permute.xlu0 %552 }
  0xca   : > { %651 = vst.msk [vmem:[#allocation2 + $0x17] sm:$0xff] %vm650_vm4, %v555_v30 }
  0xcb   : > { %649 = vst.msk [vmem:[#allocation2 + $0xf] sm:$0xfe] %vm648_vm5, %v553_v31  ;;  %800 = vrot.lane.b32.xlu1 %v3087_v28, %s2477_s26  ;;  %798 = vrot.lane.b32.xlu0 %v3090_v29, %s2477_s26 }
  0xcd   : > { %v559_v34 = vpop.permute.xlu1 %558  ;;  %v557_v35 = vpop.permute.xlu0 %556 }
  0xce   : > { %653 = vst.msk [vmem:[#allocation2 + $0x27] sm:$0xff] %vm650_vm4, %v559_v34 }
  0xcf   : > { %652 = vst.msk [vmem:[#allocation2 + $0x1f] sm:$0xfe] %vm648_vm5, %v557_v35  ;;  %804 = vrot.lane.b32.xlu1 %v3099_v32, %s2477_s26  ;;  %802 = vrot.lane.b32.xlu0 %v3102_v33, %s2477_s26 }
  0xd1   : > { %v563_v38 = vpop.permute.xlu1 %562  ;;  %v561_v41 = vpop.permute.xlu0 %560 }
  0xd2   : > { %655 = vst.msk [vmem:[#allocation2 + $0x37] sm:$0xff] %vm650_vm4, %v563_v38 }
  0xd3   : > { %654 = vst.msk [vmem:[#allocation2 + $0x2f] sm:$0xfe] %vm648_vm5, %v561_v41  ;;  %808 = vrot.lane.b32.xlu1 %v3111_v36, %s2477_s26  ;;  %806 = vrot.lane.b32.xlu0 %v3114_v37, %s2477_s26 }
  0xd5   : > { %v567_v42 = vpop.permute.xlu1 %566  ;;  %v565_v45 = vpop.permute.xlu0 %564 }
  0xd6   : > { %657 = vst.msk [vmem:[#allocation2 + $0x47] sm:$0xff] %vm650_vm4, %v567_v42 }
  0xd7   : > { %656 = vst.msk [vmem:[#allocation2 + $0x3f] sm:$0xfe] %vm648_vm5, %v565_v45  ;;  %878 = vrot.lane.b32.xlu1 %v2931_v39, %s2478_s27  ;;  %876 = vrot.lane.b32.xlu0 %v2934_v40, %s2478_s27 }
  0xd9   : > { %v571_v46 = vpop.permute.xlu1 %570  ;;  %v569_v49 = vpop.permute.xlu0 %568 }
  0xda   : > { %659 = vst.msk [vmem:[#allocation2 + $0x57] sm:$0xff] %vm650_vm4, %v571_v46 }
  0xdb   : > { %658 = vst.msk [vmem:[#allocation2 + $0x4f] sm:$0xfe] %vm648_vm5, %v569_v49  ;;  %882 = vrot.lane.b32.xlu1 %v2943_v43, %s2478_s27  ;;  %880 = vrot.lane.b32.xlu0 %v2946_v44, %s2478_s27 }
  0xdd   : > { %v575_v50 = vpop.permute.xlu1 %574  ;;  %v573_v53 = vpop.permute.xlu0 %572 }
  0xde   : > { %661 = vst.msk [vmem:[#allocation2 + $0x67] sm:$0xff] %vm650_vm4, %v575_v50 }
  0xdf   : > { %660 = vst.msk [vmem:[#allocation2 + $0x5f] sm:$0xfe] %vm648_vm5, %v573_v53  ;;  %886 = vrot.lane.b32.xlu1 %v2955_v47, %s2478_s27  ;;  %884 = vrot.lane.b32.xlu0 %v2958_v48, %s2478_s27 }
  0xe1   : > { %v579_v54 = vpop.permute.xlu1 %578  ;;  %v577_v57 = vpop.permute.xlu0 %576 }
  0xe2   : > { %663 = vst.msk [vmem:[#allocation2 + $0x77] sm:$0xff] %vm650_vm4, %v579_v54 }
  0xe3   : > { %662 = vst.msk [vmem:[#allocation2 + $0x6f] sm:$0xfe] %vm648_vm5, %v577_v57  ;;  %890 = vrot.lane.b32.xlu1 %v2967_v51, %s2478_s27  ;;  %888 = vrot.lane.b32.xlu0 %v2970_v52, %s2478_s27 }
  0xe5   : > { %v583_v58 = vpop.permute.xlu1 %582  ;;  %v581_v61 = vpop.permute.xlu0 %580 }
  0xe6   : > { %665 = vst.msk [vmem:[#allocation2 + $0x87] sm:$0xff] %vm650_vm4, %v583_v58 }
  0xe7   : > { %664 = vst.msk [vmem:[#allocation2 + $0x7f] sm:$0xfe] %vm648_vm5, %v581_v61  ;;  %894 = vrot.lane.b32.xlu1 %v2979_v55, %s2478_s27  ;;  %892 = vrot.lane.b32.xlu0 %v2982_v56, %s2478_s27 }
  0xe9   : > { %v587_v62 = vpop.permute.xlu1 %586  ;;  %v585_v1 = vpop.permute.xlu0 %584 }
  0xea   : > { %667 = vst.msk [vmem:[#allocation2 + $0x97] sm:$0xff] %vm650_vm4, %v587_v62 }
  0xeb   : > { %666 = vst.msk [vmem:[#allocation2 + $0x8f] sm:$0xfe] %vm648_vm5, %v585_v1  ;;  %898 = vrot.lane.b32.xlu1 %v2991_v59, %s2478_s27  ;;  %896 = vrot.lane.b32.xlu0 %v2994_v60, %s2478_s27 }
  0xed   : > { %v591_v3 = vpop.permute.xlu1 %590  ;;  %v589_v6 = vpop.permute.xlu0 %588 }
  0xee   : > { %669 = vst.msk [vmem:[#allocation2 + $0xa7] sm:$0xff] %vm650_vm4, %v591_v3 }
  0xef   : > { %668 = vst.msk [vmem:[#allocation2 + $0x9f] sm:$0xfe] %vm648_vm5, %v589_v6  ;;  %902 = vrot.lane.b32.xlu1 %v3003_v63, %s2478_s27  ;;  %900 = vrot.lane.b32.xlu0 %v3006_v0, %s2478_s27 }
  0xf1   : > { %v595_v7 = vpop.permute.xlu1 %594  ;;  %v593_v10 = vpop.permute.xlu0 %592 }
  0xf2   : > { %671 = vst.msk [vmem:[#allocation2 + $0xb7] sm:$0xff] %vm650_vm4, %v595_v7 }
  0xf3   : > { %670 = vst.msk [vmem:[#allocation2 + $0xaf] sm:$0xfe] %vm648_vm5, %v593_v10  ;;  %906 = vrot.lane.b32.xlu1 %v3015_v4, %s2478_s27  ;;  %904 = vrot.lane.b32.xlu0 %v3018_v5, %s2478_s27 }
  0xf5   : > { %v599_v11 = vpop.permute.xlu1 %598  ;;  %v597_v14 = vpop.permute.xlu0 %596 }
  0xf6   : > { %673 = vst.msk [vmem:[#allocation2 + $0xc7] sm:$0xff] %vm650_vm4, %v599_v11 }
  0xf7   : > { %672 = vst.msk [vmem:[#allocation2 + $0xbf] sm:$0xfe] %vm648_vm5, %v597_v14  ;;  %910 = vrot.lane.b32.xlu1 %v3027_v8, %s2478_s27  ;;  %908 = vrot.lane.b32.xlu0 %v3030_v9, %s2478_s27 }
  0xf9   : > { %v603_v15 = vpop.permute.xlu1 %602  ;;  %v601_v18 = vpop.permute.xlu0 %600 }
  0xfa   : > { %675 = vst.msk [vmem:[#allocation2 + $0xd7] sm:$0xff] %vm650_vm4, %v603_v15 }
  0xfb   : > { %674 = vst.msk [vmem:[#allocation2 + $0xcf] sm:$0xfe] %vm648_vm5, %v601_v18  ;;  %914 = vrot.lane.b32.xlu1 %v3039_v12, %s2478_s27  ;;  %912 = vrot.lane.b32.xlu0 %v3042_v13, %s2478_s27 }
  0xfd   : > { %v607_v19 = vpop.permute.xlu1 %606  ;;  %v605_v22 = vpop.permute.xlu0 %604 }
  0xfe   : > { %677 = vst.msk [vmem:[#allocation2 + $0xe7] sm:$0xff] %vm650_vm4, %v607_v19 }
  0xff   : > { %676 = vst.msk [vmem:[#allocation2 + $0xdf] sm:$0xfe] %vm648_vm5, %v605_v22  ;;  %918 = vrot.lane.b32.xlu1 %v3051_v16, %s2478_s27  ;;  %916 = vrot.lane.b32.xlu0 %v3054_v17, %s2478_s27 }
 0x101   : > { %v611_v23 = vpop.permute.xlu1 %610  ;;  %v609_v26 = vpop.permute.xlu0 %608 }
 0x102   : > { %679 = vst.msk [vmem:[#allocation2 + $0xf7] sm:$0xff] %vm650_vm4, %v611_v23 }
 0x103   : > { %678 = vst.msk [vmem:[#allocation2 + $0xef] sm:$0xfe] %vm648_vm5, %v609_v26  ;;  %922 = vrot.lane.b32.xlu1 %v3063_v20, %s2478_s27  ;;  %920 = vrot.lane.b32.xlu0 %v3066_v21, %s2478_s27 }
 0x105   : > { %v615_v27 = vpop.permute.xlu1 %614  ;;  %v613_v30 = vpop.permute.xlu0 %612 }
 0x106   : > { %681 = vst.msk [vmem:[#allocation2 + $0x107] sm:$0xff] %vm650_vm4, %v615_v27 }
 0x107   : > { %680 = vst.msk [vmem:[#allocation2 + $0xff] sm:$0xfe] %vm648_vm5, %v613_v30  ;;  %926 = vrot.lane.b32.xlu1 %v3075_v24, %s2478_s27  ;;  %924 = vrot.lane.b32.xlu0 %v3078_v25, %s2478_s27 }
 0x109   : > { %v749_v31 = vpop.permute.xlu1 %748  ;;  %v747_v34 = vpop.permute.xlu0 %746 }
 0x10a   : > { %845 = vst.msk [vmem:[#allocation2 + $0x19] sm:$0x7f] %vm844_vm6, %v749_v31 }
 0x10b   : > { %843 = vst.msk [vmem:[#allocation2 + $0x11] sm:$0xff] %vm842_vm7, %v747_v34  ;;  %930 = vrot.lane.b32.xlu1 %v3087_v28, %s2478_s27  ;;  %928 = vrot.lane.b32.xlu0 %v3090_v29, %s2478_s27 }
 0x10d   : > { %v753_v35 = vpop.permute.xlu1 %752  ;;  %v751_v38 = vpop.permute.xlu0 %750 }
 0x10e   : > { %847 = vst.msk [vmem:[#allocation2 + $0x29] sm:$0x7f] %vm844_vm6, %v753_v35 }
 0x10f   : > { %846 = vst.msk [vmem:[#allocation2 + $0x21] sm:$0xff] %vm842_vm7, %v751_v38  ;;  %934 = vrot.lane.b32.xlu1 %v3099_v32, %s2478_s27  ;;  %932 = vrot.lane.b32.xlu0 %v3102_v33, %s2478_s27 }
 0x111   : > { %v757_v41 = vpop.permute.xlu1 %756  ;;  %v755_v42 = vpop.permute.xlu0 %754 }
 0x112   : > { %849 = vst.msk [vmem:[#allocation2 + $0x39] sm:$0x7f] %vm844_vm6, %v757_v41 }
 0x113   : > { %848 = vst.msk [vmem:[#allocation2 + $0x31] sm:$0xff] %vm842_vm7, %v755_v42  ;;  %938 = vrot.lane.b32.xlu1 %v3111_v36, %s2478_s27  ;;  %936 = vrot.lane.b32.xlu0 %v3114_v37, %s2478_s27 }
 0x115   : > { %v761_v45 = vpop.permute.xlu1 %760  ;;  %v759_v46 = vpop.permute.xlu0 %758 }
 0x116   : > { %851 = vst.msk [vmem:[#allocation2 + $0x49] sm:$0x7f] %vm844_vm6, %v761_v45 }
 0x117   : > { %850 = vst.msk [vmem:[#allocation2 + $0x41] sm:$0xff] %vm842_vm7, %v759_v46  ;;  %1007 = vrot.lane.b32.xlu1 %v2931_v39, %s2479_s29  ;;  %1005 = vrot.lane.b32.xlu0 %v2934_v40, %s2479_s29 }
 0x119   : > { %v765_v49 = vpop.permute.xlu1 %764  ;;  %v763_v50 = vpop.permute.xlu0 %762 }
 0x11a   : > { %853 = vst.msk [vmem:[#allocation2 + $0x59] sm:$0x7f] %vm844_vm6, %v765_v49 }
 0x11b   : > { %852 = vst.msk [vmem:[#allocation2 + $0x51] sm:$0xff] %vm842_vm7, %v763_v50  ;;  %1011 = vrot.lane.b32.xlu1 %v2943_v43, %s2479_s29  ;;  %1009 = vrot.lane.b32.xlu0 %v2946_v44, %s2479_s29 }
 0x11d   : > { %v769_v53 = vpop.permute.xlu1 %768  ;;  %v767_v54 = vpop.permute.xlu0 %766 }
 0x11e   : > { %855 = vst.msk [vmem:[#allocation2 + $0x69] sm:$0x7f] %vm844_vm6, %v769_v53 }
 0x11f   : > { %854 = vst.msk [vmem:[#allocation2 + $0x61] sm:$0xff] %vm842_vm7, %v767_v54  ;;  %1015 = vrot.lane.b32.xlu1 %v2955_v47, %s2479_s29  ;;  %1013 = vrot.lane.b32.xlu0 %v2958_v48, %s2479_s29 }
 0x121   : > { %v773_v39 = vpop.permute.xlu1 %772  ;;  %v771_v40 = vpop.permute.xlu0 %770 }
 0x122   : > { %857 = vst.msk [vmem:[#allocation2 + $0x79] sm:$0x7f] %vm844_vm6, %v773_v39 }
 0x123   : > { %856 = vst.msk [vmem:[#allocation2 + $0x71] sm:$0xff] %vm842_vm7, %v771_v40  ;;  %1019 = vrot.lane.b32.xlu1 %v2967_v51, %s2479_s29  ;;  %1017 = vrot.lane.b32.xlu0 %v2970_v52, %s2479_s29 }
 0x125   : > { %v777_v43 = vpop.permute.xlu1 %776  ;;  %v775_v44 = vpop.permute.xlu0 %774 }
 0x126   : > { %859 = vst.msk [vmem:[#allocation2 + $0x89] sm:$0x7f] %vm844_vm6, %v777_v43 }
 0x127   : > { %858 = vst.msk [vmem:[#allocation2 + $0x81] sm:$0xff] %vm842_vm7, %v775_v44  ;;  %1023 = vrot.lane.b32.xlu1 %v2979_v55, %s2479_s29  ;;  %1021 = vrot.lane.b32.xlu0 %v2982_v56, %s2479_s29 }
 0x129   : > { %v781_v47 = vpop.permute.xlu1 %780  ;;  %v779_v48 = vpop.permute.xlu0 %778 }
 0x12a   : > { %861 = vst.msk [vmem:[#allocation2 + $0x99] sm:$0x7f] %vm844_vm6, %v781_v47 }
 0x12b   : > { %860 = vst.msk [vmem:[#allocation2 + $0x91] sm:$0xff] %vm842_vm7, %v779_v48  ;;  %1027 = vrot.lane.b32.xlu1 %v2991_v59, %s2479_s29  ;;  %1025 = vrot.lane.b32.xlu0 %v2994_v60, %s2479_s29 }
 0x12d   : > { %v785_v51 = vpop.permute.xlu1 %784  ;;  %v783_v52 = vpop.permute.xlu0 %782 }
 0x12e   : > { %863 = vst.msk [vmem:[#allocation2 + $0xa9] sm:$0x7f] %vm844_vm6, %v785_v51 }
 0x12f   : > { %862 = vst.msk [vmem:[#allocation2 + $0xa1] sm:$0xff] %vm842_vm7, %v783_v52  ;;  %1031 = vrot.lane.b32.xlu1 %v3003_v63, %s2479_s29  ;;  %1029 = vrot.lane.b32.xlu0 %v3006_v0, %s2479_s29 }
 0x131   : > { %v789_v55 = vpop.permute.xlu1 %788  ;;  %v787_v56 = vpop.permute.xlu0 %786 }
 0x132   : > { %865 = vst.msk [vmem:[#allocation2 + $0xb9] sm:$0x7f] %vm844_vm6, %v789_v55 }
 0x133   : > { %864 = vst.msk [vmem:[#allocation2 + $0xb1] sm:$0xff] %vm842_vm7, %v787_v56  ;;  %1035 = vrot.lane.b32.xlu1 %v3015_v4, %s2479_s29  ;;  %1033 = vrot.lane.b32.xlu0 %v3018_v5, %s2479_s29 }
 0x135   : > { %v793_v59 = vpop.permute.xlu1 %792  ;;  %v791_v60 = vpop.permute.xlu0 %790 }
 0x136   : > { %867 = vst.msk [vmem:[#allocation2 + $0xc9] sm:$0x7f] %vm844_vm6, %v793_v59 }
 0x137   : > { %866 = vst.msk [vmem:[#allocation2 + $0xc1] sm:$0xff] %vm842_vm7, %v791_v60  ;;  %1039 = vrot.lane.b32.xlu1 %v3027_v8, %s2479_s29  ;;  %1037 = vrot.lane.b32.xlu0 %v3030_v9, %s2479_s29 }
 0x139   : > { %v797_v63 = vpop.permute.xlu1 %796  ;;  %v795_v0 = vpop.permute.xlu0 %794 }
 0x13a   : > { %869 = vst.msk [vmem:[#allocation2 + $0xd9] sm:$0x7f] %vm844_vm6, %v797_v63 }
 0x13b   : > { %868 = vst.msk [vmem:[#allocation2 + $0xd1] sm:$0xff] %vm842_vm7, %v795_v0  ;;  %1043 = vrot.lane.b32.xlu1 %v3039_v12, %s2479_s29  ;;  %1041 = vrot.lane.b32.xlu0 %v3042_v13, %s2479_s29 }
 0x13d   : > { %v801_v4 = vpop.permute.xlu1 %800  ;;  %v799_v5 = vpop.permute.xlu0 %798 }
 0x13e   : > { %871 = vst.msk [vmem:[#allocation2 + $0xe9] sm:$0x7f] %vm844_vm6, %v801_v4 }
 0x13f   : > { %870 = vst.msk [vmem:[#allocation2 + $0xe1] sm:$0xff] %vm842_vm7, %v799_v5  ;;  %1047 = vrot.lane.b32.xlu1 %v3051_v16, %s2479_s29  ;;  %1045 = vrot.lane.b32.xlu0 %v3054_v17, %s2479_s29 }
 0x141   : > { %v805_v8 = vpop.permute.xlu1 %804  ;;  %v803_v9 = vpop.permute.xlu0 %802 }
 0x142   : > { %873 = vst.msk [vmem:[#allocation2 + $0xf9] sm:$0x7f] %vm844_vm6, %v805_v8 }
 0x143   : > { %872 = vst.msk [vmem:[#allocation2 + $0xf1] sm:$0xff] %vm842_vm7, %v803_v9  ;;  %1051 = vrot.lane.b32.xlu1 %v3063_v20, %s2479_s29  ;;  %1049 = vrot.lane.b32.xlu0 %v3066_v21, %s2479_s29 }
 0x145   : > { %v809_v12 = vpop.permute.xlu1 %808  ;;  %v807_v13 = vpop.permute.xlu0 %806 }
 0x146   : > { %875 = vst.msk [vmem:[#allocation2 + $0x109] sm:$0x7f] %vm844_vm6, %v809_v12 }
 0x147   : > { %874 = vst.msk [vmem:[#allocation2 + $0x101] sm:$0xff] %vm842_vm7, %v807_v13  ;;  %1055 = vrot.lane.b32.xlu1 %v3075_v24, %s2479_s29  ;;  %1053 = vrot.lane.b32.xlu0 %v3078_v25, %s2479_s29 }
 0x149   : > { %v879_v16 = vpop.permute.xlu1 %878  ;;  %v877_v17 = vpop.permute.xlu0 %876 }
 0x14a   : > { %974 = vst.msk [vmem:[#allocation2 + $0x18] sm:$0xff] %vm972_vm9, %v879_v16  ;;  %973 = vst.msk [vmem:[#allocation2 + $0x10] sm:$0xff] %vm972_vm9, %v877_v17 }
 0x14b   : > { %1059 = vrot.lane.b32.xlu1 %v3087_v28, %s2479_s29  ;;  %1057 = vrot.lane.b32.xlu0 %v3090_v29, %s2479_s29 }
 0x14d   : > { %v883_v2 = vpop.permute.xlu1 %882  ;;  %v881_v20 = vpop.permute.xlu0 %880 }
 0x14e   : > { %976 = vst.msk [vmem:[#allocation2 + $0x28] sm:$0xff] %vm972_vm9, %v883_v2  ;;  %975 = vst.msk [vmem:[#allocation2 + $0x20] sm:$0xff] %vm972_vm9, %v881_v20 }
 0x14f   : > { %1063 = vrot.lane.b32.xlu1 %v3099_v32, %s2479_s29  ;;  %1061 = vrot.lane.b32.xlu0 %v3102_v33, %s2479_s29 }
 0x151   : > { %v887_v21 = vpop.permute.xlu1 %886  ;;  %v885_v24 = vpop.permute.xlu0 %884 }
 0x152   : > { %978 = vst.msk [vmem:[#allocation2 + $0x38] sm:$0xff] %vm972_vm9, %v887_v21  ;;  %977 = vst.msk [vmem:[#allocation2 + $0x30] sm:$0xff] %vm972_vm9, %v885_v24 }
 0x153   : > { %1067 = vrot.lane.b32.xlu1 %v3111_v36, %s2479_s29  ;;  %1065 = vrot.lane.b32.xlu0 %v3114_v37, %s2479_s29 }
 0x155   : > { %v891_v25 = vpop.permute.xlu1 %890  ;;  %v889_v28 = vpop.permute.xlu0 %888 }
 0x156   : > { %980 = vst.msk [vmem:[#allocation2 + $0x48] sm:$0xff] %vm972_vm9, %v891_v25  ;;  %979 = vst.msk [vmem:[#allocation2 + $0x40] sm:$0xff] %vm972_vm9, %v889_v28 }
 0x159   : > { %v895_v29 = vpop.permute.xlu1 %894  ;;  %v893_v32 = vpop.permute.xlu0 %892 }
 0x15a   : > { %982 = vst.msk [vmem:[#allocation2 + $0x58] sm:$0xff] %vm972_vm9, %v895_v29  ;;  %981 = vst.msk [vmem:[#allocation2 + $0x50] sm:$0xff] %vm972_vm9, %v893_v32 }
 0x15d   : > { %v899_v33 = vpop.permute.xlu1 %898  ;;  %v897_v57 = vpop.permute.xlu0 %896 }
 0x15e   : > { %984 = vst.msk [vmem:[#allocation2 + $0x68] sm:$0xff] %vm972_vm9, %v899_v33  ;;  %983 = vst.msk [vmem:[#allocation2 + $0x60] sm:$0xff] %vm972_vm9, %v897_v57 }
 0x161   : > { %v903_v36 = vpop.permute.xlu1 %902  ;;  %v901_v37 = vpop.permute.xlu0 %900 }
 0x162   : > { %986 = vst.msk [vmem:[#allocation2 + $0x78] sm:$0xff] %vm972_vm9, %v903_v36  ;;  %985 = vst.msk [vmem:[#allocation2 + $0x70] sm:$0xff] %vm972_vm9, %v901_v37 }
 0x165   : > { %v907_v58 = vpop.permute.xlu1 %906  ;;  %v905_v61 = vpop.permute.xlu0 %904 }
 0x166   : > { %988 = vst.msk [vmem:[#allocation2 + $0x88] sm:$0xff] %vm972_vm9, %v907_v58  ;;  %987 = vst.msk [vmem:[#allocation2 + $0x80] sm:$0xff] %vm972_vm9, %v905_v61 }
 0x169   : > { %v911_v62 = vpop.permute.xlu1 %910  ;;  %v909_v1 = vpop.permute.xlu0 %908 }
 0x16a   : > { %990 = vst.msk [vmem:[#allocation2 + $0x98] sm:$0xff] %vm972_vm9, %v911_v62  ;;  %989 = vst.msk [vmem:[#allocation2 + $0x90] sm:$0xff] %vm972_vm9, %v909_v1 }
 0x16d   : > { %v915_v3 = vpop.permute.xlu1 %914  ;;  %v913_v6 = vpop.permute.xlu0 %912 }
 0x16e   : > { %992 = vst.msk [vmem:[#allocation2 + $0xa8] sm:$0xff] %vm972_vm9, %v915_v3  ;;  %991 = vst.msk [vmem:[#allocation2 + $0xa0] sm:$0xff] %vm972_vm9, %v913_v6 }
 0x171   : > { %v919_v7 = vpop.permute.xlu1 %918  ;;  %v917_v10 = vpop.permute.xlu0 %916 }
 0x172   : > { %994 = vst.msk [vmem:[#allocation2 + $0xb8] sm:$0xff] %vm972_vm9, %v919_v7  ;;  %993 = vst.msk [vmem:[#allocation2 + $0xb0] sm:$0xff] %vm972_vm9, %v917_v10 }
 0x175   : > { %v923_v11 = vpop.permute.xlu1 %922  ;;  %v921_v14 = vpop.permute.xlu0 %920 }
 0x176   : > { %996 = vst.msk [vmem:[#allocation2 + $0xc8] sm:$0xff] %vm972_vm9, %v923_v11  ;;  %995 = vst.msk [vmem:[#allocation2 + $0xc0] sm:$0xff] %vm972_vm9, %v921_v14 }
 0x179   : > { %v927_v15 = vpop.permute.xlu1 %926  ;;  %v925_v18 = vpop.permute.xlu0 %924 }
 0x17a   : > { %998 = vst.msk [vmem:[#allocation2 + $0xd8] sm:$0xff] %vm972_vm9, %v927_v15  ;;  %997 = vst.msk [vmem:[#allocation2 + $0xd0] sm:$0xff] %vm972_vm9, %v925_v18 }
 0x17d   : > { %v931_v19 = vpop.permute.xlu1 %930  ;;  %v929_v22 = vpop.permute.xlu0 %928 }
 0x17e   : > { %1000 = vst.msk [vmem:[#allocation2 + $0xe8] sm:$0xff] %vm972_vm9, %v931_v19  ;;  %999 = vst.msk [vmem:[#allocation2 + $0xe0] sm:$0xff] %vm972_vm9, %v929_v22 }
 0x181   : > { %v935_v23 = vpop.permute.xlu1 %934  ;;  %v933_v26 = vpop.permute.xlu0 %932 }
 0x182   : > { %1002 = vst.msk [vmem:[#allocation2 + $0xf8] sm:$0xff] %vm972_vm9, %v935_v23  ;;  %1001 = vst.msk [vmem:[#allocation2 + $0xf0] sm:$0xff] %vm972_vm9, %v933_v26 }
 0x185   : > { %v939_v27 = vpop.permute.xlu1 %938  ;;  %v937_v30 = vpop.permute.xlu0 %936 }
 0x186   : > { %1004 = vst.msk [vmem:[#allocation2 + $0x108] sm:$0xff] %vm972_vm9, %v939_v27  ;;  %1003 = vst.msk [vmem:[#allocation2 + $0x100] sm:$0xff] %vm972_vm9, %v937_v30 }
 0x189   : > { %v1008_v31 = vpop.permute.xlu1 %1007  ;;  %v1006_v34 = vpop.permute.xlu0 %1005 }
 0x18a   : > { %1104 = vst.msk [vmem:[#allocation2 + $0x17] sm:$0xff] %vm1103_vm10, %v1008_v31 }
 0x18b   : > { %1102 = vst.msk [vmem:[#allocation2 + $0xf] sm:$0xfe] %vm1101_vm11, %v1006_v34 }
 0x18d   : > { %v1012_v35 = vpop.permute.xlu1 %1011  ;;  %v1010_v38 = vpop.permute.xlu0 %1009 }
 0x18e   : > { %1106 = vst.msk [vmem:[#allocation2 + $0x27] sm:$0xff] %vm1103_vm10, %v1012_v35 }
 0x18f   : > { %1105 = vst.msk [vmem:[#allocation2 + $0x1f] sm:$0xfe] %vm1101_vm11, %v1010_v38 }
 0x191   : > { %v1016_v41 = vpop.permute.xlu1 %1015  ;;  %v1014_v42 = vpop.permute.xlu0 %1013 }
 0x192   : > { %1108 = vst.msk [vmem:[#allocation2 + $0x37] sm:$0xff] %vm1103_vm10, %v1016_v41 }
 0x193   : > { %1107 = vst.msk [vmem:[#allocation2 + $0x2f] sm:$0xfe] %vm1101_vm11, %v1014_v42 }
 0x195   : > { %v1020_v45 = vpop.permute.xlu1 %1019  ;;  %v1018_v46 = vpop.permute.xlu0 %1017 }
 0x196   : > { %1110 = vst.msk [vmem:[#allocation2 + $0x47] sm:$0xff] %vm1103_vm10, %v1020_v45 }
 0x197   : > { %1109 = vst.msk [vmem:[#allocation2 + $0x3f] sm:$0xfe] %vm1101_vm11, %v1018_v46 }
 0x199   : > { %v1024_v49 = vpop.permute.xlu1 %1023  ;;  %v1022_v50 = vpop.permute.xlu0 %1021 }
 0x19a   : > { %1112 = vst.msk [vmem:[#allocation2 + $0x57] sm:$0xff] %vm1103_vm10, %v1024_v49 }
 0x19b   : > { %1111 = vst.msk [vmem:[#allocation2 + $0x4f] sm:$0xfe] %vm1101_vm11, %v1022_v50 }
 0x19d   : > { %v1028_v53 = vpop.permute.xlu1 %1027  ;;  %v1026_v54 = vpop.permute.xlu0 %1025 }
 0x19e   : > { %1114 = vst.msk [vmem:[#allocation2 + $0x67] sm:$0xff] %vm1103_vm10, %v1028_v53 }
 0x19f   : > { %1113 = vst.msk [vmem:[#allocation2 + $0x5f] sm:$0xfe] %vm1101_vm11, %v1026_v54 }
 0x1a1   : > { %v1032_v39 = vpop.permute.xlu1 %1031  ;;  %v1030_v40 = vpop.permute.xlu0 %1029 }
 0x1a2   : > { %1116 = vst.msk [vmem:[#allocation2 + $0x77] sm:$0xff] %vm1103_vm10, %v1032_v39 }
 0x1a3   : > { %1115 = vst.msk [vmem:[#allocation2 + $0x6f] sm:$0xfe] %vm1101_vm11, %v1030_v40 }
 0x1a5   : > { %v1036_v43 = vpop.permute.xlu1 %1035  ;;  %v1034_v44 = vpop.permute.xlu0 %1033 }
 0x1a6   : > { %1118 = vst.msk [vmem:[#allocation2 + $0x87] sm:$0xff] %vm1103_vm10, %v1036_v43 }
 0x1a7   : > { %1117 = vst.msk [vmem:[#allocation2 + $0x7f] sm:$0xfe] %vm1101_vm11, %v1034_v44 }
 0x1a9   : > { %v1040_v47 = vpop.permute.xlu1 %1039  ;;  %v1038_v48 = vpop.permute.xlu0 %1037 }
 0x1aa   : > { %1120 = vst.msk [vmem:[#allocation2 + $0x97] sm:$0xff] %vm1103_vm10, %v1040_v47 }
 0x1ab   : > { %1119 = vst.msk [vmem:[#allocation2 + $0x8f] sm:$0xfe] %vm1101_vm11, %v1038_v48 }
 0x1ad   : > { %v1044_v51 = vpop.permute.xlu1 %1043  ;;  %v1042_v52 = vpop.permute.xlu0 %1041 }
 0x1ae   : > { %1122 = vst.msk [vmem:[#allocation2 + $0xa7] sm:$0xff] %vm1103_vm10, %v1044_v51 }
 0x1af   : > { %1121 = vst.msk [vmem:[#allocation2 + $0x9f] sm:$0xfe] %vm1101_vm11, %v1042_v52 }
 0x1b1   : > { %v1048_v55 = vpop.permute.xlu1 %1047  ;;  %v1046_v56 = vpop.permute.xlu0 %1045 }
 0x1b2   : > { %1124 = vst.msk [vmem:[#allocation2 + $0xb7] sm:$0xff] %vm1103_vm10, %v1048_v55 }
 0x1b3   : > { %1123 = vst.msk [vmem:[#allocation2 + $0xaf] sm:$0xfe] %vm1101_vm11, %v1046_v56 }
 0x1b5   : > { %v1052_v59 = vpop.permute.xlu1 %1051  ;;  %v1050_v60 = vpop.permute.xlu0 %1049 }
 0x1b6   : > { %1126 = vst.msk [vmem:[#allocation2 + $0xc7] sm:$0xff] %vm1103_vm10, %v1052_v59 }
 0x1b7   : > { %1125 = vst.msk [vmem:[#allocation2 + $0xbf] sm:$0xfe] %vm1101_vm11, %v1050_v60 }
 0x1b9   : > { %v1056_v63 = vpop.permute.xlu1 %1055  ;;  %v1054_v0 = vpop.permute.xlu0 %1053 }
 0x1ba   : > { %1128 = vst.msk [vmem:[#allocation2 + $0xd7] sm:$0xff] %vm1103_vm10, %v1056_v63 }
 0x1bb   : > { %1127 = vst.msk [vmem:[#allocation2 + $0xcf] sm:$0xfe] %vm1101_vm11, %v1054_v0 }
 0x1bd   : > { %v1060_v4 = vpop.permute.xlu1 %1059  ;;  %v1058_v5 = vpop.permute.xlu0 %1057 }
 0x1be   : > { %1130 = vst.msk [vmem:[#allocation2 + $0xe7] sm:$0xff] %vm1103_vm10, %v1060_v4 }
 0x1bf   : > { %1129 = vst.msk [vmem:[#allocation2 + $0xdf] sm:$0xfe] %vm1101_vm11, %v1058_v5 }
 0x1c1   : > { %v1064_v8 = vpop.permute.xlu1 %1063  ;;  %v1062_v9 = vpop.permute.xlu0 %1061 }
 0x1c2   : > { %1132 = vst.msk [vmem:[#allocation2 + $0xf7] sm:$0xff] %vm1103_vm10, %v1064_v8 }
 0x1c3   : > { %1131 = vst.msk [vmem:[#allocation2 + $0xef] sm:$0xfe] %vm1101_vm11, %v1062_v9 }
 0x1c5   : > { %v1068_v12 = vpop.permute.xlu1 %1067  ;;  %v1066_v13 = vpop.permute.xlu0 %1065 }
 0x1c6   : > { %1134 = vst.msk [vmem:[#allocation2 + $0x107] sm:$0xff] %vm1103_vm10, %v1068_v12 }
 0x1c7   : > { %1133 = vst.msk [vmem:[#allocation2 + $0xff] sm:$0xfe] %vm1101_vm11, %v1066_v13 }
 0x1c8 PF: > { %v2113_v16 = vld [vmem:[%s3576_s2 + $0x18] sm:$0xff]  ;;  %v2114_v17 = vld [vmem:[%s3576_s2 + $0x20] sm:$0xff]  ;;  %s2190_s11 = sshll.u32 %s2456_s18, 7  ;;  %vm1180_vm12 = vcmask 195584   ;;  %v1155_v21 = vld [vmem:[%s3576_s2 + $0x8] sm:$0xff]  ;;  %vm1822_vm13 = vcmask 31744  }
 0x1c9   : > { %v1154_v2 = vld [vmem:[%s3576_s2] sm:$0xff]  ;;  %v2340_v20 = vpack.c.bf16 %v2114_v17, %v2113_v16  ;;  %v2115_v25 = vld [vmem:[%s3576_s2 + $0x28] sm:$0xff]  ;;  %s3390_s17 = scalar_lea.vmem [#allocation2], %s2190_s11  ;;  %v1156_v29 = vld [vmem:[%s3576_s2 + $0x10] sm:$0xff]  ;;  %vm1930_vm14 = vcmask 1040384   ;;  %vm1933_vm15 = vcmask 25600  }
 0x1ca   : > { %v2344_v24 = vpack.c.bf16 %v1155_v21, %v1154_v2  ;;  %v2166_v33 = vld [vmem:[%s3576_s2 + $0x30] sm:$0xff]  ;;  %v2167_v57 = vld [vmem:[%s3576_s2 + $0x38] sm:$0xff]  ;;  %v2168_v3 = vld [vmem:[%s3576_s2 + $0x40] sm:$0xff] }
 0x1cb   : > { %2341 = vmatprep.subr.bf16.mxu1 %v2340_v20  ;;  %v2348_v58 = vpack.c.bf16 %v2167_v57, %v2166_v33  ;;  %v3475_v50 = vld [vmem:[%s3577_s3] ss:$0 sm:$0xff] }
 0x1cc   : > { %2345 = vmatprep.subr.bf16.mxu0 %v2344_v24  ;;  %2343 = vmatpush3.bf16.msra.mxu1 %v2340_v20 }
 0x1cd   : > { %2347 = vmatpush3.bf16.msra.mxu0 %v2344_v24  ;;  %2254 = vmatprep.subr.mxu1 %v2115_v25 }
 0x1ce   : > { %v2097_v28 = vld [vmem:[%s3390_s17 + $0x10] sm:$0xff]  ;;  %v1138_v32 = vld [vmem:[%s3390_s17] sm:$0xff]  ;;  %2284 = vmatprep.subr.mxu0 %v1156_v29  ;;  %v2098_v36 = vld [vmem:[%s3390_s17 + $0x18] sm:$0xff] }
 0x1cf   : > { %2256 = vmatprep.mubr.msk.f32.mxu1 %vm1180_vm12, %v2097_v28  ;;  %2286 = vmatprep.mubr.msk.f32.mxu0 %vm1180_vm12, %v1138_v32  ;;  %v1139_v37 = vld [vmem:[%s3390_s17 + $0x8] sm:$0xff]  ;;  %v2099_v61 = vld [vmem:[%s3390_s17 + $0x20] sm:$0xff]  ;;  %v2101_v1 = vld [vmem:[%s3390_s17 + $0x30] sm:$0xff] }
 0x1d0   : > { %2255 = vmatpush3.msra.mxu1 %v2115_v25  ;;  %v2100_v62 = vld [vmem:[%s3390_s17 + $0x28] sm:$0xff]  ;;  %v2102_v6 = vld [vmem:[%s3390_s17 + $0x38] sm:$0xff]  ;;  %v2103_v7 = vld [vmem:[%s3390_s17 + $0x40] sm:$0xff] }
 0x1d1   : > { %2285 = vmatpush3.msra.mxu0 %v1156_v29  ;;  %2257 = vmatmul.mubr.msk.f32.vlgmr.msra.gmra.mrb[0].mxu1 %vm1180_vm12, %v2098_v36  ;;  %v2104_v10 = vld [vmem:[%s3390_s17 + $0x48] sm:$0xff]  ;;  %v2105_v11 = vld [vmem:[%s3390_s17 + $0x50] sm:$0xff]  ;;  %v2106_v14 = vld [vmem:[%s3390_s17 + $0x58] sm:$0xff] }
 0x1d2   : > { %2352 = vmatprep.subr.bf16.mxu1 %v2344_v24  ;;  %2287 = vmatmul.mubr.msk.f32.vlgmr.msra.gmra.mrb[0].mxu0 %vm1180_vm12, %v1139_v37  ;;  %v2107_v15 = vld [vmem:[%s3390_s17 + $0x60] sm:$0xff]  ;;  %v2108_v18 = vld [vmem:[%s3390_s17 + $0x68] sm:$0xff]  ;;  %v2109_v19 = vld [vmem:[%s3390_s17 + $0x70] sm:$0xff] }
 0x1d3   : > { %2349 = vmatprep.subr.bf16.mxu0 %v2348_v58  ;;  %2354 = vmatpush3.bf16.msra.mxu1 %v2344_v24  ;;  %v2110_v22 = vld [vmem:[%s3390_s17 + $0x78] sm:$0xff]  ;;  %v2111_v23 = vld [vmem:[%s3390_s17 + $0x80] sm:$0xff]  ;;  %v2112_v26 = vld [vmem:[%s3390_s17 + $0x88] sm:$0xff] }
 0x1d4   : > { %2351 = vmatpush3.bf16.msra.mxu0 %v2348_v58  ;;  %2259 = vmatprep.mubr.msk.f32.mxu1 %vm1180_vm12, %v2099_v61  ;;  %v2164_v27 = vld [vmem:[%s3390_s17 + $0x90] sm:$0xff]  ;;  %v2165_v30 = vld [vmem:[%s3390_s17 + $0x98] sm:$0xff] }
 0x1d5   : > { %2289 = vmatprep.mubr.msk.f32.mxu0 %vm1180_vm12, %v2097_v28  ;;  %2260 = vmatmul.mubr.msk.f32.gmra.mrb[2].mxu1 %vm1180_vm12, %v2100_v62 }
 0x1d6   : > { %2290 = vmatmul.mubr.msk.f32.gmra.mrb[2].mxu0 %vm1180_vm12, %v2098_v36  ;;  %2262 = vmatprep.mubr.msk.f32.mxu1 %vm1180_vm12, %v2101_v1 }
 0x1d7   : > { %2292 = vmatprep.mubr.msk.f32.mxu0 %vm1180_vm12, %v2099_v61  ;;  %2314 = vmatprep.subr.mxu0 %v2168_v3 }
 0x1d8   : > { %2315 = vmatpush3.msra.mxu0 %v2168_v3  ;;  %2353 = vmatprep.subr.mxu1 %v1156_v29 }
 0x1d9   : > { %2263 = vmatmul.mubr.msk.f32.gmra.mrb[4].mxu1 %vm1180_vm12, %v2102_v6 }
 0x1da   : > { %2293 = vmatmul.mubr.msk.f32.gmra.mrb[4].mxu0 %vm1180_vm12, %v2100_v62  ;;  %2265 = vmatprep.mubr.msk.f32.mxu1 %vm1180_vm12, %v2103_v7 }
 0x1db   : > { %2295 = vmatprep.mubr.msk.f32.mxu0 %vm1180_vm12, %v2101_v1  ;;  %2355 = vmatpush3.msra.mxu1 %v1156_v29 }
 0x1dd   : > { %2266 = vmatmul.mubr.msk.f32.gmra.mrb[6].mxu1 %vm1180_vm12, %v2104_v10 }
 0x1de   : > { %2296 = vmatmul.mubr.msk.f32.gmra.mrb[6].mxu0 %vm1180_vm12, %v2102_v6  ;;  %2268 = vmatprep.mubr.msk.f32.mxu1 %vm1180_vm12, %v2105_v11 }
 0x1df   : > { %2316 = vmatprep.mubr.msk.f32.mxu0 %vm1180_vm12, %v2099_v61 }
 0x1e1   : > { %2269 = vmatmul.mubr.msk.f32.gmra.mrb[8].mxu1 %vm1180_vm12, %v2106_v14 }
 0x1e2   : > { %2317 = vmatmul.mubr.msk.f32.vlgmr.msra.gmra.mrb[0].mxu0 %vm1180_vm12, %v2100_v62  ;;  %2271 = vmatprep.mubr.msk.f32.mxu1 %vm1180_vm12, %v2107_v15 }
 0x1e3   : > { %2319 = vmatprep.mubr.msk.f32.mxu0 %vm1180_vm12, %v2101_v1 }
 0x1e5   : > { %2272 = vmatmul.mubr.msk.f32.gmra.mrb[10].mxu1 %vm1180_vm12, %v2108_v18 }
 0x1e6   : > { %2320 = vmatmul.mubr.msk.f32.gmra.mrb[2].mxu0 %vm1180_vm12, %v2102_v6  ;;  %2274 = vmatprep.mubr.msk.f32.mxu1 %vm1180_vm12, %v2109_v19 }
 0x1e7   : > { %2322 = vmatprep.mubr.msk.f32.mxu0 %vm1180_vm12, %v2103_v7 }
 0x1e9   : > { %2275 = vmatmul.mubr.msk.f32.gmra.mrb[12].mxu1 %vm1180_vm12, %v2110_v22 }
 0x1ea   : > { %2323 = vmatmul.mubr.msk.f32.gmra.mrb[4].mxu0 %vm1180_vm12, %v2104_v10  ;;  %2277 = vmatprep.mubr.msk.f32.mxu1 %vm1180_vm12, %v2111_v23 }
 0x1eb   : > { %2325 = vmatprep.mubr.msk.f32.mxu0 %vm1180_vm12, %v2105_v11 }
 0x1ed   : > { %2278 = vmatmul.mubr.msk.f32.gmra.mrb[14].mxu1 %vm1180_vm12, %v2112_v26 }
 0x1ee   : > { %2326 = vmatmul.mubr.msk.f32.gmra.mrb[6].mxu0 %vm1180_vm12, %v2106_v14  ;;  %2298 = vmatprep.mubr.msk.f32.mxu1 %vm1180_vm12, %v2103_v7 }
 0x1ef   : > { %2328 = vmatprep.mubr.msk.f32.mxu0 %vm1180_vm12, %v2107_v15 }
 0x1f1   : > { %2299 = vmatmul.mubr.msk.f32.vlgmr.msra.gmra.mrb[8].mxu1 %vm1180_vm12, %v2104_v10 }
 0x1f2   : > { %2329 = vmatmul.mubr.msk.f32.gmra.mrb[8].mxu0 %vm1180_vm12, %v2108_v18  ;;  %2301 = vmatprep.mubr.msk.f32.mxu1 %vm1180_vm12, %v2105_v11 }
 0x1f3   : > { %2331 = vmatprep.mubr.msk.f32.mxu0 %vm1180_vm12, %v2109_v19 }
 0x1f5   : > { %2302 = vmatmul.mubr.msk.f32.gmra.mrb[10].mxu1 %vm1180_vm12, %v2106_v14 }
 0x1f6   : > { %2332 = vmatmul.mubr.msk.f32.gmra.mrb[10].mxu0 %vm1180_vm12, %v2110_v22  ;;  %2304 = vmatprep.mubr.msk.f32.mxu1 %vm1180_vm12, %v2107_v15 }
 0x1f7   : > { %2334 = vmatprep.mubr.msk.f32.mxu0 %vm1180_vm12, %v2111_v23 }
 0x1f9   : > { %2305 = vmatmul.mubr.msk.f32.gmra.mrb[12].mxu1 %vm1180_vm12, %v2108_v18 }
 0x1fa   : > { %2335 = vmatmul.mubr.msk.f32.gmra.mrb[12].mxu0 %vm1180_vm12, %v2112_v26  ;;  %2307 = vmatprep.mubr.msk.f32.mxu1 %vm1180_vm12, %v2109_v19 }
 0x1fb   : > { %2337 = vmatprep.mubr.msk.f32.mxu0 %vm1180_vm12, %v2164_v27 }
 0x1fd   : > { %2308 = vmatmul.mubr.msk.f32.gmra.mrb[14].mxu1 %vm1180_vm12, %v2110_v22 }
 0x1fe   : > { %2338 = vmatmul.mubr.msk.f32.gmra.mrb[14].mxu0 %vm1180_vm12, %v2165_v30 }
 0x2a4   : > { %v2258_v31 = vpop.f32.mrb[0].mxu1 }
 0x2a5   : > { %v1295_v34 = vpop.f32.mrb[1].mxu1 }
 0x2a8   : > { %v2261_v35 = vpop.f32.mrb[2].mxu1 }
 0x2a9   : > { %v1305_v38 = vpop.f32.mrb[3].mxu1 }
 0x2ac   : > { %v2264_v41 = vpop.f32.mrb[4].mxu1 }
 0x2ad   : > { %v1315_v42 = vpop.f32.mrb[5].mxu1 }
 0x2b0   : > { %v2267_v45 = vpop.f32.mrb[6].mxu1 }
 0x2b1   : > { %v1325_v46 = vpop.f32.mrb[7].mxu1 }
 0x2b5   : > { %v2318_v49 = vpop.f32.mrb[0].mxu0 }
 0x2b6   : > { %v2356_v53 = vadd.f32 %v2318_v49, %v2258_v31  ;;  %v1704_v54 = vpop.f32.mrb[1].mxu0 }
 0x2b7   : > { %v2357_v39 = vadd.f32 %v1704_v54, %v1295_v34 }
 0x2b8   : > { %v1807_v40 = vadd.f32 %v2356_v53, %v3475_v50 }
 0x2b9   : > { %v1806_v43 = vadd.f32 %v2357_v39, %v3475_v50  ;;  %v2321_v44 = vpop.f32.mrb[2].mxu0 }
 0x2ba   : > { %1824 = vst.msk [vmem:[%s2561_s28 + $0x8] sm:$0xff] %vm1822_vm13, %v1807_v40  ;;  %v1840_v47 = vsel %vm1822_vm13, %v1807_v40, 0.0  ;;  %v1877_v48 = vmul.f32 %v1807_v40, %v1807_v40  ;;  %v2358_v51 = vadd.f32 %v2321_v44, %v2261_v35  ;;  %v1714_v52 = vpop.f32.mrb[3].mxu0 }
 0x2bb   : > { %1823 = vst.msk [vmem:[%s2561_s28] sm:$0xff] %vm1822_vm13, %v1806_v43  ;;  %v1839_v55 = vsel %vm1822_vm13, %v1806_v43, 0.0  ;;  %v1876_v56 = vmul.f32 %v1806_v43, %v1806_v43  ;;  %v2359_v59 = vadd.f32 %v1714_v52, %v1305_v38 }
 0x2bc   : > { %v1893_v60 = vsel %vm1822_vm13, %v1877_v48, 0.0  ;;  %v1841_v63 = vadd.f32 %v1840_v47, %v1839_v55  ;;  %v1809_v0 = vadd.f32 %v2358_v51, %v3475_v50 }
 0x2bd   : > { %v1892_v4 = vsel %vm1822_vm13, %v1876_v56, 0.0  ;;  %v1808_v5 = vadd.f32 %v2359_v59, %v3475_v50  ;;  %v2324_v8 = vpop.f32.mrb[4].mxu0 }
 0x2be   : > { %v1894_v9 = vadd.f32 %v1893_v60, %v1892_v4  ;;  %1826 = vst.msk [vmem:[%s2561_s28 + $0x18] sm:$0xff] %vm1822_vm13, %v1809_v0  ;;  %v1879_v12 = vmul.f32 %v1809_v0, %v1809_v0  ;;  %v2360_v13 = vadd.f32 %v2324_v8, %v2264_v41  ;;  %v1724_v16 = vpop.f32.mrb[5].mxu0  ;;  %v1844_v25 = vsel %vm1822_vm13, %v1809_v0, 0.0 }
 0x2bf   : > { %1825 = vst.msk [vmem:[%s2561_s28 + $0x10] sm:$0xff] %vm1822_vm13, %v1808_v5  ;;  %v1842_v17 = vsel %vm1822_vm13, %v1808_v5, 0.0  ;;  %v1878_v2 = vmul.f32 %v1808_v5, %v1808_v5  ;;  %v2361_v20 = vadd.f32 %v1724_v16, %v1315_v42 }
 0x2c0   : > { %v1843_v21 = vadd.f32 %v1842_v17, %v1841_v63  ;;  %v1811_v24 = vadd.f32 %v2360_v13, %v3475_v50  ;;  %v1897_v33 = vsel %vm1822_vm13, %v1879_v12, 0.0 }
 0x2c1   : > { %v1895_v28 = vsel %vm1822_vm13, %v1878_v2, 0.0  ;;  %v1810_v29 = vadd.f32 %v2361_v20, %v3475_v50  ;;  %v2327_v32 = vpop.f32.mrb[6].mxu0 }
 0x2c2   : > { %v1896_v57 = vadd.f32 %v1895_v28, %v1894_v9  ;;  %1828 = vst.msk [vmem:[%s2561_s28 + $0x28] sm:$0xff] %vm1822_vm13, %v1811_v24  ;;  %v1881_v36 = vmul.f32 %v1811_v24, %v1811_v24  ;;  %v1845_v37 = vadd.f32 %v1844_v25, %v1843_v21  ;;  %v1734_v58 = vpop.f32.mrb[7].mxu0  ;;  %v2362_v1 = vadd.f32 %v2327_v32, %v2267_v45 }
 0x2c3   : > { %1827 = vst.msk [vmem:[%s2561_s28 + $0x20] sm:$0xff] %vm1822_vm13, %v1810_v29  ;;  %v1846_v61 = vsel %vm1822_vm13, %v1810_v29, 0.0  ;;  %v1880_v62 = vmul.f32 %v1810_v29, %v1810_v29  ;;  %v2363_v3 = vadd.f32 %v1734_v58, %v1325_v46  ;;  %v1848_v11 = vsel %vm1822_vm13, %v1811_v24, 0.0 }
 0x2c4   : > { %v1847_v6 = vadd.f32 %v1846_v61, %v1845_v37  ;;  %v1898_v7 = vadd.f32 %v1897_v33, %v1896_v57  ;;  %v2300_v10 = vpop.f32.mrb[8].mxu1  ;;  %v1813_v15 = vadd.f32 %v2362_v1, %v3475_v50  ;;  %v1901_v31 = vsel %vm1822_vm13, %v1881_v36, 0.0 }
 0x2c5   : > { %v1899_v14 = vsel %vm1822_vm13, %v1880_v62, 0.0  ;;  %v1812_v18 = vadd.f32 %v2363_v3, %v3475_v50  ;;  %v2330_v19 = vpop.f32.mrb[8].mxu0  ;;  %v1528_v22 = vpop.f32.mrb[9].mxu1 }
 0x2c6   : > { %v1900_v23 = vadd.f32 %v1899_v14, %v1898_v7  ;;  %v1849_v26 = vadd.f32 %v1848_v11, %v1847_v6  ;;  %v2364_v27 = vadd.f32 %v2330_v19, %v2300_v10  ;;  %v1744_v30 = vpop.f32.mrb[9].mxu0  ;;  %1830 = vst.msk [vmem:[%s2561_s28 + $0x38] sm:$0xff] %vm1822_vm13, %v1813_v15  ;;  %v1883_v34 = vmul.f32 %v1813_v15, %v1813_v15 }
 0x2c7   : > { %1829 = vst.msk [vmem:[%s2561_s28 + $0x30] sm:$0xff] %vm1822_vm13, %v1812_v18  ;;  %v1850_v35 = vsel %vm1822_vm13, %v1812_v18, 0.0  ;;  %v1882_v38 = vmul.f32 %v1812_v18, %v1812_v18  ;;  %v2365_v46 = vadd.f32 %v1744_v30, %v1528_v22  ;;  %v1852_v40 = vsel %vm1822_vm13, %v1813_v15, 0.0 }
 0x2c8   : > { %v1851_v41 = vadd.f32 %v1850_v35, %v1849_v26  ;;  %v1902_v42 = vadd.f32 %v1901_v31, %v1900_v23  ;;  %v1815_v45 = vadd.f32 %v2364_v27, %v3475_v50  ;;  %v2303_v49 = vpop.f32.mrb[10].mxu1  ;;  %v1905_v43 = vsel %vm1822_vm13, %v1883_v34, 0.0 }
 0x2c9   : > { %v1903_v53 = vsel %vm1822_vm13, %v1882_v38, 0.0  ;;  %v2333_v54 = vpop.f32.mrb[10].mxu0  ;;  %v1538_v39 = vpop.f32.mrb[11].mxu1  ;;  %v1814_v47 = vadd.f32 %v2365_v46, %v3475_v50 }
 0x2ca   : > { %v1904_v44 = vadd.f32 %v1903_v53, %v1902_v42  ;;  %1832 = vst.msk [vmem:[%s2561_s28 + $0x48] sm:$0xff] %vm1822_vm13, %v1815_v45  ;;  %v1754_v48 = vpop.f32.mrb[11].mxu0  ;;  %v1885_v51 = vmul.f32 %v1815_v45, %v1815_v45  ;;  %v1853_v52 = vadd.f32 %v1852_v40, %v1851_v41  ;;  %v2366_v55 = vadd.f32 %v2333_v54, %v2303_v49 }
 0x2cb   : > { %v2367_v56 = vadd.f32 %v1754_v48, %v1538_v39  ;;  %1831 = vst.msk [vmem:[%s2561_s28 + $0x40] sm:$0xff] %vm1822_vm13, %v1814_v47  ;;  %v1854_v59 = vsel %vm1822_vm13, %v1814_v47, 0.0  ;;  %v1884_v60 = vmul.f32 %v1814_v47, %v1814_v47  ;;  %v1856_v13 = vsel %vm1822_vm13, %v1815_v45, 0.0 }
 0x2cc   : > { %v1906_v63 = vadd.f32 %v1905_v43, %v1904_v44  ;;  %v2306_v0 = vpop.f32.mrb[12].mxu1  ;;  %v1855_v4 = vadd.f32 %v1854_v59, %v1853_v52  ;;  %v1817_v5 = vadd.f32 %v2366_v55, %v3475_v50  ;;  %v1909_v20 = vsel %vm1822_vm13, %v1885_v51, 0.0 }
 0x2cd   : > { %v1816_v8 = vadd.f32 %v2367_v56, %v3475_v50  ;;  %v2336_v9 = vpop.f32.mrb[12].mxu0  ;;  %v1548_v12 = vpop.f32.mrb[13].mxu1  ;;  %v1907_v16 = vsel %vm1822_vm13, %v1884_v60, 0.0 }
 0x2ce   : > { %v2368_v17 = vadd.f32 %v2336_v9, %v2306_v0  ;;  %v1764_v2 = vpop.f32.mrb[13].mxu0  ;;  %v1908_v21 = vadd.f32 %v1907_v16, %v1906_v63  ;;  %1834 = vst.msk [vmem:[%s2561_s28 + $0x58] sm:$0xff] %vm1822_vm13, %v1817_v5  ;;  %v1887_v24 = vmul.f32 %v1817_v5, %v1817_v5  ;;  %v1857_v25 = vadd.f32 %v1856_v13, %v1855_v4 }
 0x2cf   : > { %1833 = vst.msk [vmem:[%s2561_s28 + $0x50] sm:$0xff] %vm1822_vm13, %v1816_v8  ;;  %v1858_v28 = vsel %vm1822_vm13, %v1816_v8, 0.0  ;;  %v1886_v29 = vmul.f32 %v1816_v8, %v1816_v8  ;;  %v2369_v33 = vadd.f32 %v1764_v2, %v1548_v12  ;;  %v1860_v62 = vsel %vm1822_vm13, %v1817_v5, 0.0  ;;  %v1929_v8 = vld [vmem:[%s2556_s14] sm:$0x3] }
 0x2d0   : > { %v1819_v32 = vadd.f32 %v2368_v17, %v3475_v50  ;;  %v2309_v57 = vpop.f32.mrb[14].mxu1  ;;  %v1859_v36 = vadd.f32 %v1858_v28, %v1857_v25  ;;  %v1910_v37 = vadd.f32 %v1909_v20, %v1908_v21  ;;  %v1913_v15 = vsel %vm1822_vm13, %v1887_v24, 0.0 }
 0x2d1   : > { %v2339_v58 = vpop.f32.mrb[14].mxu0  ;;  %v1558_v61 = vpop.f32.mrb[15].mxu1  ;;  %v1911_v1 = vsel %vm1822_vm13, %v1886_v29, 0.0  ;;  %v1818_v3 = vadd.f32 %v2369_v33, %v3475_v50 }
 0x2d2   : > { %1836 = vst.msk [vmem:[%s2561_s28 + $0x68] sm:$0xff] %vm1822_vm13, %v1819_v32  ;;  %v1774_v6 = vpop.f32.mrb[15].mxu0  ;;  %v1912_v7 = vadd.f32 %v1911_v1, %v1910_v37  ;;  %v1861_v10 = vadd.f32 %v1860_v62, %v1859_v36  ;;  %v2370_v11 = vadd.f32 %v2339_v58, %v2309_v57  ;;  %v1889_v18 = vmul.f32 %v1819_v32, %v1819_v32 }
 0x2d3   : > { %v2371_v14 = vadd.f32 %v1774_v6, %v1558_v61  ;;  %1835 = vst.msk [vmem:[%s2561_s28 + $0x60] sm:$0xff] %vm1822_vm13, %v1818_v3  ;;  %v1862_v19 = vsel %vm1822_vm13, %v1818_v3, 0.0  ;;  %v1888_v22 = vmul.f32 %v1818_v3, %v1818_v3  ;;  %v1864_v31 = vsel %vm1822_vm13, %v1819_v32, 0.0 }
 0x2d4   : > { %v1863_v23 = vadd.f32 %v1862_v19, %v1861_v10  ;;  %v1914_v26 = vadd.f32 %v1913_v15, %v1912_v7  ;;  %v1821_v27 = vadd.f32 %v2370_v11, %v3475_v50  ;;  %v1917_v41 = vsel %vm1822_vm13, %v1889_v18, 0.0 }
 0x2d5   : > { %v1820_v30 = vadd.f32 %v2371_v14, %v3475_v50  ;;  %v1915_v34 = vsel %vm1822_vm13, %v1888_v22, 0.0 }
 0x2d6   : > { %v1916_v35 = vadd.f32 %v1915_v34, %v1914_v26  ;;  %1838 = vst.msk [vmem:[%s2561_s28 + $0x78] sm:$0xff] %vm1822_vm13, %v1821_v27  ;;  %v1865_v38 = vadd.f32 %v1864_v31, %v1863_v23  ;;  %v1891_v42 = vmul.f32 %v1821_v27, %v1821_v27  ;;  %v1868_v50 = vsel %vm1822_vm13, %v1821_v27, 0.0 }
 0x2d7   : > { %1837 = vst.msk [vmem:[%s2561_s28 + $0x70] sm:$0xff] %vm1822_vm13, %v1820_v30  ;;  %v1866_v45 = vsel %vm1822_vm13, %v1820_v30, 0.0  ;;  %v1890_v46 = vmul.f32 %v1820_v30, %v1820_v30 }
 0x2d8   : > { %v1867_v49 = vadd.f32 %v1866_v45, %v1865_v38  ;;  %v1918_v53 = vadd.f32 %v1917_v41, %v1916_v35  ;;  %v1921_v43 = vsel %vm1822_vm13, %v1891_v42, 0.0 }
 0x2d9   : > { %v1919_v54 = vsel %vm1822_vm13, %v1890_v46, 0.0 }
 0x2da   : > { %v1869_v39 = vadd.f32 %v1868_v50, %v1867_v49  ;;  %v1920_v40 = vadd.f32 %v1919_v54, %v1918_v53 }
 0x2dc   : > { %v1870_v44 = vrot.slane %v1869_v39, 4  ;;  %v1922_v47 = vadd.f32 %v1921_v43, %v1920_v40 }
 0x2de   : > { %v1871_v48 = vadd.f32 %v1870_v44, %v1869_v39  ;;  %v1923_v51 = vrot.slane %v1922_v47, 4 }
 0x2e0   : > { %v1872_v52 = vrot.slane %v1871_v48, 2  ;;  %v1924_v55 = vadd.f32 %v1923_v51, %v1922_v47 }
 0x2e2   : > { %v1873_v56 = vadd.f32 %v1872_v52, %v1871_v48  ;;  %v1925_v59 = vrot.slane %v1924_v55, 2 }
 0x2e4   : > { %v1874_v60 = vrot.slane %v1873_v56, 1  ;;  %v1926_v63 = vadd.f32 %v1925_v59, %v1924_v55 }
 0x2e6   : > { %v1927_v0 = vrot.slane %v1926_v63, 1  ;;  %v1875_v4 = vadd.f32 %v1874_v60, %v1873_v56 }
 0x2e8   : > { %v1928_v5 = vadd.f32 %v1927_v0, %v1926_v63 }
 0x2ea   : > { %v1931_v9 = vsel %vm1930_vm14, %v1875_v4, %v1928_v5 }
 0x2eb   : > { %v1932_v12 = vadd.f32 %v1931_v9, %v1929_v8 }
 0x2ed   : > { %1934 = vst.msk [vmem:[%s2556_s14] sm:$0x3] %vm1933_vm15, %v1932_v12 }
 0x2ee PF: > { %s16_s22 = sadd.s32 1, %s2472_s22   ;;  %s3580_s18 = smov %s2464_s20 }
 0x2ef   : > { %p13_p8 = scmp.ge.s32.totalorder %s16_s22, 6   ;;  %s3581_s19 = smov %s2468_s21 }
 0x2f0   : > { %s3582_s20 = smov %s3585_s23  ;;  %s3583_s21 = smov %s3589_s24 }
 0x2f1   :  { %15 = sbr.rel (!%p13_p8) target bundleno = 3 (0x3), region = 91 }

// kernel: deconv_forward.7
= control target key start
LH: loop header
LB: loop body
LE: loop exit
PB: predicated region body
PF: predicated region fallthrough
CT: control target
= control target key end

     0   :  { %vm44_vm0 = vcmask 523264   ;;  %s105_s0 = inlined_call_operand.vmem [shape: f32[32,64], index: 0, kind: input, shape index: {}]   ;;  %s106_s1 = inlined_call_operand.vmem [shape: f32[1,64], index: 1, kind: input, shape index: {}]   ;;  %s107_s2 = inlined_call_operand.vmem [shape: f32[1,64], index: 2, kind: input, shape index: {}]   ;;  %s108_s3 = inlined_call_operand.vmem [shape: f32[32,64], index: 3, kind: output, shape index: {}]  }
   0x1   :  { %v14_v0 = vld [vmem:[%s105_s0] sm:$0xff]  ;;  %v15_v4 = vld [vmem:[%s105_s0 + $0x8] sm:$0xff]  ;;  %v16_v5 = vld [vmem:[%s105_s0 + $0x10] sm:$0xff] }
   0x2   :  { %v53_v1 = vld [vmem:[%s106_s1] ss:$0 sm:$0xff]  ;;  %v17_v6 = vld [vmem:[%s105_s0 + $0x18] sm:$0xff] }
   0x3   :  { %v54_v2 = vld [vmem:[%s107_s2] ss:$0 sm:$0xff]  ;;  %v25_v3 = vmul.f32 %v53_v1, %v14_v0  ;;  %v26_v7 = vmul.f32 %v53_v1, %v15_v4  ;;  %v27_v8 = vmul.f32 %v53_v1, %v16_v5  ;;  %v28_v9 = vmul.f32 %v53_v1, %v17_v6 }
   0x5   :  { %v36_v10 = vadd.f32 %v54_v2, %v25_v3  ;;  %v37_v11 = vadd.f32 %v54_v2, %v26_v7  ;;  %v38_v12 = vadd.f32 %v54_v2, %v27_v8  ;;  %v39_v13 = vadd.f32 %v54_v2, %v28_v9 }
   0x7   :  { %v40_v14 = vmax.f32 %v36_v10, 0.0  ;;  %v41_v15 = vmax.f32 %v37_v11, 0.0  ;;  %v42_v16 = vmax.f32 %v38_v12, 0.0  ;;  %v43_v17 = vmax.f32 %v39_v13, 0.0 }
   0x9   :  { %45 = vst.msk [vmem:[%s108_s3] sm:$0xff] %vm44_vm0, %v40_v14  ;;  %46 = vst.msk [vmem:[%s108_s3 + $0x8] sm:$0xff] %vm44_vm0, %v41_v15 }
   0xa   :  { %47 = vst.msk [vmem:[%s108_s3 + $0x10] sm:$0xff] %vm44_vm0, %v42_v16  ;;  %48 = vst.msk [vmem:[%s108_s3 + $0x18] sm:$0xff] %vm44_vm0, %v43_v17 }

// kernel: deconv_forward.6
= control target key start
LH: loop header
LB: loop body
LE: loop exit
PB: predicated region body
PF: predicated region fallthrough
CT: control target
= control target key end

     0   :  { %s2165_s21 = smov 0   ;;  %s2167_s22 = smov 0   ;;  %s2925_s0 = inlined_call_operand.vmem [shape: f32[2,16,16,4], index: 0, kind: input, shape index: {}]   ;;  %s2926_s1 = inlined_call_operand.vmem [shape: f32[1,4], index: 1, kind: input, shape index: {}]   ;;  %s2927_s2 = inlined_call_operand.vmem [shape: f32[1,4], index: 2, kind: input, shape index: {}]   ;;  %s2928_s3 = inlined_call_operand.vmem [shape: f32[3,12,4], index: 3, kind: input, shape index: {}]   ;;  %s2929_s4 = inlined_call_operand.vmem [shape: f32[1,4], index: 4, kind: input, shape index: {}]   ;;  %s2930_s5 = inlined_call_operand.vmem [shape: f32[2,16,16,4], index: 5, kind: output, shape index: {0}]   ;;  %s2931_s6 = inlined_call_operand.vmem [shape: f32[2,2,4], index: 6, kind: output, shape index: {1}]  }
   0x1   :  { %s2169_s23 = smov 0   ;;  %s2171_s24 = smov 0  }
   0x2   :  { %s2173_s25 = smov 0  }
   0x3 LB: > { %s26_s26 = sadd.s32 1, %s2116_s23  ;;  %s29_s27 = sadd.s32 1, %s2120_s24  ;;  %s2124_s25 = sphi %s2173_s25, %s17_s25   ;;  %s2120_s24 = sphi %s2171_s24, %s2937_s24   ;;  %s2116_s23 = sphi %s2169_s23, %s2936_s23   ;;  %s2112_s22 = sphi %s2167_s22, %s2935_s22   ;;  %s2108_s21 = sphi %s2165_s21, %s2934_s21  }
   0x4   : > { %p27_p0 = scmp.ge.s32.totalorder %s26_s26, 2  ;;  %p1741_p1 = scmp.ge.s32.totalorder %s2124_s25, 1 }
   0x5   : > { %p229_p2 = scmp.lt.s32.totalorder %s2124_s25, 5 }
   0x6   : > { %s2939_s26 = smov (%p27_p0, %s26_s26), 0  ;;  %s2941_s27 = smov (!%p27_p0, %s29_s27), %s2120_s24 }
   0x7   : > { %p230_p3 = pnand %p1741_p1, %p229_p2  ;;  %p31_p4 = scmp.ge.s32.totalorder %s2941_s27, 2 }
   0x8   : > { %p268_p5 = scmp.lt.s32.totalorder (!%p230_p3), %s2112_s22, 1  ;;  %s1744_s28 = sshll.u32 (!%p230_p3), %s2108_s21, 3 }
   0x9   : > { %s2943_s27 = smov (%p31_p4, %s2941_s27), 0  ;;  %233 = sbr.rel (%p230_p3) target bundleno = 559 (0x22f), region = 40 }
   0xa   : > { %p276_p6 = scmp.lt.s32.totalorder (!%p230_p3), %s1744_s28, 15  ;;  %p1749_p7 = scmp.ne.s32.totalorder (!%p230_p3), %s2108_s21, 0 }
  0x10   : > { %s2945_s22 = smov (!%p268_p5, %s2112_s22), 1  ;;  %s2947_s28 = smov (!%p276_p6, %s1744_s28), 15 }
  0x11   : > { %s1848_s29 = sshll.u32 %s2945_s22, 8  ;;  %s1746_s30 = sshll.u32 %s2945_s22, 5  ;;  %v2218_v1 = vld [vmem:[%s2926_s1] ss:$0 sm:$0xff] (!%p1749_p7)  ;;  %vm292_vm0 = vcmask (!%p1749_p7), 97280   ;;  %vm474_vm1 = vcmask (!%p1749_p7), 31744  }
  0x12   : > { %s2201_s9 = scalar_lea.vmem %s2925_s0, %s1848_s29  ;;  %s1745_s10 = sshll.u32 %s2947_s28, 1  ;;  %v2223_v2 = vld [vmem:[%s2927_s2] ss:$0 sm:$0xff] (!%p1749_p7)  ;;  %vm476_vm2 = vcmask (!%p1749_p7), 30720   ;;  %vm329_vm3 = vcmask (!%p1749_p7), 25600   ;;  %vm636_vm4 = vcmask (!%p1749_p7), 64544  }
  0x13   : > { %s280_s11 = sadd.s32 %s1746_s30, %s1745_s10  ;;  %s1748_s12 = sshll.u32 %s2945_s22, 1  ;;  %v333_v0 = vld [vmem:[%s2201_s9 + $0x10] sm:$0xff] (!%p1749_p7)  ;;  %v331_v4 = vld [vmem:[%s2201_s9] sm:$0xff] (!%p1749_p7)  ;;  %v334_v5 = vld [vmem:[%s2201_s9 + $0x18] sm:$0xff] (!%p1749_p7)  ;;  %vm767_vm5 = vcmask (!%p1749_p7), 97344   ;;  %vm765_vm6 = vcmask (!%p1749_p7), 97345  }
  0x14   : > { %s1747_s13 = sshll.u32 %s280_s11, 3  ;;  %s2206_s16 = scalar_lea.vmem %s2931_s6, %s1748_s12  ;;  %v373_v3 = vmul.f32 (!%p1749_p7), %v2218_v1, %v333_v0  ;;  %v332_v6 = vld [vmem:[%s2201_s9 + $0x8] sm:$0xff] (!%p1749_p7)  ;;  %v371_v7 = vmul.f32 (!%p1749_p7), %v2218_v1, %v331_v4  ;;  %v374_v8 = vmul.f32 (!%p1749_p7), %v2218_v1, %v334_v5  ;;  %v335_v11 = vld [vmem:[%s2201_s9 + $0x20] sm:$0xff] (!%p1749_p7)  ;;  %v338_v12 = vld [vmem:[%s2201_s9 + $0x38] sm:$0xff] (!%p1749_p7) }
  0x15   : > { %s2211_s19 = scalar_lea.vmem %s2930_s5, %s1747_s13  ;;  %291 = sbr.rel (%p1749_p7) target bundleno = 267 (0x10b), region = 44  ;;  %v372_v9 = vmul.f32 (!%p1749_p7), %v2218_v1, %v332_v6  ;;  %v336_v10 = vld [vmem:[%s2201_s9 + $0x28] sm:$0xff] (!%p1749_p7)  ;;  %v375_v15 = vmul.f32 (!%p1749_p7), %v2218_v1, %v335_v11  ;;  %v378_v16 = vmul.f32 (!%p1749_p7), %v2218_v1, %v338_v12  ;;  %v337_v17 = vld [vmem:[%s2201_s9 + $0x30] sm:$0xff] (!%p1749_p7)  ;;  %v339_v27 = vld [vmem:[%s2201_s9 + $0x40] sm:$0xff] (!%p1749_p7) }
  0x16   : > { %v411_v13 = vadd.f32 (!%p1749_p7), %v2223_v2, %v373_v3  ;;  %v376_v14 = vmul.f32 (!%p1749_p7), %v2218_v1, %v336_v10  ;;  %v409_v18 = vadd.f32 (!%p1749_p7), %v2223_v2, %v371_v7  ;;  %v412_v19 = vadd.f32 (!%p1749_p7), %v2223_v2, %v374_v8  ;;  %v340_v22 = vld [vmem:[%s2201_s9 + $0x48] sm:$0xff] (!%p1749_p7)  ;;  %v342_v28 = vld [vmem:[%s2201_s9 + $0x58] sm:$0xff] (!%p1749_p7)  ;;  %v341_v29 = vld [vmem:[%s2201_s9 + $0x50] sm:$0xff] (!%p1749_p7)  ;;  %s2126_s30 = smov (!%p1749_p7), 4   ;;  %s2128_s7 = smov (!%p1749_p7), 8  }
  0x17   : > { %v410_v20 = vadd.f32 (!%p1749_p7), %v2223_v2, %v372_v9  ;;  %v377_v21 = vmul.f32 (!%p1749_p7), %v2218_v1, %v337_v17  ;;  %v413_v25 = vadd.f32 (!%p1749_p7), %v2223_v2, %v375_v15  ;;  %v416_v26 = vadd.f32 (!%p1749_p7), %v2223_v2, %v378_v16  ;;  %v344_v34 = vld [vmem:[%s2201_s9 + $0x68] sm:$0xff] (!%p1749_p7)  ;;  %v343_v35 = vld [vmem:[%s2201_s9 + $0x60] sm:$0xff] (!%p1749_p7)  ;;  %v346_v36 = vld [vmem:[%s2201_s9 + $0x78] sm:$0xff] (!%p1749_p7) }
  0x18   : > { %v2245_v23 = vmax.f32 (!%p1749_p7), %v411_v13, 0.0  ;;  %v414_v24 = vadd.f32 (!%p1749_p7), %v2223_v2, %v376_v14  ;;  %v2253_v30 = vmax.f32 (!%p1749_p7), %v409_v18, 0.0  ;;  %v2255_v31 = vmax.f32 (!%p1749_p7), %v412_v19, 0.0  ;;  %v345_v41 = vld [vmem:[%s2201_s9 + $0x70] sm:$0xff] (!%p1749_p7)  ;;  %v348_v54 = vld [vmem:[%s2201_s9 + $0x88] sm:$0xff] (!%p1749_p7)  ;;  %v347_v59 = vld [vmem:[%s2201_s9 + $0x80] sm:$0xff] (!%p1749_p7) }
  0x19   : > { %v2257_v32 = vmax.f32 (!%p1749_p7), %v410_v20, 0.0  ;;  %v415_v33 = vadd.f32 (!%p1749_p7), %v2223_v2, %v377_v21  ;;  %v2267_v38 = vmax.f32 (!%p1749_p7), %v413_v25, 0.0  ;;  %v2269_v39 = vmax.f32 (!%p1749_p7), %v416_v26, 0.0  ;;  %v350_v60 = vld [vmem:[%s2201_s9 + $0x98] sm:$0xff] (!%p1749_p7)  ;;  %v349_v61 = vld [vmem:[%s2201_s9 + $0x90] sm:$0xff] (!%p1749_p7)  ;;  %v352_v4 = vld [vmem:[%s2201_s9 + $0xa8] sm:$0xff] (!%p1749_p7) }
  0x1a   : > { %544 = vrot.lane.b32.xlu1 (!%p1749_p7), %v2245_v23, %s2126_s30  ;;  %v2265_v37 = vmax.f32 (!%p1749_p7), %v414_v24, 0.0  ;;  %v380_v40 = vmul.f32 (!%p1749_p7), %v2218_v1, %v340_v22  ;;  %540 = vrot.lane.b32.xlu0 (!%p1749_p7), %v2253_v30, %s2126_s30  ;;  %v379_v43 = vmul.f32 (!%p1749_p7), %v2218_v1, %v339_v27  ;;  %v382_v44 = vmul.f32 (!%p1749_p7), %v2218_v1, %v342_v28  ;;  %v351_v5 = vld [vmem:[%s2201_s9 + $0xa0] sm:$0xff] (!%p1749_p7)  ;;  %v354_v6 = vld [vmem:[%s2201_s9 + $0xb8] sm:$0xff] (!%p1749_p7) }
  0x1b   : > { %v2275_v42 = vmax.f32 (!%p1749_p7), %v415_v33, 0.0  ;;  %v381_v45 = vmul.f32 (!%p1749_p7), %v2218_v1, %v341_v29  ;;  %v384_v47 = vmul.f32 (!%p1749_p7), %v2218_v1, %v344_v34  ;;  %v383_v48 = vmul.f32 (!%p1749_p7), %v2218_v1, %v343_v35  ;;  %v353_v11 = vld [vmem:[%s2201_s9 + $0xb0] sm:$0xff] (!%p1749_p7)  ;;  %v356_v25 = vld [vmem:[%s2201_s9 + $0xc8] sm:$0xff] (!%p1749_p7)  ;;  %v355_v33 = vld [vmem:[%s2201_s9 + $0xc0] sm:$0xff] (!%p1749_p7) }
  0x1c   : > { %v418_v46 = vadd.f32 %v2223_v2, %v380_v40  ;;  %v386_v49 = vmul.f32 %v2218_v1, %v346_v36  ;;  %v417_v50 = vadd.f32 %v2223_v2, %v379_v43  ;;  %v420_v51 = vadd.f32 %v2223_v2, %v382_v44  ;;  %v358_v34 = vld [vmem:[%s2201_s9 + $0xd8] sm:$0xff]  ;;  %v357_v35 = vld [vmem:[%s2201_s9 + $0xd0] sm:$0xff]  ;;  %v360_v44 = vld [vmem:[%s2201_s9 + $0xe8] sm:$0xff] }
  0x1d   : > { %v419_v52 = vadd.f32 %v2223_v2, %v381_v45  ;;  %v385_v53 = vmul.f32 %v2218_v1, %v345_v41  ;;  %v422_v56 = vadd.f32 %v2223_v2, %v384_v47  ;;  %v421_v57 = vadd.f32 %v2223_v2, %v383_v48  ;;  %v359_v45 = vld [vmem:[%s2201_s9 + $0xe0] sm:$0xff] }
  0x1e   : > { %546 = vrot.lane.b32.xlu1 %v2255_v31, %s2126_s30  ;;  %v2291_v55 = vmax.f32 %v418_v46, 0.0  ;;  %v424_v58 = vadd.f32 %v2223_v2, %v386_v49  ;;  %542 = vrot.lane.b32.xlu0 %v2257_v32, %s2126_s30  ;;  %v2301_v62 = vmax.f32 %v417_v50, 0.0  ;;  %v2303_v63 = vmax.f32 %v420_v51, 0.0  ;;  %v362_v46 = vld [vmem:[%s2201_s9 + $0xf8] sm:$0xff]  ;;  %v361_v51 = vld [vmem:[%s2201_s9 + $0xf0] sm:$0xff] }
  0x1f   : > { %v2305_v0 = vmax.f32 %v419_v52, 0.0  ;;  %v423_v3 = vadd.f32 %v2223_v2, %v385_v53  ;;  %v2311_v7 = vmax.f32 %v422_v56, 0.0  ;;  %v2313_v8 = vmax.f32 %v421_v57, 0.0 }
  0x20   : > { %v2315_v9 = vmax.f32 %v424_v58, 0.0  ;;  %v388_v10 = vmul.f32 %v2218_v1, %v348_v54  ;;  %v387_v13 = vmul.f32 %v2218_v1, %v347_v59  ;;  %v390_v14 = vmul.f32 %v2218_v1, %v350_v60 }
  0x21   : > { %v2319_v12 = vmax.f32 %v423_v3, 0.0  ;;  %v389_v15 = vmul.f32 %v2218_v1, %v349_v61  ;;  %v392_v17 = vmul.f32 %v2218_v1, %v352_v4  ;;  %v391_v18 = vmul.f32 %v2218_v1, %v351_v5 }
  0x22   : > { %550 = vrot.lane.b32.xlu1 %v2265_v37, %s2126_s30  ;;  %v426_v16 = vadd.f32 %v2223_v2, %v388_v10  ;;  %v394_v19 = vmul.f32 %v2218_v1, %v354_v6  ;;  %548 = vrot.lane.b32.xlu0 %v2267_v38, %s2126_s30  ;;  %v425_v20 = vadd.f32 %v2223_v2, %v387_v13 }
  0x23   : > { %v428_v21 = vadd.f32 %v2223_v2, %v390_v14  ;;  %v427_v22 = vadd.f32 %v2223_v2, %v389_v15  ;;  %v393_v24 = vmul.f32 %v2218_v1, %v353_v11  ;;  %v430_v27 = vadd.f32 %v2223_v2, %v392_v17 }
  0x24   : > { %v2337_v26 = vmax.f32 %v426_v16, 0.0  ;;  %v429_v28 = vadd.f32 %v2223_v2, %v391_v18  ;;  %v432_v29 = vadd.f32 %v2223_v2, %v394_v19  ;;  %v2345_v36 = vmax.f32 %v425_v20, 0.0 }
  0x25   : > { %v2347_v40 = vmax.f32 %v428_v21, 0.0  ;;  %v2349_v41 = vmax.f32 %v427_v22, 0.0  ;;  %v431_v43 = vadd.f32 %v2223_v2, %v393_v24  ;;  %v2357_v47 = vmax.f32 %v430_v27, 0.0 }
  0x26   : > { %554 = vrot.lane.b32.xlu1 %v2269_v39, %s2126_s30  ;;  %v2359_v48 = vmax.f32 %v429_v28, 0.0  ;;  %v2361_v49 = vmax.f32 %v432_v29, 0.0  ;;  %v396_v50 = vmul.f32 %v2218_v1, %v356_v25  ;;  %552 = vrot.lane.b32.xlu0 %v2275_v42, %s2126_s30  ;;  %v395_v53 = vmul.f32 %v2218_v1, %v355_v33 }
  0x27   : > { %v2367_v52 = vmax.f32 %v431_v43, 0.0  ;;  %v398_v54 = vmul.f32 %v2218_v1, %v358_v34  ;;  %v397_v56 = vmul.f32 %v2218_v1, %v357_v35  ;;  %v400_v58 = vmul.f32 %v2218_v1, %v360_v44 }
  0x28   : > { %v434_v57 = vadd.f32 %v2223_v2, %v396_v50  ;;  %v399_v59 = vmul.f32 %v2218_v1, %v359_v45  ;;  %v402_v60 = vmul.f32 %v2218_v1, %v362_v46  ;;  %v433_v61 = vadd.f32 %v2223_v2, %v395_v53 }
  0x29   : > { %v436_v3 = vadd.f32 %v2223_v2, %v398_v54  ;;  %v435_v4 = vadd.f32 %v2223_v2, %v397_v56  ;;  %v401_v5 = vmul.f32 %v2218_v1, %v361_v51  ;;  %v438_v10 = vadd.f32 %v2223_v2, %v400_v58 }
  0x2a   : > { %558 = vrot.lane.b32.xlu1 %v2291_v55, %s2126_s30  ;;  %v2382_v6 = vmax.f32 %v434_v57, 0.0  ;;  %v437_v11 = vadd.f32 %v2223_v2, %v399_v59  ;;  %v440_v13 = vadd.f32 %v2223_v2, %v402_v60  ;;  %556 = vrot.lane.b32.xlu0 %v2301_v62, %s2126_s30  ;;  %v2389_v14 = vmax.f32 %v433_v61, 0.0 }
  0x2b   : > { %v2391_v15 = vmax.f32 %v436_v3, 0.0  ;;  %v2393_v16 = vmax.f32 %v435_v4, 0.0  ;;  %v439_v1 = vadd.f32 %v2223_v2, %v401_v5  ;;  %v2396_v17 = vmax.f32 %v438_v10, 0.0 }
  0x2c   : > { %v2398_v18 = vmax.f32 %v437_v11, 0.0  ;;  %v2400_v19 = vmax.f32 %v440_v13, 0.0  ;;  %v2127_v21 = vmov 0.0  }
  0x2d   : > { %v2402_v20 = vmax.f32 %v439_v1, 0.0  ;;  %297 = vst.msk [vmem:[#allocation2 + $0x20] sm:$0xff] %vm292_vm0, %v2127_v21  ;;  %298 = vst.msk [vmem:[#allocation2 + $0x28] sm:$0xff] %vm292_vm0, %v2127_v21 }
  0x2e   : > { %293 = vst.msk [vmem:[#allocation2] sm:$0xff] %vm292_vm0, %v2127_v21  ;;  %294 = vst.msk [vmem:[#allocation2 + $0x8] sm:$0xff] %vm292_vm0, %v2127_v21  ;;  %562 = vrot.lane.b32.xlu1 %v2303_v63, %s2126_s30  ;;  %560 = vrot.lane.b32.xlu0 %v2305_v0, %s2126_s30 }
  0x2f   : > { %295 = vst.msk [vmem:[#allocation2 + $0x10] sm:$0xff] %vm292_vm0, %v2127_v21  ;;  %296 = vst.msk [vmem:[#allocation2 + $0x18] sm:$0xff] %vm292_vm0, %v2127_v21 }
  0x30   : > { %299 = vst.msk [vmem:[#allocation2 + $0x30] sm:$0xff] %vm292_vm0, %v2127_v21  ;;  %300 = vst.msk [vmem:[#allocation2 + $0x38] sm:$0xff] %vm292_vm0, %v2127_v21 }
  0x31   : > { %301 = vst.msk [vmem:[#allocation2 + $0x40] sm:$0xff] %vm292_vm0, %v2127_v21  ;;  %302 = vst.msk [vmem:[#allocation2 + $0x48] sm:$0xff] %vm292_vm0, %v2127_v21 }
  0x32   : > { %303 = vst.msk [vmem:[#allocation2 + $0x50] sm:$0xff] %vm292_vm0, %v2127_v21  ;;  %304 = vst.msk [vmem:[#allocation2 + $0x58] sm:$0xff] %vm292_vm0, %v2127_v21  ;;  %566 = vrot.lane.b32.xlu1 %v2311_v7, %s2126_s30  ;;  %564 = vrot.lane.b32.xlu0 %v2313_v8, %s2126_s30 }
  0x33   : > { %305 = vst.msk [vmem:[#allocation2 + $0x60] sm:$0xff] %vm292_vm0, %v2127_v21  ;;  %306 = vst.msk [vmem:[#allocation2 + $0x68] sm:$0xff] %vm292_vm0, %v2127_v21 }
  0x34   : > { %307 = vst.msk [vmem:[#allocation2 + $0x70] sm:$0xff] %vm292_vm0, %v2127_v21  ;;  %308 = vst.msk [vmem:[#allocation2 + $0x78] sm:$0xff] %vm292_vm0, %v2127_v21 }
  0x35   : > { %309 = vst.msk [vmem:[#allocation2 + $0x80] sm:$0xff] %vm292_vm0, %v2127_v21  ;;  %310 = vst.msk [vmem:[#allocation2 + $0x88] sm:$0xff] %vm292_vm0, %v2127_v21 }
  0x36   : > { %311 = vst.msk [vmem:[#allocation2 + $0x90] sm:$0xff] %vm292_vm0, %v2127_v21  ;;  %312 = vst.msk [vmem:[#allocation2 + $0x98] sm:$0xff] %vm292_vm0, %v2127_v21  ;;  %570 = vrot.lane.b32.xlu1 %v2315_v9, %s2126_s30  ;;  %568 = vrot.lane.b32.xlu0 %v2319_v12, %s2126_s30 }
  0x37   : > { %313 = vst.msk [vmem:[#allocation2 + $0xa0] sm:$0xff] %vm292_vm0, %v2127_v21  ;;  %314 = vst.msk [vmem:[#allocation2 + $0xa8] sm:$0xff] %vm292_vm0, %v2127_v21 }
  0x38   : > { %315 = vst.msk [vmem:[#allocation2 + $0xb0] sm:$0xff] %vm292_vm0, %v2127_v21  ;;  %316 = vst.msk [vmem:[#allocation2 + $0xb8] sm:$0xff] %vm292_vm0, %v2127_v21 }
  0x39   : > { %317 = vst.msk [vmem:[#allocation2 + $0xc0] sm:$0xff] %vm292_vm0, %v2127_v21  ;;  %318 = vst.msk [vmem:[#allocation2 + $0xc8] sm:$0xff] %vm292_vm0, %v2127_v21 }
  0x3a   : > { %319 = vst.msk [vmem:[#allocation2 + $0xd0] sm:$0xff] %vm292_vm0, %v2127_v21  ;;  %320 = vst.msk [vmem:[#allocation2 + $0xd8] sm:$0xff] %vm292_vm0, %v2127_v21  ;;  %574 = vrot.lane.b32.xlu1 %v2337_v26, %s2126_s30  ;;  %572 = vrot.lane.b32.xlu0 %v2345_v36, %s2126_s30 }
  0x3b   : > { %321 = vst.msk [vmem:[#allocation2 + $0xe0] sm:$0xff] %vm292_vm0, %v2127_v21  ;;  %322 = vst.msk [vmem:[#allocation2 + $0xe8] sm:$0xff] %vm292_vm0, %v2127_v21 }
  0x3c   : > { %323 = vst.msk [vmem:[#allocation2 + $0xf0] sm:$0xff] %vm292_vm0, %v2127_v21  ;;  %324 = vst.msk [vmem:[#allocation2 + $0xf8] sm:$0xff] %vm292_vm0, %v2127_v21 }
  0x3d   : > { %325 = vst.msk [vmem:[#allocation2 + $0x100] sm:$0xff] %vm292_vm0, %v2127_v21  ;;  %326 = vst.msk [vmem:[#allocation2 + $0x108] sm:$0xff] %vm292_vm0, %v2127_v21 }
  0x3e   : > { %327 = vst.msk [vmem:[#allocation2 + $0x110] sm:$0xff] %vm292_vm0, %v2127_v21  ;;  %328 = vst.msk [vmem:[#allocation2 + $0x118] sm:$0xff] %vm292_vm0, %v2127_v21  ;;  %578 = vrot.lane.b32.xlu1 %v2347_v40, %s2126_s30  ;;  %576 = vrot.lane.b32.xlu0 %v2349_v41, %s2126_s30 }
  0x3f   : > { %478 = vst.msk [vmem:[#allocation2 + $0x21] sm:$0xff] %vm474_vm1, %v2245_v23  ;;  %475 = vst.msk [vmem:[#allocation2 + $0x11] sm:$0xff] %vm474_vm1, %v2253_v30 }
  0x40   : > { %480 = vst.msk [vmem:[#allocation2 + $0x31] sm:$0xff] %vm474_vm1, %v2267_v38  ;;  %482 = vst.msk [vmem:[#allocation2 + $0x41] sm:$0xff] %vm474_vm1, %v2275_v42 }
  0x41   : > { %484 = vst.msk [vmem:[#allocation2 + $0x51] sm:$0xff] %vm474_vm1, %v2301_v62  ;;  %486 = vst.msk [vmem:[#allocation2 + $0x61] sm:$0xff] %vm474_vm1, %v2305_v0 }
  0x42   : > { %488 = vst.msk [vmem:[#allocation2 + $0x71] sm:$0xff] %vm474_vm1, %v2313_v8  ;;  %490 = vst.msk [vmem:[#allocation2 + $0x81] sm:$0xff] %vm474_vm1, %v2319_v12  ;;  %582 = vrot.lane.b32.xlu1 %v2357_v47, %s2126_s30  ;;  %580 = vrot.lane.b32.xlu0 %v2359_v48, %s2126_s30 }
  0x43   : > { %492 = vst.msk [vmem:[#allocation2 + $0x91] sm:$0xff] %vm474_vm1, %v2345_v36  ;;  %494 = vst.msk [vmem:[#allocation2 + $0xa1] sm:$0xff] %vm474_vm1, %v2349_v41 }
  0x44   : > { %496 = vst.msk [vmem:[#allocation2 + $0xb1] sm:$0xff] %vm474_vm1, %v2359_v48  ;;  %498 = vst.msk [vmem:[#allocation2 + $0xc1] sm:$0xff] %vm474_vm1, %v2367_v52 }
  0x45   : > { %500 = vst.msk [vmem:[#allocation2 + $0xd1] sm:$0xff] %vm474_vm1, %v2389_v14  ;;  %502 = vst.msk [vmem:[#allocation2 + $0xe1] sm:$0xff] %vm474_vm1, %v2393_v16 }
  0x46   : > { %504 = vst.msk [vmem:[#allocation2 + $0xf1] sm:$0xff] %vm474_vm1, %v2398_v18  ;;  %506 = vst.msk [vmem:[#allocation2 + $0x101] sm:$0xff] %vm474_vm1, %v2402_v20  ;;  %586 = vrot.lane.b32.xlu1 %v2361_v49, %s2126_s30  ;;  %584 = vrot.lane.b32.xlu0 %v2367_v52, %s2126_s30 }
  0x47   : > { %479 = vst.msk [vmem:[#allocation2 + $0x29] sm:$0x7f] %vm476_vm2, %v2255_v31  ;;  %477 = vst.msk [vmem:[#allocation2 + $0x19] sm:$0x7f] %vm476_vm2, %v2257_v32 }
  0x48   : > { %481 = vst.msk [vmem:[#allocation2 + $0x39] sm:$0x7f] %vm476_vm2, %v2265_v37  ;;  %483 = vst.msk [vmem:[#allocation2 + $0x49] sm:$0x7f] %vm476_vm2, %v2269_v39 }
  0x49   : > { %485 = vst.msk [vmem:[#allocation2 + $0x59] sm:$0x7f] %vm476_vm2, %v2291_v55  ;;  %487 = vst.msk [vmem:[#allocation2 + $0x69] sm:$0x7f] %vm476_vm2, %v2303_v63 }
  0x4a   : > { %489 = vst.msk [vmem:[#allocation2 + $0x79] sm:$0x7f] %vm476_vm2, %v2311_v7  ;;  %491 = vst.msk [vmem:[#allocation2 + $0x89] sm:$0x7f] %vm476_vm2, %v2315_v9  ;;  %590 = vrot.lane.b32.xlu1 %v2382_v6, %s2126_s30  ;;  %588 = vrot.lane.b32.xlu0 %v2389_v14, %s2126_s30 }
  0x4b   : > { %493 = vst.msk [vmem:[#allocation2 + $0x99] sm:$0x7f] %vm476_vm2, %v2337_v26  ;;  %495 = vst.msk [vmem:[#allocation2 + $0xa9] sm:$0x7f] %vm476_vm2, %v2347_v40 }
  0x4c   : > { %497 = vst.msk [vmem:[#allocation2 + $0xb9] sm:$0x7f] %vm476_vm2, %v2357_v47  ;;  %499 = vst.msk [vmem:[#allocation2 + $0xc9] sm:$0x7f] %vm476_vm2, %v2361_v49 }
  0x4d   : > { %501 = vst.msk [vmem:[#allocation2 + $0xd9] sm:$0x7f] %vm476_vm2, %v2382_v6  ;;  %503 = vst.msk [vmem:[#allocation2 + $0xe9] sm:$0x7f] %vm476_vm2, %v2391_v15 }
  0x4e   : > { %505 = vst.msk [vmem:[#allocation2 + $0xf9] sm:$0x7f] %vm476_vm2, %v2396_v17  ;;  %507 = vst.msk [vmem:[#allocation2 + $0x109] sm:$0x7f] %vm476_vm2, %v2400_v19  ;;  %594 = vrot.lane.b32.xlu1 %v2391_v15, %s2126_s30  ;;  %592 = vrot.lane.b32.xlu0 %v2393_v16, %s2126_s30 }
  0x4f   : > { %330 = vst.msk [vmem:[%s2206_s16] sm:$0x3] %vm329_vm3, %v2127_v21 }
  0x52   : > { %598 = vrot.lane.b32.xlu1 %v2396_v17, %s2126_s30  ;;  %596 = vrot.lane.b32.xlu0 %v2398_v18, %s2126_s30 }
  0x56   : > { %602 = vrot.lane.b32.xlu1 %v2400_v19, %s2126_s30  ;;  %600 = vrot.lane.b32.xlu0 %v2402_v20, %s2126_s30 }
  0x5a   : > { %671 = vrot.lane.b32.xlu1 %v2257_v32, %s2128_s7  ;;  %669 = vrot.lane.b32.xlu0 %v2253_v30, %s2128_s7 }
  0x5e   : > { %675 = vrot.lane.b32.xlu1 %v2255_v31, %s2128_s7  ;;  %673 = vrot.lane.b32.xlu0 %v2245_v23, %s2128_s7 }
  0x62   : > { %679 = vrot.lane.b32.xlu1 %v2265_v37, %s2128_s7  ;;  %677 = vrot.lane.b32.xlu0 %v2267_v38, %s2128_s7 }
  0x66   : > { %683 = vrot.lane.b32.xlu1 %v2269_v39, %s2128_s7  ;;  %681 = vrot.lane.b32.xlu0 %v2275_v42, %s2128_s7 }
  0x6a   : > { %687 = vrot.lane.b32.xlu1 %v2291_v55, %s2128_s7  ;;  %685 = vrot.lane.b32.xlu0 %v2301_v62, %s2128_s7 }
  0x6e   : > { %691 = vrot.lane.b32.xlu1 %v2303_v63, %s2128_s7  ;;  %689 = vrot.lane.b32.xlu0 %v2305_v0, %s2128_s7 }
  0x72   : > { %695 = vrot.lane.b32.xlu1 %v2311_v7, %s2128_s7  ;;  %693 = vrot.lane.b32.xlu0 %v2313_v8, %s2128_s7 }
  0x76   : > { %699 = vrot.lane.b32.xlu1 %v2315_v9, %s2128_s7  ;;  %697 = vrot.lane.b32.xlu0 %v2319_v12, %s2128_s7 }
  0x7a   : > { %703 = vrot.lane.b32.xlu1 %v2337_v26, %s2128_s7  ;;  %701 = vrot.lane.b32.xlu0 %v2345_v36, %s2128_s7 }
  0x7e   : > { %707 = vrot.lane.b32.xlu1 %v2347_v40, %s2128_s7  ;;  %705 = vrot.lane.b32.xlu0 %v2349_v41, %s2128_s7 }
  0x82   : > { %711 = vrot.lane.b32.xlu1 %v2357_v47, %s2128_s7  ;;  %709 = vrot.lane.b32.xlu0 %v2359_v48, %s2128_s7 }
  0x86   : > { %715 = vrot.lane.b32.xlu1 %v2361_v49, %s2128_s7  ;;  %713 = vrot.lane.b32.xlu0 %v2367_v52, %s2128_s7 }
  0x8a   : > { %719 = vrot.lane.b32.xlu1 %v2382_v6, %s2128_s7  ;;  %717 = vrot.lane.b32.xlu0 %v2389_v14, %s2128_s7 }
  0x8c   : > { %v545_v2 = vpop.permute.xlu1 %544  ;;  %v541_v23 = vpop.permute.xlu0 %540 }
  0x8d   : > { %639 = vst.msk [vmem:[#allocation2 + $0x20] sm:$0xff] %vm636_vm4, %v545_v2  ;;  %637 = vst.msk [vmem:[#allocation2 + $0x10] sm:$0xff] %vm636_vm4, %v541_v23 }
  0x8e   : > { %723 = vrot.lane.b32.xlu1 %v2391_v15, %s2128_s7  ;;  %721 = vrot.lane.b32.xlu0 %v2393_v16, %s2128_s7 }
  0x90   : > { %v547_v30 = vpop.permute.xlu1 %546  ;;  %v543_v31 = vpop.permute.xlu0 %542 }
  0x91   : > { %640 = vst.msk [vmem:[#allocation2 + $0x28] sm:$0xff] %vm636_vm4, %v547_v30  ;;  %638 = vst.msk [vmem:[#allocation2 + $0x18] sm:$0xff] %vm636_vm4, %v543_v31 }
  0x92   : > { %727 = vrot.lane.b32.xlu1 %v2396_v17, %s2128_s7  ;;  %725 = vrot.lane.b32.xlu0 %v2398_v18, %s2128_s7 }
  0x94   : > { %v551_v32 = vpop.permute.xlu1 %550  ;;  %v549_v37 = vpop.permute.xlu0 %548 }
  0x95   : > { %642 = vst.msk [vmem:[#allocation2 + $0x38] sm:$0xff] %vm636_vm4, %v551_v32  ;;  %641 = vst.msk [vmem:[#allocation2 + $0x30] sm:$0xff] %vm636_vm4, %v549_v37 }
  0x96   : > { %731 = vrot.lane.b32.xlu1 %v2400_v19, %s2128_s7  ;;  %729 = vrot.lane.b32.xlu0 %v2402_v20, %s2128_s7 }
  0x98   : > { %v555_v38 = vpop.permute.xlu1 %554  ;;  %v553_v39 = vpop.permute.xlu0 %552 }
  0x99   : > { %644 = vst.msk [vmem:[#allocation2 + $0x48] sm:$0xff] %vm636_vm4, %v555_v38  ;;  %643 = vst.msk [vmem:[#allocation2 + $0x40] sm:$0xff] %vm636_vm4, %v553_v39 }
  0x9c   : > { %v559_v42 = vpop.permute.xlu1 %558  ;;  %v557_v55 = vpop.permute.xlu0 %556 }
  0x9d   : > { %646 = vst.msk [vmem:[#allocation2 + $0x58] sm:$0xff] %vm636_vm4, %v559_v42  ;;  %645 = vst.msk [vmem:[#allocation2 + $0x50] sm:$0xff] %vm636_vm4, %v557_v55 }
  0xa0   : > { %v563_v62 = vpop.permute.xlu1 %562  ;;  %v561_v63 = vpop.permute.xlu0 %560 }
  0xa1   : > { %648 = vst.msk [vmem:[#allocation2 + $0x68] sm:$0xff] %vm636_vm4, %v563_v62  ;;  %647 = vst.msk [vmem:[#allocation2 + $0x60] sm:$0xff] %vm636_vm4, %v561_v63 }
  0xa4   : > { %v567_v0 = vpop.permute.xlu1 %566  ;;  %v565_v7 = vpop.permute.xlu0 %564 }
  0xa5   : > { %650 = vst.msk [vmem:[#allocation2 + $0x78] sm:$0xff] %vm636_vm4, %v567_v0  ;;  %649 = vst.msk [vmem:[#allocation2 + $0x70] sm:$0xff] %vm636_vm4, %v565_v7 }
  0xa8   : > { %v571_v8 = vpop.permute.xlu1 %570  ;;  %v569_v9 = vpop.permute.xlu0 %568 }
  0xa9   : > { %652 = vst.msk [vmem:[#allocation2 + $0x88] sm:$0xff] %vm636_vm4, %v571_v8  ;;  %651 = vst.msk [vmem:[#allocation2 + $0x80] sm:$0xff] %vm636_vm4, %v569_v9 }
  0xac   : > { %v575_v12 = vpop.permute.xlu1 %574  ;;  %v573_v22 = vpop.permute.xlu0 %572 }
  0xad   : > { %654 = vst.msk [vmem:[#allocation2 + $0x98] sm:$0xff] %vm636_vm4, %v575_v12  ;;  %653 = vst.msk [vmem:[#allocation2 + $0x90] sm:$0xff] %vm636_vm4, %v573_v22 }
  0xb0   : > { %v579_v24 = vpop.permute.xlu1 %578  ;;  %v577_v25 = vpop.permute.xlu0 %576 }
  0xb1   : > { %656 = vst.msk [vmem:[#allocation2 + $0xa8] sm:$0xff] %vm636_vm4, %v579_v24  ;;  %655 = vst.msk [vmem:[#allocation2 + $0xa0] sm:$0xff] %vm636_vm4, %v577_v25 }
  0xb4   : > { %v583_v26 = vpop.permute.xlu1 %582  ;;  %v581_v27 = vpop.permute.xlu0 %580 }
  0xb5   : > { %658 = vst.msk [vmem:[#allocation2 + $0xb8] sm:$0xff] %vm636_vm4, %v583_v26  ;;  %657 = vst.msk [vmem:[#allocation2 + $0xb0] sm:$0xff] %vm636_vm4, %v581_v27 }
  0xb8   : > { %v587_v28 = vpop.permute.xlu1 %586  ;;  %v585_v29 = vpop.permute.xlu0 %584 }
  0xb9   : > { %660 = vst.msk [vmem:[#allocation2 + $0xc8] sm:$0xff] %vm636_vm4, %v587_v28  ;;  %659 = vst.msk [vmem:[#allocation2 + $0xc0] sm:$0xff] %vm636_vm4, %v585_v29 }
  0xbc   : > { %v591_v33 = vpop.permute.xlu1 %590  ;;  %v589_v34 = vpop.permute.xlu0 %588 }
  0xbd   : > { %662 = vst.msk [vmem:[#allocation2 + $0xd8] sm:$0xff] %vm636_vm4, %v591_v33  ;;  %661 = vst.msk [vmem:[#allocation2 + $0xd0] sm:$0xff] %vm636_vm4, %v589_v34 }
  0xc0   : > { %v595_v35 = vpop.permute.xlu1 %594  ;;  %v593_v36 = vpop.permute.xlu0 %592 }
  0xc1   : > { %664 = vst.msk [vmem:[#allocation2 + $0xe8] sm:$0xff] %vm636_vm4, %v595_v35  ;;  %663 = vst.msk [vmem:[#allocation2 + $0xe0] sm:$0xff] %vm636_vm4, %v593_v36 }
  0xc4   : > { %v599_v40 = vpop.permute.xlu1 %598  ;;  %v597_v41 = vpop.permute.xlu0 %596 }
  0xc5   : > { %666 = vst.msk [vmem:[#allocation2 + $0xf8] sm:$0xff] %vm636_vm4, %v599_v40  ;;  %665 = vst.msk [vmem:[#allocation2 + $0xf0] sm:$0xff] %vm636_vm4, %v597_v41 }
  0xc8   : > { %v603_v43 = vpop.permute.xlu1 %602  ;;  %v601_v44 = vpop.permute.xlu0 %600 }
  0xc9   : > { %668 = vst.msk [vmem:[#allocation2 + $0x108] sm:$0xff] %vm636_vm4, %v603_v43  ;;  %667 = vst.msk [vmem:[#allocation2 + $0x100] sm:$0xff] %vm636_vm4, %v601_v44 }
  0xcc   : > { %v672_v45 = vpop.permute.xlu1 %671  ;;  %v670_v46 = vpop.permute.xlu0 %669 }
  0xcd   : > { %768 = vst.msk [vmem:[#allocation2 + $0x17] sm:$0xff] %vm767_vm5, %v672_v45 }
  0xce   : > { %766 = vst.msk [vmem:[#allocation2 + $0xf] sm:$0xfe] %vm765_vm6, %v670_v46 }
  0xd0   : > { %v676_v47 = vpop.permute.xlu1 %675  ;;  %v674_v48 = vpop.permute.xlu0 %673 }
  0xd1   : > { %770 = vst.msk [vmem:[#allocation2 + $0x27] sm:$0xff] %vm767_vm5, %v676_v47 }
  0xd2   : > { %769 = vst.msk [vmem:[#allocation2 + $0x1f] sm:$0xfe] %vm765_vm6, %v674_v48 }
  0xd4   : > { %v680_v49 = vpop.permute.xlu1 %679  ;;  %v678_v50 = vpop.permute.xlu0 %677 }
  0xd5   : > { %772 = vst.msk [vmem:[#allocation2 + $0x37] sm:$0xff] %vm767_vm5, %v680_v49 }
  0xd6   : > { %771 = vst.msk [vmem:[#allocation2 + $0x2f] sm:$0xfe] %vm765_vm6, %v678_v50 }
  0xd8   : > { %v684_v51 = vpop.permute.xlu1 %683  ;;  %v682_v52 = vpop.permute.xlu0 %681 }
  0xd9   : > { %774 = vst.msk [vmem:[#allocation2 + $0x47] sm:$0xff] %vm767_vm5, %v684_v51 }
  0xda   : > { %773 = vst.msk [vmem:[#allocation2 + $0x3f] sm:$0xfe] %vm765_vm6, %v682_v52 }
  0xdc   : > { %v688_v53 = vpop.permute.xlu1 %687  ;;  %v686_v54 = vpop.permute.xlu0 %685 }
  0xdd   : > { %776 = vst.msk [vmem:[#allocation2 + $0x57] sm:$0xff] %vm767_vm5, %v688_v53 }
  0xde   : > { %775 = vst.msk [vmem:[#allocation2 + $0x4f] sm:$0xfe] %vm765_vm6, %v686_v54 }
  0xe0   : > { %v692_v56 = vpop.permute.xlu1 %691  ;;  %v690_v57 = vpop.permute.xlu0 %689 }
  0xe1   : > { %778 = vst.msk [vmem:[#allocation2 + $0x67] sm:$0xff] %vm767_vm5, %v692_v56 }
  0xe2   : > { %777 = vst.msk [vmem:[#allocation2 + $0x5f] sm:$0xfe] %vm765_vm6, %v690_v57 }
  0xe4   : > { %v696_v58 = vpop.permute.xlu1 %695  ;;  %v694_v59 = vpop.permute.xlu0 %693 }
  0xe5   : > { %780 = vst.msk [vmem:[#allocation2 + $0x77] sm:$0xff] %vm767_vm5, %v696_v58 }
  0xe6   : > { %779 = vst.msk [vmem:[#allocation2 + $0x6f] sm:$0xfe] %vm765_vm6, %v694_v59 }
  0xe8   : > { %v700_v60 = vpop.permute.xlu1 %699  ;;  %v698_v61 = vpop.permute.xlu0 %697 }
  0xe9   : > { %782 = vst.msk [vmem:[#allocation2 + $0x87] sm:$0xff] %vm767_vm5, %v700_v60 }
  0xea   : > { %781 = vst.msk [vmem:[#allocation2 + $0x7f] sm:$0xfe] %vm765_vm6, %v698_v61 }
  0xec   : > { %v704_v3 = vpop.permute.xlu1 %703  ;;  %v702_v4 = vpop.permute.xlu0 %701 }
  0xed   : > { %784 = vst.msk [vmem:[#allocation2 + $0x97] sm:$0xff] %vm767_vm5, %v704_v3 }
  0xee   : > { %783 = vst.msk [vmem:[#allocation2 + $0x8f] sm:$0xfe] %vm765_vm6, %v702_v4 }
  0xf0   : > { %v708_v5 = vpop.permute.xlu1 %707  ;;  %v706_v6 = vpop.permute.xlu0 %705 }
  0xf1   : > { %786 = vst.msk [vmem:[#allocation2 + $0xa7] sm:$0xff] %vm767_vm5, %v708_v5 }
  0xf2   : > { %785 = vst.msk [vmem:[#allocation2 + $0x9f] sm:$0xfe] %vm765_vm6, %v706_v6 }
  0xf4   : > { %v712_v10 = vpop.permute.xlu1 %711  ;;  %v710_v11 = vpop.permute.xlu0 %709 }
  0xf5   : > { %788 = vst.msk [vmem:[#allocation2 + $0xb7] sm:$0xff] %vm767_vm5, %v712_v10 }
  0xf6   : > { %787 = vst.msk [vmem:[#allocation2 + $0xaf] sm:$0xfe] %vm765_vm6, %v710_v11 }
  0xf8   : > { %v716_v13 = vpop.permute.xlu1 %715  ;;  %v714_v14 = vpop.permute.xlu0 %713 }
  0xf9   : > { %790 = vst.msk [vmem:[#allocation2 + $0xc7] sm:$0xff] %vm767_vm5, %v716_v13 }
  0xfa   : > { %789 = vst.msk [vmem:[#allocation2 + $0xbf] sm:$0xfe] %vm765_vm6, %v714_v14 }
  0xfc   : > { %v720_v15 = vpop.permute.xlu1 %719  ;;  %v718_v16 = vpop.permute.xlu0 %717 }
  0xfd   : > { %792 = vst.msk [vmem:[#allocation2 + $0xd7] sm:$0xff] %vm767_vm5, %v720_v15 }
  0xfe   : > { %791 = vst.msk [vmem:[#allocation2 + $0xcf] sm:$0xfe] %vm765_vm6, %v718_v16 }
 0x100   : > { %v724_v1 = vpop.permute.xlu1 %723  ;;  %v722_v17 = vpop.permute.xlu0 %721 }
 0x101   : > { %794 = vst.msk [vmem:[#allocation2 + $0xe7] sm:$0xff] %vm767_vm5, %v724_v1 }
 0x102   : > { %793 = vst.msk [vmem:[#allocation2 + $0xdf] sm:$0xfe] %vm765_vm6, %v722_v17 }
 0x104   : > { %v728_v18 = vpop.permute.xlu1 %727  ;;  %v726_v19 = vpop.permute.xlu0 %725 }
 0x105   : > { %796 = vst.msk [vmem:[#allocation2 + $0xf7] sm:$0xff] %vm767_vm5, %v728_v18 }
 0x106   : > { %795 = vst.msk [vmem:[#allocation2 + $0xef] sm:$0xfe] %vm765_vm6, %v726_v19 }
 0x108   : > { %v732_v20 = vpop.permute.xlu1 %731  ;;  %v730_v21 = vpop.permute.xlu0 %729 }
 0x109   : > { %798 = vst.msk [vmem:[#allocation2 + $0x107] sm:$0xff] %vm767_vm5, %v732_v20 }
 0x10a   : > { %797 = vst.msk [vmem:[#allocation2 + $0xff] sm:$0xfe] %vm765_vm6, %v730_v21 }
 0x10b PF: > { %v1772_v2 = vld [vmem:[%s2928_s3 + $0x10] sm:$0xff]  ;;  %v1773_v23 = vld [vmem:[%s2928_s3 + $0x18] sm:$0xf]  ;;  %vm891_vm7 = vcmask 1043456   ;;  %v818_v30 = vld [vmem:[%s2928_s3] sm:$0xff]  ;;  %vm2129_vm8 = vmmov 1  }
 0x10c   : > { %v1990_v31 = vpack.c.bf16 %v1773_v23, %v1772_v2  ;;  %vm2723_vm9 = vmpackc.low %vm891_vm7, %vm2129_vm8  ;;  %v819_v37 = vld [vmem:[%s2928_s3 + $0x8] sm:$0xf]  ;;  %s1849_s17 = sshll.u32 %s2108_s21, 7  ;;  %v1826_v38 = vld [vmem:[%s2928_s3 + $0x20] sm:$0xff]  ;;  %vm842_vm10 = vcmask 97280   ;;  %vm1493_vm11 = vcmask 31744  }
 0x10d   : > { %v1996_v39 = vpack.c.bf16 %v819_v37, %v818_v30  ;;  %v1827_v42 = vld [vmem:[%s2928_s3 + $0x28] sm:$0xf]  ;;  %s2739_s29 = scalar_lea.vmem [#allocation2], %s1849_s17  ;;  %v2826_v52 = vld [vmem:[%s2929_s4] ss:$0 sm:$0xff]  ;;  %vm1601_vm12 = vcmask 1040384  }
 0x10e   : > { %1992 = vmatprep.subr.msk.bf16.mxu1 %vm2723_vm9, %v1990_v31  ;;  %v2002_v63 = vpack.c.bf16 %v1827_v42, %v1826_v38  ;;  %vm1604_vm13 = vcmask 25600  }
 0x10f   : > { %1998 = vmatprep.subr.msk.bf16.mxu0 %vm2723_vm9, %v1996_v39  ;;  %1995 = vmatpush3.bf16.msk.msra.mxu1 %vm2723_vm9, %v1990_v31 }
 0x110   : > { %2001 = vmatpush3.bf16.msk.msra.mxu0 %vm2723_vm9, %v1996_v39  ;;  %2008 = vmatprep.subr.msk.bf16.mxu1 %vm2723_vm9, %v1996_v39 }
 0x111   : > { %v1756_v55 = vld [vmem:[%s2739_s29 + $0x10] sm:$0xff]  ;;  %v802_v62 = vld [vmem:[%s2739_s29] sm:$0xff]  ;;  %v1757_v0 = vld [vmem:[%s2739_s29 + $0x18] sm:$0xff]  ;;  %2004 = vmatprep.subr.msk.bf16.mxu0 %vm2723_vm9, %v2002_v63 }
 0x112   : > { %1910 = vmatprep.mubr.msk.f32.mxu1 %vm842_vm10, %v1756_v55  ;;  %v803_v7 = vld [vmem:[%s2739_s29 + $0x8] sm:$0xff]  ;;  %1938 = vmatprep.mubr.msk.f32.mxu0 %vm842_vm10, %v802_v62  ;;  %v1758_v8 = vld [vmem:[%s2739_s29 + $0x20] sm:$0xff]  ;;  %v1760_v12 = vld [vmem:[%s2739_s29 + $0x30] sm:$0xff] }
 0x113   : > { %1911 = vmatmul.mubr.msk.f32.vlgmr.msra.gmra.mrb[0].mxu1 %vm842_vm10, %v1757_v0  ;;  %1939 = vmatmul.mubr.msk.f32.vlgmr.msra.gmra.mrb[0].mxu0 %vm842_vm10, %v803_v7  ;;  %v1759_v9 = vld [vmem:[%s2739_s29 + $0x28] sm:$0xff]  ;;  %v1761_v22 = vld [vmem:[%s2739_s29 + $0x38] sm:$0xff]  ;;  %v1762_v24 = vld [vmem:[%s2739_s29 + $0x40] sm:$0xff] }
 0x114   : > { %2009 = vmatpush3.bf16.msk.msra.mxu1 %vm2723_vm9, %v1996_v39  ;;  %2007 = vmatpush3.bf16.msk.msra.mxu0 %vm2723_vm9, %v2002_v63  ;;  %v1763_v25 = vld [vmem:[%s2739_s29 + $0x48] sm:$0xff]  ;;  %v1764_v26 = vld [vmem:[%s2739_s29 + $0x50] sm:$0xff]  ;;  %v1765_v27 = vld [vmem:[%s2739_s29 + $0x58] sm:$0xff] }
 0x115   : > { %1913 = vmatprep.mubr.msk.f32.mxu1 %vm842_vm10, %v1758_v8  ;;  %1941 = vmatprep.mubr.msk.f32.mxu0 %vm842_vm10, %v1756_v55  ;;  %v1766_v28 = vld [vmem:[%s2739_s29 + $0x60] sm:$0xff]  ;;  %v1767_v29 = vld [vmem:[%s2739_s29 + $0x68] sm:$0xff]  ;;  %v1768_v33 = vld [vmem:[%s2739_s29 + $0x70] sm:$0xff] }
 0x116   : > { %v1769_v34 = vld [vmem:[%s2739_s29 + $0x78] sm:$0xff]  ;;  %v1770_v35 = vld [vmem:[%s2739_s29 + $0x80] sm:$0xff]  ;;  %v1771_v36 = vld [vmem:[%s2739_s29 + $0x88] sm:$0xff] }
 0x117   : > { %1914 = vmatmul.mubr.msk.f32.gmra.mrb[2].mxu1 %vm842_vm10, %v1759_v9  ;;  %1942 = vmatmul.mubr.msk.f32.gmra.mrb[2].mxu0 %vm842_vm10, %v1757_v0  ;;  %v1824_v40 = vld [vmem:[%s2739_s29 + $0x90] sm:$0xff]  ;;  %v1825_v41 = vld [vmem:[%s2739_s29 + $0x98] sm:$0xff] }
 0x118   : > { %1916 = vmatprep.mubr.msk.f32.mxu1 %vm842_vm10, %v1760_v12  ;;  %1944 = vmatprep.mubr.msk.f32.mxu0 %vm842_vm10, %v1758_v8 }
 0x11b   : > { %1917 = vmatmul.mubr.msk.f32.gmra.mrb[4].mxu1 %vm842_vm10, %v1761_v22  ;;  %1945 = vmatmul.mubr.msk.f32.gmra.mrb[4].mxu0 %vm842_vm10, %v1759_v9 }
 0x11c   : > { %1919 = vmatprep.mubr.msk.f32.mxu1 %vm842_vm10, %v1762_v24  ;;  %1947 = vmatprep.mubr.msk.f32.mxu0 %vm842_vm10, %v1760_v12 }
 0x11f   : > { %1920 = vmatmul.mubr.msk.f32.gmra.mrb[6].mxu1 %vm842_vm10, %v1763_v25  ;;  %1948 = vmatmul.mubr.msk.f32.gmra.mrb[6].mxu0 %vm842_vm10, %v1761_v22 }
 0x120   : > { %1922 = vmatprep.mubr.msk.f32.mxu1 %vm842_vm10, %v1764_v26  ;;  %1966 = vmatprep.mubr.msk.f32.mxu0 %vm842_vm10, %v1758_v8 }
 0x123   : > { %1923 = vmatmul.mubr.msk.f32.gmra.mrb[8].mxu1 %vm842_vm10, %v1765_v27  ;;  %1967 = vmatmul.mubr.msk.f32.vlgmr.msra.gmra.mrb[0].mxu0 %vm842_vm10, %v1759_v9 }
 0x124   : > { %1925 = vmatprep.mubr.msk.f32.mxu1 %vm842_vm10, %v1766_v28  ;;  %1969 = vmatprep.mubr.msk.f32.mxu0 %vm842_vm10, %v1760_v12 }
 0x127   : > { %1926 = vmatmul.mubr.msk.f32.gmra.mrb[10].mxu1 %vm842_vm10, %v1767_v29  ;;  %1970 = vmatmul.mubr.msk.f32.gmra.mrb[2].mxu0 %vm842_vm10, %v1761_v22 }
 0x128   : > { %1928 = vmatprep.mubr.msk.f32.mxu1 %vm842_vm10, %v1768_v33  ;;  %1972 = vmatprep.mubr.msk.f32.mxu0 %vm842_vm10, %v1762_v24 }
 0x12b   : > { %1929 = vmatmul.mubr.msk.f32.gmra.mrb[12].mxu1 %vm842_vm10, %v1769_v34  ;;  %1973 = vmatmul.mubr.msk.f32.gmra.mrb[4].mxu0 %vm842_vm10, %v1763_v25 }
 0x12c   : > { %1931 = vmatprep.mubr.msk.f32.mxu1 %vm842_vm10, %v1770_v35  ;;  %1975 = vmatprep.mubr.msk.f32.mxu0 %vm842_vm10, %v1764_v26 }
 0x12f   : > { %1932 = vmatmul.mubr.msk.f32.gmra.mrb[14].mxu1 %vm842_vm10, %v1771_v36  ;;  %1976 = vmatmul.mubr.msk.f32.gmra.mrb[6].mxu0 %vm842_vm10, %v1765_v27 }
 0x130   : > { %1950 = vmatprep.mubr.msk.f32.mxu1 %vm842_vm10, %v1762_v24  ;;  %1978 = vmatprep.mubr.msk.f32.mxu0 %vm842_vm10, %v1766_v28 }
 0x133   : > { %1951 = vmatmul.mubr.msk.f32.vlgmr.msra.gmra.mrb[8].mxu1 %vm842_vm10, %v1763_v25  ;;  %1979 = vmatmul.mubr.msk.f32.gmra.mrb[8].mxu0 %vm842_vm10, %v1767_v29 }
 0x134   : > { %1953 = vmatprep.mubr.msk.f32.mxu1 %vm842_vm10, %v1764_v26  ;;  %1981 = vmatprep.mubr.msk.f32.mxu0 %vm842_vm10, %v1768_v33 }
 0x137   : > { %1954 = vmatmul.mubr.msk.f32.gmra.mrb[10].mxu1 %vm842_vm10, %v1765_v27  ;;  %1982 = vmatmul.mubr.msk.f32.gmra.mrb[10].mxu0 %vm842_vm10, %v1769_v34 }
 0x138   : > { %1956 = vmatprep.mubr.msk.f32.mxu1 %vm842_vm10, %v1766_v28  ;;  %1984 = vmatprep.mubr.msk.f32.mxu0 %vm842_vm10, %v1770_v35 }
 0x13b   : > { %1957 = vmatmul.mubr.msk.f32.gmra.mrb[12].mxu1 %vm842_vm10, %v1767_v29  ;;  %1985 = vmatmul.mubr.msk.f32.gmra.mrb[12].mxu0 %vm842_vm10, %v1771_v36 }
 0x13c   : > { %1959 = vmatprep.mubr.msk.f32.mxu1 %vm842_vm10, %v1768_v33  ;;  %1987 = vmatprep.mubr.msk.f32.mxu0 %vm842_vm10, %v1824_v40 }
 0x13f   : > { %1960 = vmatmul.mubr.msk.f32.gmra.mrb[14].mxu1 %vm842_vm10, %v1769_v34  ;;  %1988 = vmatmul.mubr.msk.f32.gmra.mrb[14].mxu0 %vm842_vm10, %v1825_v41 }
 0x1e6   : > { %v1912_v43 = vpop.f32.mrb[0].mxu1 }
 0x1e7   : > { %v961_v44 = vpop.f32.mrb[1].mxu1 }
 0x1ea   : > { %v1915_v45 = vpop.f32.mrb[2].mxu1 }
 0x1eb   : > { %v971_v46 = vpop.f32.mrb[3].mxu1 }
 0x1ee   : > { %v1918_v47 = vpop.f32.mrb[4].mxu1 }
 0x1ef   : > { %v981_v48 = vpop.f32.mrb[5].mxu1 }
 0x1f2   : > { %v1921_v49 = vpop.f32.mrb[6].mxu1 }
 0x1f3   : > { %v991_v50 = vpop.f32.mrb[7].mxu1 }
 0x1f6   : > { %v1968_v51 = vpop.f32.mrb[0].mxu0 }
 0x1f7   : > { %v2010_v53 = vadd.f32 %v1968_v51, %v1912_v43  ;;  %v1375_v54 = vpop.f32.mrb[1].mxu0 }
 0x1f8   : > { %v2011_v56 = vadd.f32 %v1375_v54, %v961_v44 }
 0x1f9   : > { %v1478_v57 = vadd.f32 %v2010_v53, %v2826_v52 }
 0x1fa   : > { %v1477_v58 = vadd.f32 %v2011_v56, %v2826_v52  ;;  %v1971_v59 = vpop.f32.mrb[2].mxu0 }
 0x1fb   : > { %1495 = vst.msk [vmem:[%s2211_s19 + $0x8] sm:$0xff] %vm1493_vm11, %v1478_v57  ;;  %v1511_v60 = vsel %vm1493_vm11, %v1478_v57, 0.0  ;;  %v1548_v61 = vmul.f32 %v1478_v57, %v1478_v57  ;;  %v2012_v3 = vadd.f32 %v1971_v59, %v1915_v45  ;;  %v1385_v4 = vpop.f32.mrb[3].mxu0 }
 0x1fc   : > { %1494 = vst.msk [vmem:[%s2211_s19] sm:$0xff] %vm1493_vm11, %v1477_v58  ;;  %v1510_v5 = vsel %vm1493_vm11, %v1477_v58, 0.0  ;;  %v1547_v6 = vmul.f32 %v1477_v58, %v1477_v58  ;;  %v2013_v10 = vadd.f32 %v1385_v4, %v971_v46 }
 0x1fd   : > { %v1564_v11 = vsel %vm1493_vm11, %v1548_v61, 0.0  ;;  %v1512_v13 = vadd.f32 %v1511_v60, %v1510_v5  ;;  %v1480_v14 = vadd.f32 %v2012_v3, %v2826_v52 }
 0x1fe   : > { %v1563_v15 = vsel %vm1493_vm11, %v1547_v6, 0.0  ;;  %v1479_v16 = vadd.f32 %v2013_v10, %v2826_v52  ;;  %v1974_v1 = vpop.f32.mrb[4].mxu0 }
 0x1ff   : > { %v1565_v17 = vadd.f32 %v1564_v11, %v1563_v15  ;;  %1497 = vst.msk [vmem:[%s2211_s19 + $0x18] sm:$0xff] %vm1493_vm11, %v1480_v14  ;;  %v1550_v18 = vmul.f32 %v1480_v14, %v1480_v14  ;;  %v2014_v19 = vadd.f32 %v1974_v1, %v1918_v47  ;;  %v1395_v20 = vpop.f32.mrb[5].mxu0  ;;  %v1515_v32 = vsel %vm1493_vm11, %v1480_v14, 0.0 }
 0x200   : > { %1496 = vst.msk [vmem:[%s2211_s19 + $0x10] sm:$0xff] %vm1493_vm11, %v1479_v16  ;;  %v1513_v21 = vsel %vm1493_vm11, %v1479_v16, 0.0  ;;  %v1549_v2 = vmul.f32 %v1479_v16, %v1479_v16  ;;  %v2015_v23 = vadd.f32 %v1395_v20, %v981_v48 }
 0x201   : > { %v1514_v30 = vadd.f32 %v1513_v21, %v1512_v13  ;;  %v1482_v31 = vadd.f32 %v2014_v19, %v2826_v52  ;;  %v1568_v42 = vsel %vm1493_vm11, %v1550_v18, 0.0 }
 0x202   : > { %v1566_v37 = vsel %vm1493_vm11, %v1549_v2, 0.0  ;;  %v1481_v38 = vadd.f32 %v2015_v23, %v2826_v52  ;;  %v1977_v39 = vpop.f32.mrb[6].mxu0 }
 0x203   : > { %v1567_v55 = vadd.f32 %v1566_v37, %v1565_v17  ;;  %1499 = vst.msk [vmem:[%s2211_s19 + $0x28] sm:$0xff] %vm1493_vm11, %v1482_v31  ;;  %v1552_v62 = vmul.f32 %v1482_v31, %v1482_v31  ;;  %v1516_v63 = vadd.f32 %v1515_v32, %v1514_v30  ;;  %v1405_v0 = vpop.f32.mrb[7].mxu0  ;;  %v2016_v9 = vadd.f32 %v1977_v39, %v1921_v49 }
 0x204   : > { %1498 = vst.msk [vmem:[%s2211_s19 + $0x20] sm:$0xff] %vm1493_vm11, %v1481_v38  ;;  %v1517_v7 = vsel %vm1493_vm11, %v1481_v38, 0.0  ;;  %v1551_v8 = vmul.f32 %v1481_v38, %v1481_v38  ;;  %v2017_v12 = vadd.f32 %v1405_v0, %v991_v50  ;;  %v1519_v26 = vsel %vm1493_vm11, %v1482_v31, 0.0 }
 0x205   : > { %v1518_v22 = vadd.f32 %v1517_v7, %v1516_v63  ;;  %v1569_v24 = vadd.f32 %v1568_v42, %v1567_v55  ;;  %v1484_v28 = vadd.f32 %v2016_v9, %v2826_v52  ;;  %v1572_v43 = vsel %vm1493_vm11, %v1552_v62, 0.0 }
 0x206   : > { %v1952_v25 = vpop.f32.mrb[8].mxu1  ;;  %v1570_v27 = vsel %vm1493_vm11, %v1551_v8, 0.0  ;;  %v1483_v29 = vadd.f32 %v2017_v12, %v2826_v52  ;;  %v1980_v33 = vpop.f32.mrb[8].mxu0 }
 0x207   : > { %v1197_v34 = vpop.f32.mrb[9].mxu1  ;;  %v1571_v35 = vadd.f32 %v1570_v27, %v1569_v24  ;;  %v1520_v36 = vadd.f32 %v1519_v26, %v1518_v22  ;;  %v2018_v40 = vadd.f32 %v1980_v33, %v1952_v25  ;;  %v1415_v41 = vpop.f32.mrb[9].mxu0  ;;  %1501 = vst.msk [vmem:[%s2211_s19 + $0x38] sm:$0xff] %vm1493_vm11, %v1484_v28  ;;  %v1554_v44 = vmul.f32 %v1484_v28, %v1484_v28 }
 0x208   : > { %1500 = vst.msk [vmem:[%s2211_s19 + $0x30] sm:$0xff] %vm1493_vm11, %v1483_v29  ;;  %v1521_v45 = vsel %vm1493_vm11, %v1483_v29, 0.0  ;;  %v1553_v46 = vmul.f32 %v1483_v29, %v1483_v29  ;;  %v2019_v50 = vadd.f32 %v1415_v41, %v1197_v34  ;;  %v1523_v57 = vsel %vm1493_vm11, %v1484_v28, 0.0 }
 0x209   : > { %v1522_v47 = vadd.f32 %v1521_v45, %v1520_v36  ;;  %v1573_v48 = vadd.f32 %v1572_v43, %v1571_v35  ;;  %v1486_v49 = vadd.f32 %v2018_v40, %v2826_v52  ;;  %v1576_v58 = vsel %vm1493_vm11, %v1554_v44, 0.0 }
 0x20a   : > { %v1955_v51 = vpop.f32.mrb[10].mxu1  ;;  %v1574_v53 = vsel %vm1493_vm11, %v1553_v46, 0.0  ;;  %v1983_v54 = vpop.f32.mrb[10].mxu0  ;;  %v1485_v60 = vadd.f32 %v2019_v50, %v2826_v52 }
 0x20b   : > { %v1207_v56 = vpop.f32.mrb[11].mxu1  ;;  %v1575_v59 = vadd.f32 %v1574_v53, %v1573_v48  ;;  %1503 = vst.msk [vmem:[%s2211_s19 + $0x48] sm:$0xff] %vm1493_vm11, %v1486_v49  ;;  %v1425_v61 = vpop.f32.mrb[11].mxu0  ;;  %v1556_v3 = vmul.f32 %v1486_v49, %v1486_v49  ;;  %v1524_v4 = vadd.f32 %v1523_v57, %v1522_v47  ;;  %v2020_v5 = vadd.f32 %v1983_v54, %v1955_v51 }
 0x20c   : > { %v2021_v6 = vadd.f32 %v1425_v61, %v1207_v56  ;;  %1502 = vst.msk [vmem:[%s2211_s19 + $0x40] sm:$0xff] %vm1493_vm11, %v1485_v60  ;;  %v1525_v10 = vsel %vm1493_vm11, %v1485_v60, 0.0  ;;  %v1555_v11 = vmul.f32 %v1485_v60, %v1485_v60  ;;  %v1527_v19 = vsel %vm1493_vm11, %v1486_v49, 0.0 }
 0x20d   : > { %v1577_v13 = vadd.f32 %v1576_v58, %v1575_v59  ;;  %v1526_v15 = vadd.f32 %v1525_v10, %v1524_v4  ;;  %v1488_v16 = vadd.f32 %v2020_v5, %v2826_v52  ;;  %v1580_v23 = vsel %vm1493_vm11, %v1556_v3, 0.0 }
 0x20e   : > { %v1958_v14 = vpop.f32.mrb[12].mxu1  ;;  %v1487_v1 = vadd.f32 %v2021_v6, %v2826_v52  ;;  %v1986_v17 = vpop.f32.mrb[12].mxu0  ;;  %v1578_v20 = vsel %vm1493_vm11, %v1555_v11, 0.0 }
 0x20f   : > { %v1217_v18 = vpop.f32.mrb[13].mxu1  ;;  %v2022_v21 = vadd.f32 %v1986_v17, %v1958_v14  ;;  %v1435_v2 = vpop.f32.mrb[13].mxu0  ;;  %v1579_v30 = vadd.f32 %v1578_v20, %v1577_v13  ;;  %1505 = vst.msk [vmem:[%s2211_s19 + $0x58] sm:$0xff] %vm1493_vm11, %v1488_v16  ;;  %v1558_v31 = vmul.f32 %v1488_v16, %v1488_v16  ;;  %v1528_v32 = vadd.f32 %v1527_v19, %v1526_v15 }
 0x210   : > { %1504 = vst.msk [vmem:[%s2211_s19 + $0x50] sm:$0xff] %vm1493_vm11, %v1487_v1  ;;  %v1529_v37 = vsel %vm1493_vm11, %v1487_v1, 0.0  ;;  %v1557_v38 = vmul.f32 %v1487_v1, %v1487_v1  ;;  %v2023_v42 = vadd.f32 %v1435_v2, %v1217_v18  ;;  %v1531_v8 = vsel %vm1493_vm11, %v1488_v16, 0.0  ;;  %v1600_v1 = vld [vmem:[%s2206_s16] sm:$0x3] }
 0x211   : > { %v1490_v39 = vadd.f32 %v2022_v21, %v2826_v52  ;;  %v1530_v62 = vadd.f32 %v1529_v37, %v1528_v32  ;;  %v1581_v63 = vadd.f32 %v1580_v23, %v1579_v30  ;;  %v1584_v28 = vsel %vm1493_vm11, %v1558_v31, 0.0 }
 0x212   : > { %v1961_v55 = vpop.f32.mrb[14].mxu1  ;;  %v1989_v0 = vpop.f32.mrb[14].mxu0  ;;  %v1582_v9 = vsel %vm1493_vm11, %v1557_v38, 0.0  ;;  %v1489_v12 = vadd.f32 %v2023_v42, %v2826_v52 }
 0x213   : > { %v1227_v7 = vpop.f32.mrb[15].mxu1  ;;  %1507 = vst.msk [vmem:[%s2211_s19 + $0x68] sm:$0xff] %vm1493_vm11, %v1490_v39  ;;  %v1445_v22 = vpop.f32.mrb[15].mxu0  ;;  %v1583_v24 = vadd.f32 %v1582_v9, %v1581_v63  ;;  %v1532_v25 = vadd.f32 %v1531_v8, %v1530_v62  ;;  %v2024_v26 = vadd.f32 %v1989_v0, %v1961_v55  ;;  %v1560_v29 = vmul.f32 %v1490_v39, %v1490_v39 }
 0x214   : > { %v2025_v27 = vadd.f32 %v1445_v22, %v1227_v7  ;;  %1506 = vst.msk [vmem:[%s2211_s19 + $0x60] sm:$0xff] %vm1493_vm11, %v1489_v12  ;;  %v1533_v33 = vsel %vm1493_vm11, %v1489_v12, 0.0  ;;  %v1559_v34 = vmul.f32 %v1489_v12, %v1489_v12  ;;  %v1535_v43 = vsel %vm1493_vm11, %v1490_v39, 0.0 }
 0x215   : > { %v1534_v35 = vadd.f32 %v1533_v33, %v1532_v25  ;;  %v1585_v36 = vadd.f32 %v1584_v28, %v1583_v24  ;;  %v1492_v40 = vadd.f32 %v2024_v26, %v2826_v52  ;;  %v1588_v47 = vsel %vm1493_vm11, %v1560_v29, 0.0 }
 0x216   : > { %v1491_v41 = vadd.f32 %v2025_v27, %v2826_v52  ;;  %v1586_v44 = vsel %vm1493_vm11, %v1559_v34, 0.0 }
 0x217   : > { %v1587_v45 = vadd.f32 %v1586_v44, %v1585_v36  ;;  %1509 = vst.msk [vmem:[%s2211_s19 + $0x78] sm:$0xff] %vm1493_vm11, %v1492_v40  ;;  %v1536_v46 = vadd.f32 %v1535_v43, %v1534_v35  ;;  %v1562_v48 = vmul.f32 %v1492_v40, %v1492_v40  ;;  %v1539_v52 = vsel %vm1493_vm11, %v1492_v40, 0.0 }
 0x218   : > { %1508 = vst.msk [vmem:[%s2211_s19 + $0x70] sm:$0xff] %vm1493_vm11, %v1491_v41  ;;  %v1537_v49 = vsel %vm1493_vm11, %v1491_v41, 0.0  ;;  %v1561_v50 = vmul.f32 %v1491_v41, %v1491_v41 }
 0x219   : > { %v1538_v51 = vadd.f32 %v1537_v49, %v1536_v46  ;;  %v1589_v53 = vadd.f32 %v1588_v47, %v1587_v45  ;;  %v1592_v58 = vsel %vm1493_vm11, %v1562_v48, 0.0 }
 0x21a   : > { %v1590_v54 = vsel %vm1493_vm11, %v1561_v50, 0.0 }
 0x21b   : > { %v1540_v56 = vadd.f32 %v1539_v52, %v1538_v51  ;;  %v1591_v57 = vadd.f32 %v1590_v54, %v1589_v53 }
 0x21d   : > { %v1541_v59 = vrot.slane %v1540_v56, 4  ;;  %v1593_v60 = vadd.f32 %v1592_v58, %v1591_v57 }
 0x21f   : > { %v1542_v61 = vadd.f32 %v1541_v59, %v1540_v56  ;;  %v1594_v3 = vrot.slane %v1593_v60, 4 }
 0x221   : > { %v1543_v4 = vrot.slane %v1542_v61, 2  ;;  %v1595_v5 = vadd.f32 %v1594_v3, %v1593_v60 }
 0x223   : > { %v1544_v6 = vadd.f32 %v1543_v4, %v1542_v61  ;;  %v1596_v10 = vrot.slane %v1595_v5, 2 }
 0x225   : > { %v1545_v11 = vrot.slane %v1544_v6, 1  ;;  %v1597_v13 = vadd.f32 %v1596_v10, %v1595_v5 }
 0x227   : > { %v1598_v14 = vrot.slane %v1597_v13, 1  ;;  %v1546_v15 = vadd.f32 %v1545_v11, %v1544_v6 }
 0x229   : > { %v1599_v16 = vadd.f32 %v1598_v14, %v1597_v13 }
 0x22b   : > { %v1602_v17 = vsel %vm1601_vm12, %v1546_v15, %v1599_v16 }
 0x22c   : > { %v1603_v18 = vadd.f32 %v1602_v17, %v1600_v1 }
 0x22e   : > { %1605 = vst.msk [vmem:[%s2206_s16] sm:$0x3] %vm1604_vm13, %v1603_v18 }
 0x22f PF: > { %s17_s25 = sadd.s32 1, %s2124_s25   ;;  %s2934_s21 = smov %s2116_s23 }
 0x230   : > { %p14_p8 = scmp.ge.s32.totalorder %s17_s25, 6   ;;  %s2935_s22 = smov %s2120_s24 }
 0x231   : > { %s2936_s23 = smov %s2939_s26  ;;  %s2937_s24 = smov %s2943_s27 }
 0x232   :  { %16 = sbr.rel (!%p14_p8) target bundleno = 3 (0x3), region = 92 }

</bundles_post_ra>
